<compile_context>
chip_gen: v6e
topology: v6e:2x2x1
jax: 0.10.0
libtpu: 0.0.40
codegen_flags: <defaults>
</compile_context>

<pallas_src>
import numpy as np

import jax
import jax.numpy as jnp
from jax.experimental import pallas as pl
from jax.experimental.pallas import tpu as pltpu


# ---------------------------------------------------------------------------
# Single fused Pallas kernel: conv1..conv4 (+folded BN + ReLU) + folded FC head
# ---------------------------------------------------------------------------
def _classifier_kernel(p1_ref, w1_ref, sb1_ref,
                       s2_ref, w2_ref, sb2_ref,
                       s3_ref, w3_ref, sb3_ref,
                       w4_ref, sb4_ref,
                       wh_ref, bh_ref,
                       o_ref):
    f32 = jnp.float32
    bf16 = jnp.bfloat16

    def bn_relu(acc, sb_ref):
        # acc: (rows, C) f32; sb_ref: (2, C) f32 with row 0 = scale, row 1 = bias.
        return jnp.maximum(acc * sb_ref[0:1, :] + sb_ref[1:2, :], 0.0)

    def conv_block(x, s_ref, w_ref, sb_ref):
        # x:     (B*rows_in, C_in)       f32  VMEM-resident activations
        # s_ref: (9, rows_out, rows_in)  bf16 per-IMAGE one-hot row gathers
        # w_ref: (9*C_in, C_out)         bf16 K-stacked per-tap conv weights
        taps, rows_out, rows_in = s_ref.shape
        batch = x.shape[0] // rows_in                 # static
        xb = x.astype(bf16)
        cols = []
        for t in range(taps):                         # static unroll (9 taps)
            st = s_ref[t]
            per_img = [
                jnp.dot(st, xb[b * rows_in:(b + 1) * rows_in, :],
                        preferred_element_type=f32)   # exact: one-hot selection
                for b in range(batch)
            ]
            cols.append(per_img[0] if batch == 1
                        else jnp.concatenate(per_img, axis=0))
        # One K-stacked weight GEMM replaces 9 tiny per-tap GEMMs; a single
        # downcast replaces the 9 per-tap casts.
        g = jnp.concatenate(cols, axis=1).astype(bf16)   # (B*rows_out, 9*C_in)
        acc = jnp.dot(g, w_ref[...], preferred_element_type=f32)
        return bn_relu(acc, sb_ref)

    # conv1: patch matrix (B*196, 9) built from the raw input in the wrapper.
    a = jnp.dot(p1_ref[...], w1_ref[...], preferred_element_type=f32)
    a = bn_relu(a, sb1_ref)                          # (B*196, 32)

    a = conv_block(a, s2_ref, w2_ref, sb2_ref)       # (B*49, 64)
    a = conv_block(a, s3_ref, w3_ref, sb3_ref)       # (B*16, 128)

    # conv4: 4x4 input, k=3, stride=3, pad=0 -> one output position per image;
    # its 9 taps are the fixed per-image rows {i*4 + j}.  Build the (B, 1152)
    # patch with static slices / lane concat (no gather matmuls, no s4 DMA).
    rows_img = 16
    batch = a.shape[0] // rows_img                   # static
    ab = a.astype(bf16)
    img_rows = []
    for b in range(batch):
        taps = [ab[b * rows_img + i * 4 + j:b * rows_img + i * 4 + j + 1, :]
                for i in range(3) for j in range(3)]
        img_rows.append(jnp.concatenate(taps, axis=1))           # (1, 1152)
    patch4 = (img_rows[0] if batch == 1
              else jnp.concatenate(img_rows, axis=0))            # (B, 1152)
    feat = bn_relu(jnp.dot(patch4, w4_ref[...], preferred_element_type=f32),
                   sb4_ref)                                      # (B, 256)

    # Head: class_fc(mu_fc(feat)) folded into one (256, 1) GEMM, then sigmoid.
    logit = jnp.dot(feat.astype(bf16), wh_ref[...],
                    preferred_element_type=f32) + bh_ref[...]
    o_ref[...] = jax.nn.sigmoid(logit)


def classifier_forward(x, kp):
    """x: (B, 1, 28, 28) float32; kp: prepared kernel params. Returns (B,) float32."""
    B = x.shape[0]
    patches, _, _ = im2col(x, kh=3, kw=3, stride=2, padding=1)    # (B*196, 9)
    patches = patches.astype(jnp.bfloat16)

    operands = (patches, kp["w1"], kp["sb1"],
                kp["s2"], kp["w2"], kp["sb2"],
                kp["s3"], kp["w3"], kp["sb3"],
                kp["w4"], kp["sb4"],
                kp["wh"], kp["bh"])

    # Advisory cost estimate so XLA doesn't treat this tiny custom call as
    # expensive / serialize the surrounding ops.
    flops = 2 * B * (196 * 9 * 32                     # conv1 GEMM
                     + 9 * 49 * 196 * 32              # conv2 per-image gathers
                     + 49 * (9 * 32) * 64             # conv2 fused weight GEMM
                     + 9 * 16 * 49 * 64               # conv3 per-image gathers
                     + 16 * (9 * 64) * 128            # conv3 fused weight GEMM
                     + (9 * 128) * 256                # conv4 GEMM
                     + 256)                           # folded head GEMM
    bytes_accessed = sum(int(a.size) * int(np.dtype(a.dtype).itemsize)
                         for a in operands) + B * 4
    cost = pl.CostEstimate(flops=flops, transcendentals=B,
                           bytes_accessed=bytes_accessed)

    vmem = pl.BlockSpec(memory_space=pltpu.MemorySpace.VMEM)
    # Single un-gridded call: batch stays stacked in the GEMM M dimension
    # (v5e/v6e have one TensorCore and the MXU rows are already under-filled).
    # For v7x at larger B: grid=(B,), dimension_semantics=("parallel",),
    # per-image BlockSpecs for patches/output (weights with constant
    # index_map), and an explicit vmem_limit_bytes sized against 64 MiB.
    out = pl.pallas_call(
        _classifier_kernel,
        out_shape=jax.ShapeDtypeStruct((B, 1), jnp.float32),
        in_specs=[vmem] * len(operands),
        out_specs=vmem,
        cost_estimate=cost,
    )(*operands)
    return out[:, 0]


# ---------------------------------------------------------------------------
# JAX glue for conv1 only (raw input -> patch matrix); later layers gather
# in-kernel so intermediate activations never leave VMEM.
# ---------------------------------------------------------------------------
def im2col(x, kh, kw, stride, padding):
    """x: (B, C, H, W) -> (B*OH*OW, C*kh*kw) patch matrix, plus (OH, OW)."""
    B, C, H, W = x.shape
    if padding > 0:
        x = jnp.pad(x, ((0, 0), (0, 0), (padding, padding), (padding, padding)))
    Hp, Wp = x.shape[2], x.shape[3]
    OH = (Hp - kh) // stride + 1
    OW = (Wp - kw) // stride + 1
    cols = []
    for i in range(kh):
        for j in range(kw):
            cols.append(x[:, :, i:i + stride * OH:stride, j:j + stride * OW:stride])
    cols = jnp.stack(cols, axis=0).reshape(kh, kw, B, C, OH, OW)
    cols = cols.transpose(2, 4, 5, 3, 0, 1)        # (B, OH, OW, C, kh, kw)
    return cols.reshape(B * OH * OW, C * kh * kw), OH, OW


def _onehot_gather_mats(h, w, k, stride, padding):
    """Per-tap, per-IMAGE one-hot row-selection matrices implementing a strided,
    padded kxk im2col as k*k MXU gathers over one image's (H*W, C) activation
    block.  Returns (S, OH, OW); S: (k*k, OH*OW, H*W) float32 of {0,1}.  Taps
    landing in the zero-padding region select nothing (all-zero rows)."""
    oh = (h + 2 * padding - k) // stride + 1
    ow = (w + 2 * padding - k) // stride + 1
    S = np.zeros((k * k, oh * ow, h * w), np.float32)
    for i in range(k):
        for j in range(k):
            t = i * k + j
            for r in range(oh):
                ih = r * stride + i - padding
                if not 0 <= ih < h:
                    continue
                for c in range(ow):
                    iw = c * stride + j - padding
                    if 0 <= iw < w:
                        S[t, r * ow + c, ih * w + iw] = 1.0
    return S, oh, ow


# ---------------------------------------------------------------------------
# Parameter construction (deterministic, synthetic) and kernel-side packing
# ---------------------------------------------------------------------------
def make_conv_bn_params(key, cin, cout, k):
    ks = jax.random.split(key, 6)
    w = jax.random.normal(ks[0], (cout, cin, k, k), jnp.float32) * 0.1
    b = jax.random.normal(ks[1], (cout,), jnp.float32) * 0.1
    gamma = 1.0 + 0.1 * jax.random.normal(ks[2], (cout,), jnp.float32)
    beta = 0.1 * jax.random.normal(ks[3], (cout,), jnp.float32)
    r_mean = 0.1 * jax.random.normal(ks[4], (cout,), jnp.float32)
    r_var = jax.random.uniform(ks[5], (cout,), jnp.float32, 0.5, 1.5)
    return dict(w=w, b=b, gamma=gamma, beta=beta, mean=r_mean, var=r_var)


def make_linear_params(key, fin, fout):
    ks = jax.random.split(key, 2)
    bound = 1.0 / (fin ** 0.5)
    w = jax.random.uniform(ks[0], (fout, fin), jnp.float32, -bound, bound)
    b = jax.random.uniform(ks[1], (fout,), jnp.float32, -bound, bound)
    return dict(w=w, b=b)


def prepare_kernel_params(params, height, width, eps=1e-5):
    """Fold BN + conv bias, fold mu_fc∘class_fc, pack K-stacked conv weights,
    and build per-image one-hot gather matrices.  Done once, outside jit."""
    kp = {}

    def fold_bn(p):
        scale = p["gamma"] / jnp.sqrt(p["var"] + eps)
        bias = scale * (p["b"] - p["mean"]) + p["beta"]
        return jnp.stack([scale, bias], axis=0).astype(jnp.float32)   # (2, C)

    # conv1 -> plain GEMM weights for the wrapper-built (B*196, 9) patch matrix.
    p1 = params["conv1"]
    kp["w1"] = p1["w"].reshape(p1["w"].shape[0], -1).T.astype(jnp.bfloat16)  # (9, 32)
    kp["sb1"] = fold_bn(p1)

    # conv2..4 -> K-stacked per-tap weights; conv2/3 also get per-image gather
    # matrices (in-kernel im2col); conv4 taps are static slices in the kernel.
    h = (height + 2 * 1 - 3) // 2 + 1    # conv1 output spatial dims
    w = (width + 2 * 1 - 3) // 2 + 1
    for idx, (name, stride, pad, use_gather) in enumerate(
            [("conv2", 2, 1, True), ("conv3", 2, 1, True), ("conv4", 3, 0, False)],
            start=2):
        p = params[name]
        cout, cin, kh, kw = p["w"].shape
        if use_gather:
            S, oh, ow = _onehot_gather_mats(h, w, kh, stride, pad)
            kp[f"s{idx}"] = jnp.asarray(S, jnp.bfloat16)
        else:
            oh = (h + 2 * pad - kh) // stride + 1
            ow = (w + 2 * pad - kw) // stride + 1
        # K-stacked weights: row index = tap*C_in + c_in, tap = i*kw + j.
        kp[f"w{idx}"] = jnp.transpose(p["w"], (2, 3, 1, 0)).reshape(
            kh * kw * cin, cout).astype(jnp.bfloat16)
        kp[f"sb{idx}"] = fold_bn(p)
        h, w = oh, ow

    # mu_fc followed by class_fc is affine-of-affine -> fold into one (256,1) GEMM.
    wmu, bmu = params["mu_fc"]["w"], params["mu_fc"]["b"]
    wcl, bcl = params["class_fc"]["w"], params["class_fc"]["b"]
    kp["wh"] = (wmu.T @ wcl.T).astype(jnp.bfloat16)                 # (256, 1)
    kp["bh"] = (bmu @ wcl.T + bcl).reshape(1, 1).astype(jnp.float32)
    return kp


# ---------------------------------------------------------------------------
# Pure-JAX f32 reference (for correctness validation only)
# ---------------------------------------------------------------------------
def reference_forward(x, params, eps=1e-5):
    def block(x, p, stride, padding):
        y = jax.lax.conv_general_dilated(
            x, p["w"], window_strides=(stride, stride),
            padding=((padding, padding), (padding, padding)),
            dimension_numbers=("NCHW", "OIHW", "NCHW"))
        y = y + p["b"][None, :, None, None]
        inv = (p["gamma"] / jnp.sqrt(p["var"] + eps))[None, :, None, None]
        y = (y - p["mean"][None, :, None, None]) * inv + p["beta"][None, :, None, None]
        return jnp.maximum(y, 0.0)

    x = block(x, params["conv1"], 2, 1)
    x = block(x, params["conv2"], 2, 1)
    x = block(x, params["conv3"], 2, 1)
    x = block(x, params["conv4"], 3, 0)
    feat = x.reshape(x.shape[0], -1)
    mu = feat @ params["mu_fc"]["w"].T + params["mu_fc"]["b"]
    logits = mu @ params["class_fc"]["w"].T + params["class_fc"]["b"]
    return jax.nn.sigmoid(logits)[:, 0]


# ---------------------------------------------------------------------------
if __name__ == "__main__":
    latent_size = 16
    key = jax.random.PRNGKey(0)
    kx, k1, k2, k3, k4, kmu, klv, kcl = jax.random.split(key, 8)

    # 28x28 single-channel input (MNIST-style) so the flattened encoder
    # feature is 256, matching nn.Linear(256, latent_size).
    x = jax.random.normal(kx, (2, 1, 28, 28), jnp.float32)

    params = {
        "conv1": make_conv_bn_params(k1, 1, 32, 3),
        "conv2": make_conv_bn_params(k2, 32, 64, 3),
        "conv3": make_conv_bn_params(k3, 64, 128, 3),
        "conv4": make_conv_bn_params(k4, 128, 256, 3),
        "mu_fc": make_linear_params(kmu, 256, latent_size),
        "log_var_fc": make_linear_params(klv, 256, latent_size),  # unused by Classifier.forward
        "class_fc": make_linear_params(kcl, latent_size, 1),
    }

    kp = prepare_kernel_params(params, height=28, width=28)

    out = jax.jit(classifier_forward)(x, kp)
    out = jax.block_until_ready(out)

    assert out.shape == (2,), out.shape
    assert out.dtype == jnp.float32
    assert bool(jnp.all(jnp.isfinite(out)))
    assert bool(jnp.all((out >= 0.0) & (out <= 1.0)))

    # Validate against the pure-JAX f32 reference (bf16 MXU operands in the
    # kernel -> small tolerance on the sigmoid outputs).
    ref = reference_forward(x, params)
    max_err = float(jnp.max(jnp.abs(out - ref)))
    assert max_err < 5e-2, f"mismatch vs reference: {max_err}"

    print("KERNEL_OK")
</pallas_src>

<mosaic_0001>
module attributes {stable_mosaic.version = 11 : i64} {
  func.func @_classifier_kernel(%arg0: memref<392x9xbf16, #tpu.memory_space<vmem>>, %arg1: memref<9x32xbf16, #tpu.memory_space<vmem>>, %arg2: memref<2x32xf32, #tpu.memory_space<vmem>>, %arg3: memref<9x49x196xbf16, #tpu.memory_space<vmem>>, %arg4: memref<288x64xbf16, #tpu.memory_space<vmem>>, %arg5: memref<2x64xf32, #tpu.memory_space<vmem>>, %arg6: memref<9x16x49xbf16, #tpu.memory_space<vmem>>, %arg7: memref<576x128xbf16, #tpu.memory_space<vmem>>, %arg8: memref<2x128xf32, #tpu.memory_space<vmem>>, %arg9: memref<1152x256xbf16, #tpu.memory_space<vmem>>, %arg10: memref<2x256xf32, #tpu.memory_space<vmem>>, %arg11: memref<256x1xbf16, #tpu.memory_space<vmem>>, %arg12: memref<1x1xf32, #tpu.memory_space<vmem>>, %arg13: memref<2x1xf32, #tpu.memory_space<vmem>>) attributes {dimension_semantics = [], scalar_prefetch = 0 : i64, scratch_operands = 0 : i64, tpu.core_type = #tpu.core_type<tc>} {
    %c0 = arith.constant 0 : index
    %c0_0 = arith.constant 0 : index
    %0 = vector.load %arg0[%c0, %c0_0] : memref<392x9xbf16, #tpu.memory_space<vmem>>, vector<392x9xbf16>
    %c0_1 = arith.constant 0 : index
    %c0_2 = arith.constant 0 : index
    %1 = vector.load %arg1[%c0_1, %c0_2] : memref<9x32xbf16, #tpu.memory_space<vmem>>, vector<9x32xbf16>
    %cst = arith.constant dense<0.000000e+00> : vector<392x32xf32>
    %2 = tpu.matmul %0, %1, %cst {dimension_numbers = #tpu.dot_dimension_numbers<[1], [0], [0], [1], [0, 0, 1, 1], [], []>} : vector<392x9xbf16>, vector<9x32xbf16>, vector<392x32xf32> -> vector<392x32xf32>
    %c0_3 = arith.constant 0 : index
    %c0_4 = arith.constant 0 : index
    %3 = vector.load %arg2[%c0_3, %c0_4] : memref<2x32xf32, #tpu.memory_space<vmem>>, vector<1x32xf32>
    %4 = vector.broadcast %3 : vector<1x32xf32> to vector<392x32xf32>
    %5 = arith.mulf %2, %4 : vector<392x32xf32>
    %c1 = arith.constant 1 : index
    %c0_5 = arith.constant 0 : index
    %6 = vector.load %arg2[%c1, %c0_5] : memref<2x32xf32, #tpu.memory_space<vmem>>, vector<1x32xf32>
    %7 = vector.broadcast %6 : vector<1x32xf32> to vector<392x32xf32>
    %8 = arith.addf %5, %7 : vector<392x32xf32>
    %cst_6 = arith.constant 0.000000e+00 : f32
    %9 = vector.broadcast %cst_6 : f32 to vector<392x32xf32>
    %10 = arith.maximumf %8, %9 : vector<392x32xf32>
    %11 = arith.truncf %10 : vector<392x32xf32> to vector<392x32xbf16>
    %c0_7 = arith.constant 0 : index
    %c0_8 = arith.constant 0 : index
    %c0_9 = arith.constant 0 : index
    %12 = vector.load %arg3[%c0_7, %c0_8, %c0_9] : memref<9x49x196xbf16, #tpu.memory_space<vmem>>, vector<1x49x196xbf16>
    %13 = vector.shape_cast %12 : vector<1x49x196xbf16> to vector<49x196xbf16>
    %14 = vector.extract_strided_slice %11 {offsets = [0, 0], sizes = [196, 32], strides = [1, 1]} : vector<392x32xbf16> to vector<196x32xbf16>
    %cst_10 = arith.constant dense<0.000000e+00> : vector<49x32xf32>
    %15 = tpu.matmul %13, %14, %cst_10 {dimension_numbers = #tpu.dot_dimension_numbers<[1], [0], [0], [1], [0, 0, 1, 1], [], []>} : vector<49x196xbf16>, vector<196x32xbf16>, vector<49x32xf32> -> vector<49x32xf32>
    %16 = vector.extract_strided_slice %11 {offsets = [196, 0], sizes = [196, 32], strides = [1, 1]} : vector<392x32xbf16> to vector<196x32xbf16>
    %cst_11 = arith.constant dense<0.000000e+00> : vector<49x32xf32>
    %17 = tpu.matmul %13, %16, %cst_11 {dimension_numbers = #tpu.dot_dimension_numbers<[1], [0], [0], [1], [0, 0, 1, 1], [], []>} : vector<49x196xbf16>, vector<196x32xbf16>, vector<49x32xf32> -> vector<49x32xf32>
    %18 = tpu.concatenate %15, %17 in 0 : vector<49x32xf32>, vector<49x32xf32> -> vector<98x32xf32>
    %c1_12 = arith.constant 1 : index
    %c0_13 = arith.constant 0 : index
    %c0_14 = arith.constant 0 : index
    %19 = vector.load %arg3[%c1_12, %c0_13, %c0_14] : memref<9x49x196xbf16, #tpu.memory_space<vmem>>, vector<1x49x196xbf16>
    %20 = vector.shape_cast %19 : vector<1x49x196xbf16> to vector<49x196xbf16>
    %21 = vector.extract_strided_slice %11 {offsets = [0, 0], sizes = [196, 32], strides = [1, 1]} : vector<392x32xbf16> to vector<196x32xbf16>
    %cst_15 = arith.constant dense<0.000000e+00> : vector<49x32xf32>
    %22 = tpu.matmul %20, %21, %cst_15 {dimension_numbers = #tpu.dot_dimension_numbers<[1], [0], [0], [1], [0, 0, 1, 1], [], []>} : vector<49x196xbf16>, vector<196x32xbf16>, vector<49x32xf32> -> vector<49x32xf32>
    %23 = vector.extract_strided_slice %11 {offsets = [196, 0], sizes = [196, 32], strides = [1, 1]} : vector<392x32xbf16> to vector<196x32xbf16>
    %cst_16 = arith.constant dense<0.000000e+00> : vector<49x32xf32>
    %24 = tpu.matmul %20, %23, %cst_16 {dimension_numbers = #tpu.dot_dimension_numbers<[1], [0], [0], [1], [0, 0, 1, 1], [], []>} : vector<49x196xbf16>, vector<196x32xbf16>, vector<49x32xf32> -> vector<49x32xf32>
    %25 = tpu.concatenate %22, %24 in 0 : vector<49x32xf32>, vector<49x32xf32> -> vector<98x32xf32>
    %c2 = arith.constant 2 : index
    %c0_17 = arith.constant 0 : index
    %c0_18 = arith.constant 0 : index
    %26 = vector.load %arg3[%c2, %c0_17, %c0_18] : memref<9x49x196xbf16, #tpu.memory_space<vmem>>, vector<1x49x196xbf16>
    %27 = vector.shape_cast %26 : vector<1x49x196xbf16> to vector<49x196xbf16>
    %28 = vector.extract_strided_slice %11 {offsets = [0, 0], sizes = [196, 32], strides = [1, 1]} : vector<392x32xbf16> to vector<196x32xbf16>
    %cst_19 = arith.constant dense<0.000000e+00> : vector<49x32xf32>
    %29 = tpu.matmul %27, %28, %cst_19 {dimension_numbers = #tpu.dot_dimension_numbers<[1], [0], [0], [1], [0, 0, 1, 1], [], []>} : vector<49x196xbf16>, vector<196x32xbf16>, vector<49x32xf32> -> vector<49x32xf32>
    %30 = vector.extract_strided_slice %11 {offsets = [196, 0], sizes = [196, 32], strides = [1, 1]} : vector<392x32xbf16> to vector<196x32xbf16>
    %cst_20 = arith.constant dense<0.000000e+00> : vector<49x32xf32>
    %31 = tpu.matmul %27, %30, %cst_20 {dimension_numbers = #tpu.dot_dimension_numbers<[1], [0], [0], [1], [0, 0, 1, 1], [], []>} : vector<49x196xbf16>, vector<196x32xbf16>, vector<49x32xf32> -> vector<49x32xf32>
    %32 = tpu.concatenate %29, %31 in 0 : vector<49x32xf32>, vector<49x32xf32> -> vector<98x32xf32>
    %c3 = arith.constant 3 : index
    %c0_21 = arith.constant 0 : index
    %c0_22 = arith.constant 0 : index
    %33 = vector.load %arg3[%c3, %c0_21, %c0_22] : memref<9x49x196xbf16, #tpu.memory_space<vmem>>, vector<1x49x196xbf16>
    %34 = vector.shape_cast %33 : vector<1x49x196xbf16> to vector<49x196xbf16>
    %35 = vector.extract_strided_slice %11 {offsets = [0, 0], sizes = [196, 32], strides = [1, 1]} : vector<392x32xbf16> to vector<196x32xbf16>
    %cst_23 = arith.constant dense<0.000000e+00> : vector<49x32xf32>
    %36 = tpu.matmul %34, %35, %cst_23 {dimension_numbers = #tpu.dot_dimension_numbers<[1], [0], [0], [1], [0, 0, 1, 1], [], []>} : vector<49x196xbf16>, vector<196x32xbf16>, vector<49x32xf32> -> vector<49x32xf32>
    %37 = vector.extract_strided_slice %11 {offsets = [196, 0], sizes = [196, 32], strides = [1, 1]} : vector<392x32xbf16> to vector<196x32xbf16>
    %cst_24 = arith.constant dense<0.000000e+00> : vector<49x32xf32>
    %38 = tpu.matmul %34, %37, %cst_24 {dimension_numbers = #tpu.dot_dimension_numbers<[1], [0], [0], [1], [0, 0, 1, 1], [], []>} : vector<49x196xbf16>, vector<196x32xbf16>, vector<49x32xf32> -> vector<49x32xf32>
    %39 = tpu.concatenate %36, %38 in 0 : vector<49x32xf32>, vector<49x32xf32> -> vector<98x32xf32>
    %c4 = arith.constant 4 : index
    %c0_25 = arith.constant 0 : index
    %c0_26 = arith.constant 0 : index
    %40 = vector.load %arg3[%c4, %c0_25, %c0_26] : memref<9x49x196xbf16, #tpu.memory_space<vmem>>, vector<1x49x196xbf16>
    %41 = vector.shape_cast %40 : vector<1x49x196xbf16> to vector<49x196xbf16>
    %42 = vector.extract_strided_slice %11 {offsets = [0, 0], sizes = [196, 32], strides = [1, 1]} : vector<392x32xbf16> to vector<196x32xbf16>
    %cst_27 = arith.constant dense<0.000000e+00> : vector<49x32xf32>
    %43 = tpu.matmul %41, %42, %cst_27 {dimension_numbers = #tpu.dot_dimension_numbers<[1], [0], [0], [1], [0, 0, 1, 1], [], []>} : vector<49x196xbf16>, vector<196x32xbf16>, vector<49x32xf32> -> vector<49x32xf32>
    %44 = vector.extract_strided_slice %11 {offsets = [196, 0], sizes = [196, 32], strides = [1, 1]} : vector<392x32xbf16> to vector<196x32xbf16>
    %cst_28 = arith.constant dense<0.000000e+00> : vector<49x32xf32>
    %45 = tpu.matmul %41, %44, %cst_28 {dimension_numbers = #tpu.dot_dimension_numbers<[1], [0], [0], [1], [0, 0, 1, 1], [], []>} : vector<49x196xbf16>, vector<196x32xbf16>, vector<49x32xf32> -> vector<49x32xf32>
    %46 = tpu.concatenate %43, %45 in 0 : vector<49x32xf32>, vector<49x32xf32> -> vector<98x32xf32>
    %c5 = arith.constant 5 : index
    %c0_29 = arith.constant 0 : index
    %c0_30 = arith.constant 0 : index
    %47 = vector.load %arg3[%c5, %c0_29, %c0_30] : memref<9x49x196xbf16, #tpu.memory_space<vmem>>, vector<1x49x196xbf16>
    %48 = vector.shape_cast %47 : vector<1x49x196xbf16> to vector<49x196xbf16>
    %49 = vector.extract_strided_slice %11 {offsets = [0, 0], sizes = [196, 32], strides = [1, 1]} : vector<392x32xbf16> to vector<196x32xbf16>
    %cst_31 = arith.constant dense<0.000000e+00> : vector<49x32xf32>
    %50 = tpu.matmul %48, %49, %cst_31 {dimension_numbers = #tpu.dot_dimension_numbers<[1], [0], [0], [1], [0, 0, 1, 1], [], []>} : vector<49x196xbf16>, vector<196x32xbf16>, vector<49x32xf32> -> vector<49x32xf32>
    %51 = vector.extract_strided_slice %11 {offsets = [196, 0], sizes = [196, 32], strides = [1, 1]} : vector<392x32xbf16> to vector<196x32xbf16>
    %cst_32 = arith.constant dense<0.000000e+00> : vector<49x32xf32>
    %52 = tpu.matmul %48, %51, %cst_32 {dimension_numbers = #tpu.dot_dimension_numbers<[1], [0], [0], [1], [0, 0, 1, 1], [], []>} : vector<49x196xbf16>, vector<196x32xbf16>, vector<49x32xf32> -> vector<49x32xf32>
    %53 = tpu.concatenate %50, %52 in 0 : vector<49x32xf32>, vector<49x32xf32> -> vector<98x32xf32>
    %c6 = arith.constant 6 : index
    %c0_33 = arith.constant 0 : index
    %c0_34 = arith.constant 0 : index
    %54 = vector.load %arg3[%c6, %c0_33, %c0_34] : memref<9x49x196xbf16, #tpu.memory_space<vmem>>, vector<1x49x196xbf16>
    %55 = vector.shape_cast %54 : vector<1x49x196xbf16> to vector<49x196xbf16>
    %56 = vector.extract_strided_slice %11 {offsets = [0, 0], sizes = [196, 32], strides = [1, 1]} : vector<392x32xbf16> to vector<196x32xbf16>
    %cst_35 = arith.constant dense<0.000000e+00> : vector<49x32xf32>
    %57 = tpu.matmul %55, %56, %cst_35 {dimension_numbers = #tpu.dot_dimension_numbers<[1], [0], [0], [1], [0, 0, 1, 1], [], []>} : vector<49x196xbf16>, vector<196x32xbf16>, vector<49x32xf32> -> vector<49x32xf32>
    %58 = vector.extract_strided_slice %11 {offsets = [196, 0], sizes = [196, 32], strides = [1, 1]} : vector<392x32xbf16> to vector<196x32xbf16>
    %cst_36 = arith.constant dense<0.000000e+00> : vector<49x32xf32>
    %59 = tpu.matmul %55, %58, %cst_36 {dimension_numbers = #tpu.dot_dimension_numbers<[1], [0], [0], [1], [0, 0, 1, 1], [], []>} : vector<49x196xbf16>, vector<196x32xbf16>, vector<49x32xf32> -> vector<49x32xf32>
    %60 = tpu.concatenate %57, %59 in 0 : vector<49x32xf32>, vector<49x32xf32> -> vector<98x32xf32>
    %c7 = arith.constant 7 : index
    %c0_37 = arith.constant 0 : index
    %c0_38 = arith.constant 0 : index
    %61 = vector.load %arg3[%c7, %c0_37, %c0_38] : memref<9x49x196xbf16, #tpu.memory_space<vmem>>, vector<1x49x196xbf16>
    %62 = vector.shape_cast %61 : vector<1x49x196xbf16> to vector<49x196xbf16>
    %63 = vector.extract_strided_slice %11 {offsets = [0, 0], sizes = [196, 32], strides = [1, 1]} : vector<392x32xbf16> to vector<196x32xbf16>
    %cst_39 = arith.constant dense<0.000000e+00> : vector<49x32xf32>
    %64 = tpu.matmul %62, %63, %cst_39 {dimension_numbers = #tpu.dot_dimension_numbers<[1], [0], [0], [1], [0, 0, 1, 1], [], []>} : vector<49x196xbf16>, vector<196x32xbf16>, vector<49x32xf32> -> vector<49x32xf32>
    %65 = vector.extract_strided_slice %11 {offsets = [196, 0], sizes = [196, 32], strides = [1, 1]} : vector<392x32xbf16> to vector<196x32xbf16>
    %cst_40 = arith.constant dense<0.000000e+00> : vector<49x32xf32>
    %66 = tpu.matmul %62, %65, %cst_40 {dimension_numbers = #tpu.dot_dimension_numbers<[1], [0], [0], [1], [0, 0, 1, 1], [], []>} : vector<49x196xbf16>, vector<196x32xbf16>, vector<49x32xf32> -> vector<49x32xf32>
    %67 = tpu.concatenate %64, %66 in 0 : vector<49x32xf32>, vector<49x32xf32> -> vector<98x32xf32>
    %c8 = arith.constant 8 : index
    %c0_41 = arith.constant 0 : index
    %c0_42 = arith.constant 0 : index
    %68 = vector.load %arg3[%c8, %c0_41, %c0_42] : memref<9x49x196xbf16, #tpu.memory_space<vmem>>, vector<1x49x196xbf16>
    %69 = vector.shape_cast %68 : vector<1x49x196xbf16> to vector<49x196xbf16>
    %70 = vector.extract_strided_slice %11 {offsets = [0, 0], sizes = [196, 32], strides = [1, 1]} : vector<392x32xbf16> to vector<196x32xbf16>
    %cst_43 = arith.constant dense<0.000000e+00> : vector<49x32xf32>
    %71 = tpu.matmul %69, %70, %cst_43 {dimension_numbers = #tpu.dot_dimension_numbers<[1], [0], [0], [1], [0, 0, 1, 1], [], []>} : vector<49x196xbf16>, vector<196x32xbf16>, vector<49x32xf32> -> vector<49x32xf32>
    %72 = vector.extract_strided_slice %11 {offsets = [196, 0], sizes = [196, 32], strides = [1, 1]} : vector<392x32xbf16> to vector<196x32xbf16>
    %cst_44 = arith.constant dense<0.000000e+00> : vector<49x32xf32>
    %73 = tpu.matmul %69, %72, %cst_44 {dimension_numbers = #tpu.dot_dimension_numbers<[1], [0], [0], [1], [0, 0, 1, 1], [], []>} : vector<49x196xbf16>, vector<196x32xbf16>, vector<49x32xf32> -> vector<49x32xf32>
    %74 = tpu.concatenate %71, %73 in 0 : vector<49x32xf32>, vector<49x32xf32> -> vector<98x32xf32>
    %75 = tpu.concatenate %18, %25, %32, %39, %46, %53, %60, %67, %74 in 1 : vector<98x32xf32>, vector<98x32xf32>, vector<98x32xf32>, vector<98x32xf32>, vector<98x32xf32>, vector<98x32xf32>, vector<98x32xf32>, vector<98x32xf32>, vector<98x32xf32> -> vector<98x288xf32>
    %76 = arith.truncf %75 : vector<98x288xf32> to vector<98x288xbf16>
    %c0_45 = arith.constant 0 : index
    %c0_46 = arith.constant 0 : index
    %77 = vector.load %arg4[%c0_45, %c0_46] : memref<288x64xbf16, #tpu.memory_space<vmem>>, vector<288x64xbf16>
    %cst_47 = arith.constant dense<0.000000e+00> : vector<98x64xf32>
    %78 = tpu.matmul %76, %77, %cst_47 {dimension_numbers = #tpu.dot_dimension_numbers<[1], [0], [0], [1], [0, 0, 1, 1], [], []>} : vector<98x288xbf16>, vector<288x64xbf16>, vector<98x64xf32> -> vector<98x64xf32>
    %c0_48 = arith.constant 0 : index
    %c0_49 = arith.constant 0 : index
    %79 = vector.load %arg5[%c0_48, %c0_49] : memref<2x64xf32, #tpu.memory_space<vmem>>, vector<1x64xf32>
    %80 = vector.broadcast %79 : vector<1x64xf32> to vector<98x64xf32>
    %81 = arith.mulf %78, %80 : vector<98x64xf32>
    %c1_50 = arith.constant 1 : index
    %c0_51 = arith.constant 0 : index
    %82 = vector.load %arg5[%c1_50, %c0_51] : memref<2x64xf32, #tpu.memory_space<vmem>>, vector<1x64xf32>
    %83 = vector.broadcast %82 : vector<1x64xf32> to vector<98x64xf32>
    %84 = arith.addf %81, %83 : vector<98x64xf32>
    %cst_52 = arith.constant 0.000000e+00 : f32
    %85 = vector.broadcast %cst_52 : f32 to vector<98x64xf32>
    %86 = arith.maximumf %84, %85 : vector<98x64xf32>
    %87 = arith.truncf %86 : vector<98x64xf32> to vector<98x64xbf16>
    %c0_53 = arith.constant 0 : index
    %c0_54 = arith.constant 0 : index
    %c0_55 = arith.constant 0 : index
    %88 = vector.load %arg6[%c0_53, %c0_54, %c0_55] : memref<9x16x49xbf16, #tpu.memory_space<vmem>>, vector<1x16x49xbf16>
    %89 = vector.shape_cast %88 : vector<1x16x49xbf16> to vector<16x49xbf16>
    %90 = vector.extract_strided_slice %87 {offsets = [0, 0], sizes = [49, 64], strides = [1, 1]} : vector<98x64xbf16> to vector<49x64xbf16>
    %cst_56 = arith.constant dense<0.000000e+00> : vector<16x64xf32>
    %91 = tpu.matmul %89, %90, %cst_56 {dimension_numbers = #tpu.dot_dimension_numbers<[1], [0], [0], [1], [0, 0, 1, 1], [], []>} : vector<16x49xbf16>, vector<49x64xbf16>, vector<16x64xf32> -> vector<16x64xf32>
    %92 = vector.extract_strided_slice %87 {offsets = [49, 0], sizes = [49, 64], strides = [1, 1]} : vector<98x64xbf16> to vector<49x64xbf16>
    %cst_57 = arith.constant dense<0.000000e+00> : vector<16x64xf32>
    %93 = tpu.matmul %89, %92, %cst_57 {dimension_numbers = #tpu.dot_dimension_numbers<[1], [0], [0], [1], [0, 0, 1, 1], [], []>} : vector<16x49xbf16>, vector<49x64xbf16>, vector<16x64xf32> -> vector<16x64xf32>
    %94 = tpu.concatenate %91, %93 in 0 : vector<16x64xf32>, vector<16x64xf32> -> vector<32x64xf32>
    %c1_58 = arith.constant 1 : index
    %c0_59 = arith.constant 0 : index
    %c0_60 = arith.constant 0 : index
    %95 = vector.load %arg6[%c1_58, %c0_59, %c0_60] : memref<9x16x49xbf16, #tpu.memory_space<vmem>>, vector<1x16x49xbf16>
    %96 = vector.shape_cast %95 : vector<1x16x49xbf16> to vector<16x49xbf16>
    %97 = vector.extract_strided_slice %87 {offsets = [0, 0], sizes = [49, 64], strides = [1, 1]} : vector<98x64xbf16> to vector<49x64xbf16>
    %cst_61 = arith.constant dense<0.000000e+00> : vector<16x64xf32>
    %98 = tpu.matmul %96, %97, %cst_61 {dimension_numbers = #tpu.dot_dimension_numbers<[1], [0], [0], [1], [0, 0, 1, 1], [], []>} : vector<16x49xbf16>, vector<49x64xbf16>, vector<16x64xf32> -> vector<16x64xf32>
    %99 = vector.extract_strided_slice %87 {offsets = [49, 0], sizes = [49, 64], strides = [1, 1]} : vector<98x64xbf16> to vector<49x64xbf16>
    %cst_62 = arith.constant dense<0.000000e+00> : vector<16x64xf32>
    %100 = tpu.matmul %96, %99, %cst_62 {dimension_numbers = #tpu.dot_dimension_numbers<[1], [0], [0], [1], [0, 0, 1, 1], [], []>} : vector<16x49xbf16>, vector<49x64xbf16>, vector<16x64xf32> -> vector<16x64xf32>
    %101 = tpu.concatenate %98, %100 in 0 : vector<16x64xf32>, vector<16x64xf32> -> vector<32x64xf32>
    %c2_63 = arith.constant 2 : index
    %c0_64 = arith.constant 0 : index
    %c0_65 = arith.constant 0 : index
    %102 = vector.load %arg6[%c2_63, %c0_64, %c0_65] : memref<9x16x49xbf16, #tpu.memory_space<vmem>>, vector<1x16x49xbf16>
    %103 = vector.shape_cast %102 : vector<1x16x49xbf16> to vector<16x49xbf16>
    %104 = vector.extract_strided_slice %87 {offsets = [0, 0], sizes = [49, 64], strides = [1, 1]} : vector<98x64xbf16> to vector<49x64xbf16>
    %cst_66 = arith.constant dense<0.000000e+00> : vector<16x64xf32>
    %105 = tpu.matmul %103, %104, %cst_66 {dimension_numbers = #tpu.dot_dimension_numbers<[1], [0], [0], [1], [0, 0, 1, 1], [], []>} : vector<16x49xbf16>, vector<49x64xbf16>, vector<16x64xf32> -> vector<16x64xf32>
    %106 = vector.extract_strided_slice %87 {offsets = [49, 0], sizes = [49, 64], strides = [1, 1]} : vector<98x64xbf16> to vector<49x64xbf16>
    %cst_67 = arith.constant dense<0.000000e+00> : vector<16x64xf32>
    %107 = tpu.matmul %103, %106, %cst_67 {dimension_numbers = #tpu.dot_dimension_numbers<[1], [0], [0], [1], [0, 0, 1, 1], [], []>} : vector<16x49xbf16>, vector<49x64xbf16>, vector<16x64xf32> -> vector<16x64xf32>
    %108 = tpu.concatenate %105, %107 in 0 : vector<16x64xf32>, vector<16x64xf32> -> vector<32x64xf32>
    %c3_68 = arith.constant 3 : index
    %c0_69 = arith.constant 0 : index
    %c0_70 = arith.constant 0 : index
    %109 = vector.load %arg6[%c3_68, %c0_69, %c0_70] : memref<9x16x49xbf16, #tpu.memory_space<vmem>>, vector<1x16x49xbf16>
    %110 = vector.shape_cast %109 : vector<1x16x49xbf16> to vector<16x49xbf16>
    %111 = vector.extract_strided_slice %87 {offsets = [0, 0], sizes = [49, 64], strides = [1, 1]} : vector<98x64xbf16> to vector<49x64xbf16>
    %cst_71 = arith.constant dense<0.000000e+00> : vector<16x64xf32>
    %112 = tpu.matmul %110, %111, %cst_71 {dimension_numbers = #tpu.dot_dimension_numbers<[1], [0], [0], [1], [0, 0, 1, 1], [], []>} : vector<16x49xbf16>, vector<49x64xbf16>, vector<16x64xf32> -> vector<16x64xf32>
    %113 = vector.extract_strided_slice %87 {offsets = [49, 0], sizes = [49, 64], strides = [1, 1]} : vector<98x64xbf16> to vector<49x64xbf16>
    %cst_72 = arith.constant dense<0.000000e+00> : vector<16x64xf32>
    %114 = tpu.matmul %110, %113, %cst_72 {dimension_numbers = #tpu.dot_dimension_numbers<[1], [0], [0], [1], [0, 0, 1, 1], [], []>} : vector<16x49xbf16>, vector<49x64xbf16>, vector<16x64xf32> -> vector<16x64xf32>
    %115 = tpu.concatenate %112, %114 in 0 : vector<16x64xf32>, vector<16x64xf32> -> vector<32x64xf32>
    %c4_73 = arith.constant 4 : index
    %c0_74 = arith.constant 0 : index
    %c0_75 = arith.constant 0 : index
    %116 = vector.load %arg6[%c4_73, %c0_74, %c0_75] : memref<9x16x49xbf16, #tpu.memory_space<vmem>>, vector<1x16x49xbf16>
    %117 = vector.shape_cast %116 : vector<1x16x49xbf16> to vector<16x49xbf16>
    %118 = vector.extract_strided_slice %87 {offsets = [0, 0], sizes = [49, 64], strides = [1, 1]} : vector<98x64xbf16> to vector<49x64xbf16>
    %cst_76 = arith.constant dense<0.000000e+00> : vector<16x64xf32>
    %119 = tpu.matmul %117, %118, %cst_76 {dimension_numbers = #tpu.dot_dimension_numbers<[1], [0], [0], [1], [0, 0, 1, 1], [], []>} : vector<16x49xbf16>, vector<49x64xbf16>, vector<16x64xf32> -> vector<16x64xf32>
    %120 = vector.extract_strided_slice %87 {offsets = [49, 0], sizes = [49, 64], strides = [1, 1]} : vector<98x64xbf16> to vector<49x64xbf16>
    %cst_77 = arith.constant dense<0.000000e+00> : vector<16x64xf32>
    %121 = tpu.matmul %117, %120, %cst_77 {dimension_numbers = #tpu.dot_dimension_numbers<[1], [0], [0], [1], [0, 0, 1, 1], [], []>} : vector<16x49xbf16>, vector<49x64xbf16>, vector<16x64xf32> -> vector<16x64xf32>
    %122 = tpu.concatenate %119, %121 in 0 : vector<16x64xf32>, vector<16x64xf32> -> vector<32x64xf32>
    %c5_78 = arith.constant 5 : index
    %c0_79 = arith.constant 0 : index
    %c0_80 = arith.constant 0 : index
    %123 = vector.load %arg6[%c5_78, %c0_79, %c0_80] : memref<9x16x49xbf16, #tpu.memory_space<vmem>>, vector<1x16x49xbf16>
    %124 = vector.shape_cast %123 : vector<1x16x49xbf16> to vector<16x49xbf16>
    %125 = vector.extract_strided_slice %87 {offsets = [0, 0], sizes = [49, 64], strides = [1, 1]} : vector<98x64xbf16> to vector<49x64xbf16>
    %cst_81 = arith.constant dense<0.000000e+00> : vector<16x64xf32>
    %126 = tpu.matmul %124, %125, %cst_81 {dimension_numbers = #tpu.dot_dimension_numbers<[1], [0], [0], [1], [0, 0, 1, 1], [], []>} : vector<16x49xbf16>, vector<49x64xbf16>, vector<16x64xf32> -> vector<16x64xf32>
    %127 = vector.extract_strided_slice %87 {offsets = [49, 0], sizes = [49, 64], strides = [1, 1]} : vector<98x64xbf16> to vector<49x64xbf16>
    %cst_82 = arith.constant dense<0.000000e+00> : vector<16x64xf32>
    %128 = tpu.matmul %124, %127, %cst_82 {dimension_numbers = #tpu.dot_dimension_numbers<[1], [0], [0], [1], [0, 0, 1, 1], [], []>} : vector<16x49xbf16>, vector<49x64xbf16>, vector<16x64xf32> -> vector<16x64xf32>
    %129 = tpu.concatenate %126, %128 in 0 : vector<16x64xf32>, vector<16x64xf32> -> vector<32x64xf32>
    %c6_83 = arith.constant 6 : index
    %c0_84 = arith.constant 0 : index
    %c0_85 = arith.constant 0 : index
    %130 = vector.load %arg6[%c6_83, %c0_84, %c0_85] : memref<9x16x49xbf16, #tpu.memory_space<vmem>>, vector<1x16x49xbf16>
    %131 = vector.shape_cast %130 : vector<1x16x49xbf16> to vector<16x49xbf16>
    %132 = vector.extract_strided_slice %87 {offsets = [0, 0], sizes = [49, 64], strides = [1, 1]} : vector<98x64xbf16> to vector<49x64xbf16>
    %cst_86 = arith.constant dense<0.000000e+00> : vector<16x64xf32>
    %133 = tpu.matmul %131, %132, %cst_86 {dimension_numbers = #tpu.dot_dimension_numbers<[1], [0], [0], [1], [0, 0, 1, 1], [], []>} : vector<16x49xbf16>, vector<49x64xbf16>, vector<16x64xf32> -> vector<16x64xf32>
    %134 = vector.extract_strided_slice %87 {offsets = [49, 0], sizes = [49, 64], strides = [1, 1]} : vector<98x64xbf16> to vector<49x64xbf16>
    %cst_87 = arith.constant dense<0.000000e+00> : vector<16x64xf32>
    %135 = tpu.matmul %131, %134, %cst_87 {dimension_numbers = #tpu.dot_dimension_numbers<[1], [0], [0], [1], [0, 0, 1, 1], [], []>} : vector<16x49xbf16>, vector<49x64xbf16>, vector<16x64xf32> -> vector<16x64xf32>
    %136 = tpu.concatenate %133, %135 in 0 : vector<16x64xf32>, vector<16x64xf32> -> vector<32x64xf32>
    %c7_88 = arith.constant 7 : index
    %c0_89 = arith.constant 0 : index
    %c0_90 = arith.constant 0 : index
    %137 = vector.load %arg6[%c7_88, %c0_89, %c0_90] : memref<9x16x49xbf16, #tpu.memory_space<vmem>>, vector<1x16x49xbf16>
    %138 = vector.shape_cast %137 : vector<1x16x49xbf16> to vector<16x49xbf16>
    %139 = vector.extract_strided_slice %87 {offsets = [0, 0], sizes = [49, 64], strides = [1, 1]} : vector<98x64xbf16> to vector<49x64xbf16>
    %cst_91 = arith.constant dense<0.000000e+00> : vector<16x64xf32>
    %140 = tpu.matmul %138, %139, %cst_91 {dimension_numbers = #tpu.dot_dimension_numbers<[1], [0], [0], [1], [0, 0, 1, 1], [], []>} : vector<16x49xbf16>, vector<49x64xbf16>, vector<16x64xf32> -> vector<16x64xf32>
    %141 = vector.extract_strided_slice %87 {offsets = [49, 0], sizes = [49, 64], strides = [1, 1]} : vector<98x64xbf16> to vector<49x64xbf16>
    %cst_92 = arith.constant dense<0.000000e+00> : vector<16x64xf32>
    %142 = tpu.matmul %138, %141, %cst_92 {dimension_numbers = #tpu.dot_dimension_numbers<[1], [0], [0], [1], [0, 0, 1, 1], [], []>} : vector<16x49xbf16>, vector<49x64xbf16>, vector<16x64xf32> -> vector<16x64xf32>
    %143 = tpu.concatenate %140, %142 in 0 : vector<16x64xf32>, vector<16x64xf32> -> vector<32x64xf32>
    %c8_93 = arith.constant 8 : index
    %c0_94 = arith.constant 0 : index
    %c0_95 = arith.constant 0 : index
    %144 = vector.load %arg6[%c8_93, %c0_94, %c0_95] : memref<9x16x49xbf16, #tpu.memory_space<vmem>>, vector<1x16x49xbf16>
    %145 = vector.shape_cast %144 : vector<1x16x49xbf16> to vector<16x49xbf16>
    %146 = vector.extract_strided_slice %87 {offsets = [0, 0], sizes = [49, 64], strides = [1, 1]} : vector<98x64xbf16> to vector<49x64xbf16>
    %cst_96 = arith.constant dense<0.000000e+00> : vector<16x64xf32>
    %147 = tpu.matmul %145, %146, %cst_96 {dimension_numbers = #tpu.dot_dimension_numbers<[1], [0], [0], [1], [0, 0, 1, 1], [], []>} : vector<16x49xbf16>, vector<49x64xbf16>, vector<16x64xf32> -> vector<16x64xf32>
    %148 = vector.extract_strided_slice %87 {offsets = [49, 0], sizes = [49, 64], strides = [1, 1]} : vector<98x64xbf16> to vector<49x64xbf16>
    %cst_97 = arith.constant dense<0.000000e+00> : vector<16x64xf32>
    %149 = tpu.matmul %145, %148, %cst_97 {dimension_numbers = #tpu.dot_dimension_numbers<[1], [0], [0], [1], [0, 0, 1, 1], [], []>} : vector<16x49xbf16>, vector<49x64xbf16>, vector<16x64xf32> -> vector<16x64xf32>
    %150 = tpu.concatenate %147, %149 in 0 : vector<16x64xf32>, vector<16x64xf32> -> vector<32x64xf32>
    %151 = tpu.concatenate %94, %101, %108, %115, %122, %129, %136, %143, %150 in 1 : vector<32x64xf32>, vector<32x64xf32>, vector<32x64xf32>, vector<32x64xf32>, vector<32x64xf32>, vector<32x64xf32>, vector<32x64xf32>, vector<32x64xf32>, vector<32x64xf32> -> vector<32x576xf32>
    %152 = arith.truncf %151 : vector<32x576xf32> to vector<32x576xbf16>
    %c0_98 = arith.constant 0 : index
    %c0_99 = arith.constant 0 : index
    %153 = vector.load %arg7[%c0_98, %c0_99] : memref<576x128xbf16, #tpu.memory_space<vmem>>, vector<576x128xbf16>
    %cst_100 = arith.constant dense<0.000000e+00> : vector<32x128xf32>
    %154 = tpu.matmul %152, %153, %cst_100 {dimension_numbers = #tpu.dot_dimension_numbers<[1], [0], [0], [1], [0, 0, 1, 1], [], []>} : vector<32x576xbf16>, vector<576x128xbf16>, vector<32x128xf32> -> vector<32x128xf32>
    %c0_101 = arith.constant 0 : index
    %c0_102 = arith.constant 0 : index
    %155 = vector.load %arg8[%c0_101, %c0_102] : memref<2x128xf32, #tpu.memory_space<vmem>>, vector<1x128xf32>
    %156 = vector.broadcast %155 : vector<1x128xf32> to vector<32x128xf32>
    %157 = arith.mulf %154, %156 : vector<32x128xf32>
    %c1_103 = arith.constant 1 : index
    %c0_104 = arith.constant 0 : index
    %158 = vector.load %arg8[%c1_103, %c0_104] : memref<2x128xf32, #tpu.memory_space<vmem>>, vector<1x128xf32>
    %159 = vector.broadcast %158 : vector<1x128xf32> to vector<32x128xf32>
    %160 = arith.addf %157, %159 : vector<32x128xf32>
    %cst_105 = arith.constant 0.000000e+00 : f32
    %161 = vector.broadcast %cst_105 : f32 to vector<32x128xf32>
    %162 = arith.maximumf %160, %161 : vector<32x128xf32>
    %163 = arith.truncf %162 : vector<32x128xf32> to vector<32x128xbf16>
    %164 = vector.extract_strided_slice %163 {offsets = [0, 0], sizes = [1, 128], strides = [1, 1]} : vector<32x128xbf16> to vector<1x128xbf16>
    %165 = vector.extract_strided_slice %163 {offsets = [1, 0], sizes = [1, 128], strides = [1, 1]} : vector<32x128xbf16> to vector<1x128xbf16>
    %166 = vector.extract_strided_slice %163 {offsets = [2, 0], sizes = [1, 128], strides = [1, 1]} : vector<32x128xbf16> to vector<1x128xbf16>
    %167 = vector.extract_strided_slice %163 {offsets = [4, 0], sizes = [1, 128], strides = [1, 1]} : vector<32x128xbf16> to vector<1x128xbf16>
    %168 = vector.extract_strided_slice %163 {offsets = [5, 0], sizes = [1, 128], strides = [1, 1]} : vector<32x128xbf16> to vector<1x128xbf16>
    %169 = vector.extract_strided_slice %163 {offsets = [6, 0], sizes = [1, 128], strides = [1, 1]} : vector<32x128xbf16> to vector<1x128xbf16>
    %170 = vector.extract_strided_slice %163 {offsets = [8, 0], sizes = [1, 128], strides = [1, 1]} : vector<32x128xbf16> to vector<1x128xbf16>
    %171 = vector.extract_strided_slice %163 {offsets = [9, 0], sizes = [1, 128], strides = [1, 1]} : vector<32x128xbf16> to vector<1x128xbf16>
    %172 = vector.extract_strided_slice %163 {offsets = [10, 0], sizes = [1, 128], strides = [1, 1]} : vector<32x128xbf16> to vector<1x128xbf16>
    %173 = tpu.concatenate %164, %165, %166, %167, %168, %169, %170, %171, %172 in 1 : vector<1x128xbf16>, vector<1x128xbf16>, vector<1x128xbf16>, vector<1x128xbf16>, vector<1x128xbf16>, vector<1x128xbf16>, vector<1x128xbf16>, vector<1x128xbf16>, vector<1x128xbf16> -> vector<1x1152xbf16>
    %174 = vector.extract_strided_slice %163 {offsets = [16, 0], sizes = [1, 128], strides = [1, 1]} : vector<32x128xbf16> to vector<1x128xbf16>
    %175 = vector.extract_strided_slice %163 {offsets = [17, 0], sizes = [1, 128], strides = [1, 1]} : vector<32x128xbf16> to vector<1x128xbf16>
    %176 = vector.extract_strided_slice %163 {offsets = [18, 0], sizes = [1, 128], strides = [1, 1]} : vector<32x128xbf16> to vector<1x128xbf16>
    %177 = vector.extract_strided_slice %163 {offsets = [20, 0], sizes = [1, 128], strides = [1, 1]} : vector<32x128xbf16> to vector<1x128xbf16>
    %178 = vector.extract_strided_slice %163 {offsets = [21, 0], sizes = [1, 128], strides = [1, 1]} : vector<32x128xbf16> to vector<1x128xbf16>
    %179 = vector.extract_strided_slice %163 {offsets = [22, 0], sizes = [1, 128], strides = [1, 1]} : vector<32x128xbf16> to vector<1x128xbf16>
    %180 = vector.extract_strided_slice %163 {offsets = [24, 0], sizes = [1, 128], strides = [1, 1]} : vector<32x128xbf16> to vector<1x128xbf16>
    %181 = vector.extract_strided_slice %163 {offsets = [25, 0], sizes = [1, 128], strides = [1, 1]} : vector<32x128xbf16> to vector<1x128xbf16>
    %182 = vector.extract_strided_slice %163 {offsets = [26, 0], sizes = [1, 128], strides = [1, 1]} : vector<32x128xbf16> to vector<1x128xbf16>
    %183 = tpu.concatenate %174, %175, %176, %177, %178, %179, %180, %181, %182 in 1 : vector<1x128xbf16>, vector<1x128xbf16>, vector<1x128xbf16>, vector<1x128xbf16>, vector<1x128xbf16>, vector<1x128xbf16>, vector<1x128xbf16>, vector<1x128xbf16>, vector<1x128xbf16> -> vector<1x1152xbf16>
    %184 = tpu.concatenate %173, %183 in 0 : vector<1x1152xbf16>, vector<1x1152xbf16> -> vector<2x1152xbf16>
    %c0_106 = arith.constant 0 : index
    %c0_107 = arith.constant 0 : index
    %185 = vector.load %arg9[%c0_106, %c0_107] : memref<1152x256xbf16, #tpu.memory_space<vmem>>, vector<1152x256xbf16>
    %cst_108 = arith.constant dense<0.000000e+00> : vector<2x256xf32>
    %186 = tpu.matmul %184, %185, %cst_108 {dimension_numbers = #tpu.dot_dimension_numbers<[1], [0], [0], [1], [0, 0, 1, 1], [], []>} : vector<2x1152xbf16>, vector<1152x256xbf16>, vector<2x256xf32> -> vector<2x256xf32>
    %c0_109 = arith.constant 0 : index
    %c0_110 = arith.constant 0 : index
    %187 = vector.load %arg10[%c0_109, %c0_110] : memref<2x256xf32, #tpu.memory_space<vmem>>, vector<1x256xf32>
    %188 = vector.broadcast %187 : vector<1x256xf32> to vector<2x256xf32>
    %189 = arith.mulf %186, %188 : vector<2x256xf32>
    %c1_111 = arith.constant 1 : index
    %c0_112 = arith.constant 0 : index
    %190 = vector.load %arg10[%c1_111, %c0_112] : memref<2x256xf32, #tpu.memory_space<vmem>>, vector<1x256xf32>
    %191 = vector.broadcast %190 : vector<1x256xf32> to vector<2x256xf32>
    %192 = arith.addf %189, %191 : vector<2x256xf32>
    %cst_113 = arith.constant 0.000000e+00 : f32
    %193 = vector.broadcast %cst_113 : f32 to vector<2x256xf32>
    %194 = arith.maximumf %192, %193 : vector<2x256xf32>
    %195 = arith.truncf %194 : vector<2x256xf32> to vector<2x256xbf16>
    %c0_114 = arith.constant 0 : index
    %c0_115 = arith.constant 0 : index
    %196 = vector.load %arg11[%c0_114, %c0_115] : memref<256x1xbf16, #tpu.memory_space<vmem>>, vector<256x1xbf16>
    %cst_116 = arith.constant dense<0.000000e+00> : vector<2x1xf32>
    %197 = tpu.matmul %195, %196, %cst_116 {dimension_numbers = #tpu.dot_dimension_numbers<[1], [0], [0], [1], [0, 0, 1, 1], [], []>} : vector<2x256xbf16>, vector<256x1xbf16>, vector<2x1xf32> -> vector<2x1xf32>
    %c0_117 = arith.constant 0 : index
    %c0_118 = arith.constant 0 : index
    %198 = vector.load %arg12[%c0_117, %c0_118] : memref<1x1xf32, #tpu.memory_space<vmem>>, vector<1x1xf32>
    %199 = vector.broadcast %198 : vector<1x1xf32> to vector<2x1xf32>
    %200 = arith.addf %197, %199 : vector<2x1xf32>
    %201 = arith.negf %200 : vector<2x1xf32>
    %202 = math.exp %201 : vector<2x1xf32>
    %cst_119 = arith.constant 1.000000e+00 : f32
    %203 = vector.broadcast %cst_119 : f32 to vector<2x1xf32>
    %204 = arith.addf %203, %202 : vector<2x1xf32>
    %205 = arith.divf %203, %204 : vector<2x1xf32>
    %c0_120 = arith.constant 0 : index
    %c0_121 = arith.constant 0 : index
    %206 = vector.load %arg13[%c0_120, %c0_121] : memref<2x1xf32, #tpu.memory_space<vmem>>, vector<2x1xf32>
    tpu.vector_store %arg13[%c0_120, %c0_121], %205 {strides = array<i32>} : memref<2x1xf32, #tpu.memory_space<vmem>>, vector<2x1xf32>,
    return
  }
}

</mosaic_0001>

<bundles_post_ra>
// kernel: classifier_forward.1
= control target key start
LH: loop header
LB: loop body
LE: loop exit
PB: predicated region body
PF: predicated region fallthrough
CT: control target
= control target key end

     0   :  { %s11191_s0 = inlined_call_operand.vmem [shape: bf16[392,9], index: 0, kind: input, shape index: {}]   ;;  %s11192_s1 = inlined_call_operand.vmem [shape: bf16[9,32], index: 1, kind: input, shape index: {}]   ;;  %s11193_s2 = inlined_call_operand.vmem [shape: f32[2,32], index: 2, kind: input, shape index: {}]   ;;  %s11194_s3 = inlined_call_operand.vmem [shape: bf16[9,49,196], index: 3, kind: input, shape index: {}]   ;;  %s11195_s4 = inlined_call_operand.vmem [shape: bf16[288,64], index: 4, kind: input, shape index: {}]   ;;  %s11196_s5 = inlined_call_operand.vmem [shape: f32[2,64], index: 5, kind: input, shape index: {}]   ;;  %s11197_s6 = inlined_call_operand.hbm [shape: bf16[9,16,49], index: 6, kind: input, shape index: {}]   ;;  %s11198_s7 = inlined_call_operand.hbm [shape: bf16[576,128], index: 7, kind: input, shape index: {}]   ;;  %s11199_s8 = inlined_call_operand.vmem [shape: f32[2,128], index: 8, kind: input, shape index: {}]   ;;  %s11200_s9 = inlined_call_operand.vmem [shape: bf16[1152,256], index: 9, kind: input, shape index: {}]   ;;  %s11201_s10 = inlined_call_operand.vmem [shape: f32[2,256], index: 10, kind: input, shape index: {}]   ;;  %s11202_s11 = inlined_call_operand.vmem [shape: bf16[256,1], index: 11, kind: input, shape index: {}]   ;;  %s11203_s12 = inlined_call_operand.<no memory space> [shape: f32[1,1], index: 12, kind: input, shape index: {}]   ;;  %s11204_s13 = inlined_call_operand.vmem [shape: f32[2,1], index: 13, kind: output, shape index: {}]  }
   0x1   :  { %v18_v0 = vstv %s11203_s12 }
   0x2   :  { %19 = vst [vmem:[#allocation2] sm:$0x1] %v18_v0 }
   0x3   :  { %20 = vsyncpa [#allocation4], 0 }
   0x4   :  { %21 = vsyncpa [#allocation6], 0  ;;  %s8083_s27 = smov [#allocation3]  }
   0x5   :  { %s39_s28 = sshll.u32 %s8083_s27, 4  ;;  %s40_s28 = int_to_ptr.vmem [resolvable:$true] %s39_s28 }
   0x6   :  { %s8047_s29 = scalar_lea.vmem %s40_s28, 1152  ;;  %p8052_p1 = scmp.lt.s32.totalorder %s40_s28, %s40_s28 }
   0x7   :  { %p8048_p0 = scmp.ne.s32.totalorder %s40_s28, %s8047_s29  ;;  %p8053_p2 = scmp.lt.s32.totalorder %s8047_s29, %s8047_s29 }
   0x9   :  { %p8054_p3 = por %p8053_p2, %p8052_p1 }
   0xb   :  { %p8055_p4 = pnand %p8054_p3, %p8048_p0 }
   0xd   :  { %8058 = shalt.err (!%p8055_p4)
}
   0xe   :  { %s8084_s30 = smov 64   ;;  %s8085_s14 = smov 4  }
   0xf   :  { %45 = dma.hbm_to_vmem [thread:$0]  %s11197_s6, 1152, %s40_s28, [#allocation4], %s8084_s30, %s8084_s30, %s8085_s14  }
  0x10   :  { %s8086_s12 = smov [#allocation5]  }
  0x11   :  { %s51_s17 = sshll.u32 %s8086_s12, 4  ;;  %s52_s17 = int_to_ptr.vmem [resolvable:$true] %s51_s17 }
  0x12   :  { %s8067_s18 = scalar_lea.vmem %s52_s17, 4608  ;;  %p8072_p6 = scmp.lt.s32.totalorder %s52_s17, %s52_s17 }
  0x13   :  { %p8068_p5 = scmp.ne.s32.totalorder %s52_s17, %s8067_s18  ;;  %p8073_p7 = scmp.lt.s32.totalorder %s8067_s18, %s8067_s18 }
  0x15   :  { %p8074_p8 = por %p8073_p7, %p8072_p6 }
  0x17   :  { %p8075_p9 = pnand %p8074_p8, %p8068_p5 }
  0x19   :  { %8078 = shalt.err (!%p8075_p9)
}
  0x1a   :  { %57 = dma.hbm_to_vmem [thread:$0]  %s11198_s7, 4608, %s52_s17, [#allocation6], %s8084_s30, %s8084_s30, %s8085_s14  }
  0x1b   :  { %8079 = dma.done.wait [#allocation4], 1152  }
  0x1c   :  { %8080 = vsyncadd [#allocation4], 4294966144 }
  0x1d   :  { %8081 = dma.done.wait [#allocation6], 4608  }
  0x1e   :  { %8082 = vsyncadd [#allocation6], 4294962688  ;;  %vm330_vm0 = vcmask 1043456   ;;  %v11206_v1 = vmov 0.0   ;;  %vm8088_vm1 = vmmov 0   ;;  %vm331_vm2 = vcmask 1044480  }
  0x1f   :  { %7008 = vmatprep.subr.bf16.mxu0 %v11206_v1  ;;  %7010 = vmatprep.mubr.msk.bf16.mxu0 %vm8088_vm1, %v11206_v1  ;;  %v8089_v2 = vmov 65535   ;;  %v7615_v5 = vld [vmem:[%s11192_s1] sm:$0x1f]   ;;  %vm254_vm3 = vcmask 72704   ;;  %v7617_v8 = vld [vmem:[%s11191_s0 + $0x8] sm:$0xff]   ;;  %v7618_v9 = vld [vmem:[%s11191_s0 + $0x10] sm:$0xff]  }
  0x20   :  { %v332_v3 = vsel %vm330_vm0, 4294967295, %v8089_v2  ;;  %v7616_v7 = vld [vmem:[%s11191_s0] sm:$0xff]   ;;  %v7619_v10 = vld [vmem:[%s11191_s0 + $0x18] sm:$0xff]   ;;  %v7621_v12 = vld [vmem:[%s11191_s0 + $0x28] sm:$0xff]   ;;  %v11209_v25 = vmov 0   ;;  %vm791_vm4 = vcmask 556032  }
  0x21   :  { %v333_v4 = vsel %vm331_vm2, %v332_v3, 0  ;;  %v7620_v11 = vld [vmem:[%s11191_s0 + $0x20] sm:$0xff]   ;;  %v7622_v13 = vld [vmem:[%s11191_s0 + $0x30] sm:$0xff]   ;;  %v7623_v14 = vld [vmem:[%s11191_s0 + $0x38] sm:$0xff]   ;;  %808 = vmatprep.subr.bf16.mxu1 %v11209_v25  ;;  %vm804_vm5 = vcmask 1041408   ;;  %vm885_vm6 = vcmask 1045504  }
  0x22   :  { %v335_v6 = vand.u32 %v7615_v5, %v333_v4  ;;  %v7624_v15 = vld [vmem:[%s11191_s0 + $0x40] sm:$0xff]   ;;  %v7625_v16 = vld [vmem:[%s11191_s0 + $0x48] sm:$0xff]   ;;  %v7626_v17 = vld [vmem:[%s11191_s0 + $0x50] sm:$0xff]   ;;  %vm997_vm7 = vcmask 1040384   ;;  %s8091_s16 = smov 32   ;;  %s8092_s6 = smov 96  }
  0x23   :  { %v7627_v18 = vld [vmem:[%s11191_s0 + $0x58] sm:$0xff]   ;;  %v7628_v19 = vld [vmem:[%s11191_s0 + $0x60] sm:$0xff]   ;;  %v7629_v20 = vld [vmem:[%s11191_s0 + $0x68] sm:$0xff]   ;;  %vm2931_vm8 = vcmask 261120   ;;  %vm2945_vm9 = vcmask 523264   ;;  %vm2959_vm10 = vcmask 785408  }
  0x24   :  { %7009 = vmatpush3.bf16.msra.mxu0 %v335_v6  ;;  %v7630_v21 = vld [vmem:[%s11191_s0 + $0x70] sm:$0xff]   ;;  %v7631_v22 = vld [vmem:[%s11191_s0 + $0x78] sm:$0xff]   ;;  %v7632_v23 = vld [vmem:[%s11191_s0 + $0x80] sm:$0xff]   ;;  %vm3437_vm11 = vcmask 400384   ;;  %vm3487_vm12 = vsmask.f32 7424 }
  0x25   :  { %v7633_v24 = vld [vmem:[%s11191_s0 + $0x88] sm:$0xff]   ;;  %1136 = vmatprep.subr.bf16.mxu0 %v11209_v25  ;;  %v7634_v26 = vld [vmem:[%s11191_s0 + $0x90] sm:$0xff]   ;;  %v7635_v27 = vld [vmem:[%s11191_s0 + $0x98] sm:$0xff]   ;;  %vm4929_vm13 = vsmask.f32 256  ;;  %vm6223_vm15 = vcmask 1024  }
  0x26   :  { %v7636_v28 = vld [vmem:[%s11191_s0 + $0xa0] sm:$0xff]   ;;  %v7637_v29 = vld [vmem:[%s11191_s0 + $0xa8] sm:$0xff]   ;;  %v7638_v30 = vld [vmem:[%s11191_s0 + $0xb0] sm:$0xff]  }
  0x27   :  { %7011 = vmatmul.mubr.msk.bf16.vlgmr.msra.gmra.mxu0 %vm254_vm3, %v7616_v7  ;;  %v7639_v31 = vld [vmem:[%s11191_s0 + $0xb8] sm:$0xff]   ;;  %v7640_v32 = vld [vmem:[%s11191_s0 + $0xc0] ss:$0 sps:$4 sm:$0xff]   ;;  %v8341_v36 = vld [vmem:[%s11193_s2 + $0x1] ss:$0 sm:$0xff] }
  0x28   :  { %7014 = vmatprep.mubr.msk.bf16.mxu0 %vm8088_vm1, %v11206_v1  ;;  %v8334_v33 = vld [vmem:[%s11193_s2] ss:$0 sm:$0xff]  ;;  %v8359_v6 = vld [vmem:[%s11194_s3 + $0x4] ss:$8 sps:$4 sm:$0xff]   ;;  %vm10868_vm14 = vmand %vm997_vm7, %vm4929_vm13 }
  0x29   :  { %6292 = vmatprep.mubr.msk.bf16.mxu1 %vm791_vm4, %v8359_v6 }
  0x2f   :  { %7015 = vmatmul.mubr.msk.bf16.gmra.mxu0 %vm254_vm3, %v7617_v8 }
  0x30   :  { %7018 = vmatprep.mubr.msk.bf16.mxu0 %vm8088_vm1, %v11206_v1 }
  0x37   :  { %7019 = vmatmul.mubr.msk.bf16.gmra.mxu0 %vm254_vm3, %v7618_v9 }
  0x38   :  { %7022 = vmatprep.mubr.msk.bf16.mxu0 %vm8088_vm1, %v11206_v1 }
  0x3f   :  { %7023 = vmatmul.mubr.msk.bf16.gmra.mxu0 %vm254_vm3, %v7619_v10 }
  0x40   :  { %7026 = vmatprep.mubr.msk.bf16.mxu0 %vm8088_vm1, %v11206_v1 }
  0x47   :  { %7027 = vmatmul.mubr.msk.bf16.gmra.mxu0 %vm254_vm3, %v7620_v11 }
  0x48   :  { %7030 = vmatprep.mubr.msk.bf16.mxu0 %vm8088_vm1, %v11206_v1 }
  0x4f   :  { %7031 = vmatmul.mubr.msk.bf16.gmra.mxu0 %vm254_vm3, %v7621_v12 }
  0x50   :  { %7034 = vmatprep.mubr.msk.bf16.mxu0 %vm8088_vm1, %v11206_v1 }
  0x57   :  { %7035 = vmatmul.mubr.msk.bf16.gmra.mxu0 %vm254_vm3, %v7622_v13 }
  0x58   :  { %7038 = vmatprep.mubr.msk.bf16.mxu0 %vm8088_vm1, %v11206_v1 }
  0x5f   :  { %7039 = vmatmul.mubr.msk.bf16.gmra.mxu0 %vm254_vm3, %v7623_v14 }
  0x60   :  { %7042 = vmatprep.mubr.msk.bf16.mxu0 %vm8088_vm1, %v11206_v1 }
  0x67   :  { %7043 = vmatmul.mubr.msk.bf16.gmra.mxu0 %vm254_vm3, %v7624_v15 }
  0x68   :  { %7046 = vmatprep.mubr.msk.bf16.mxu0 %vm8088_vm1, %v11206_v1 }
  0x6f   :  { %7047 = vmatmul.mubr.msk.bf16.gmra.mxu0 %vm254_vm3, %v7625_v16 }
  0x70   :  { %7050 = vmatprep.mubr.msk.bf16.mxu0 %vm8088_vm1, %v11206_v1 }
  0x77   :  { %7051 = vmatmul.mubr.msk.bf16.gmra.mxu0 %vm254_vm3, %v7626_v17 }
  0x78   :  { %7054 = vmatprep.mubr.msk.bf16.mxu0 %vm8088_vm1, %v11206_v1 }
  0x7f   :  { %7055 = vmatmul.mubr.msk.bf16.gmra.mxu0 %vm254_vm3, %v7627_v18 }
  0x80   :  { %7058 = vmatprep.mubr.msk.bf16.mxu0 %vm8088_vm1, %v11206_v1 }
  0x87   :  { %7059 = vmatmul.mubr.msk.bf16.gmra.mxu0 %vm254_vm3, %v7628_v19 }
  0x88   :  { %7062 = vmatprep.mubr.msk.bf16.mxu0 %vm8088_vm1, %v11206_v1 }
  0x8f   :  { %7063 = vmatmul.mubr.msk.bf16.gmra.mxu0 %vm254_vm3, %v7629_v20 }
  0x90   :  { %7066 = vmatprep.mubr.msk.bf16.mxu0 %vm8088_vm1, %v11206_v1 }
  0x97   :  { %7067 = vmatmul.mubr.msk.bf16.gmra.mxu0 %vm254_vm3, %v7630_v21 }
  0x98   :  { %7070 = vmatprep.mubr.msk.bf16.mxu0 %vm8088_vm1, %v11206_v1 }
  0x9f   :  { %7071 = vmatmul.mubr.msk.bf16.gmra.mxu0 %vm254_vm3, %v7631_v22 }
  0xa0   :  { %7074 = vmatprep.mubr.msk.bf16.mxu0 %vm8088_vm1, %v11206_v1 }
  0xa7   :  { %7075 = vmatmul.mubr.msk.bf16.gmra.mxu0 %vm254_vm3, %v7632_v23 }
  0xa8   :  { %7078 = vmatprep.mubr.msk.bf16.mxu0 %vm8088_vm1, %v11206_v1 }
  0xaf   :  { %7079 = vmatmul.mubr.msk.bf16.gmra.mxu0 %vm254_vm3, %v7633_v24 }
  0xb0   :  { %7082 = vmatprep.mubr.msk.bf16.mxu0 %vm8088_vm1, %v11206_v1 }
  0xb7   :  { %7083 = vmatmul.mubr.msk.bf16.gmra.mxu0 %vm254_vm3, %v7634_v26 }
  0xb8   :  { %7086 = vmatprep.mubr.msk.bf16.mxu0 %vm8088_vm1, %v11206_v1 }
  0xbf   :  { %7087 = vmatmul.mubr.msk.bf16.gmra.mxu0 %vm254_vm3, %v7635_v27 }
  0xc0   :  { %7090 = vmatprep.mubr.msk.bf16.mxu0 %vm8088_vm1, %v11206_v1 }
  0xc7   :  { %7091 = vmatmul.mubr.msk.bf16.gmra.mxu0 %vm254_vm3, %v7636_v28 }
  0xc8   :  { %7094 = vmatprep.mubr.msk.bf16.mxu0 %vm8088_vm1, %v11206_v1 }
  0xcf   :  { %7095 = vmatmul.mubr.msk.bf16.gmra.mxu0 %vm254_vm3, %v7637_v29 }
  0xd0   :  { %7098 = vmatprep.mubr.msk.bf16.mxu0 %vm8088_vm1, %v11206_v1 }
  0xd7   :  { %7099 = vmatmul.mubr.msk.bf16.gmra.mxu0 %vm254_vm3, %v7638_v30 }
  0xd8   :  { %7102 = vmatprep.mubr.msk.bf16.mxu0 %vm8088_vm1, %v11206_v1 }
  0xdf   :  { %7103 = vmatmul.mubr.msk.bf16.gmra.mxu0 %vm254_vm3, %v7639_v31 }
  0xe0   :  { %7106 = vmatprep.mubr.msk.bf16.mxu0 %vm8088_vm1, %v11206_v1 }
  0xe7   :  { %v371_v34 = vpop.f32.mrf.mxu0  ;;  %7107 = vmatmul.mubr.msk.bf16.gmra.mxu0 %vm254_vm3, %v7640_v32 }
  0xe8   :  { %v574_v35 = vmul.f32 %v8334_v33, %v371_v34 }
  0xe9   :  { %v7012_v37 = vpop.f32.mrf.mxu0 }
  0xea   :  { %v628_v39 = vadd.f32 %v8341_v36, %v574_v35 }
  0xeb   :  { %v374_v38 = vpop.f32.mrf.mxu0 }
  0xec   :  { %v575_v40 = vmul.f32 %v8334_v33, %v374_v38  ;;  %v677_v44 = vmax.f32 %v628_v39, 0.0 }
  0xed   :  { %v7013_v41 = vpop.f32.mrf.mxu0 }
  0xee   :  { %v629_v42 = vadd.f32 %v8341_v36, %v575_v40 }
  0xef   :  { %v379_v43 = vpop.f32.mrf.mxu0 }
  0xf0   :  { %v678_v45 = vmax.f32 %v629_v42, 0.0  ;;  %v576_v46 = vmul.f32 %v8334_v33, %v379_v43 }
  0xf1   :  { %v7016_v47 = vpop.f32.mrf.mxu0 }
  0xf2   :  { %v8347_v48 = vpack.c.bf16 %v678_v45, %v677_v44  ;;  %v630_v50 = vadd.f32 %v8341_v36, %v576_v46 }
  0xf3   :  { %v382_v49 = vpop.f32.mrf.mxu0 }
  0xf4   :  { %v577_v51 = vmul.f32 %v8334_v33, %v382_v49  ;;  %v679_v55 = vmax.f32 %v630_v50, 0.0 }
  0xf5   :  { %v7017_v52 = vpop.f32.mrf.mxu0 }
  0xf6   :  { %v631_v53 = vadd.f32 %v8341_v36, %v577_v51 }
  0xf7   :  { %v8352_v54 = vpop.f32.mrf.mxu0 }
  0xf8   :  { %v680_v56 = vmax.f32 %v631_v53, 0.0 }
  0xf9   :  { %v7020_v57 = vpop.f32.mrf.mxu0 }
  0xfa   :  { %v8354_v58 = vpack.c.bf16 %v680_v56, %v679_v55 }
  0xfb   :  { %v390_v59 = vpop.f32.mrf.mxu0 }
  0xfc   :  { %v579_v56 = vmul.f32 %v8334_v33, %v390_v59 }
  0xfd   :  { %v7021_v60 = vpop.f32.mrf.mxu0 }
  0xff   :  { %v395_v61 = vpop.f32.mrf.mxu0 }
 0x100   :  { %v580_v51 = vmul.f32 %v8334_v33, %v395_v61 }
 0x101   :  { %v7024_v62 = vpop.f32.mrf.mxu0 }
 0x102   :  { %v634_v61 = vadd.f32 %v8341_v36, %v580_v51 }
 0x103   :  { %v398_v63 = vpop.f32.mrf.mxu0 }
 0x104   :  { %v581_v45 = vmul.f32 %v8334_v33, %v398_v63 }
 0x105   :  { %v7025_v0 = vpop.f32.mrf.mxu0 }
 0x106   :  { %v635_v57 = vadd.f32 %v8341_v36, %v581_v45  ;;  %v578_v0 = vmul.f32 %v8334_v33, %v8352_v54 }
 0x107   :  { %v403_v2 = vpop.f32.mrf.mxu0 }
 0x108   :  { %v582_v41 = vmul.f32 %v8334_v33, %v403_v2  ;;  %v684_v59 = vmax.f32 %v635_v57, 0.0 }
 0x109   :  { %v7028_v3 = vpop.f32.mrf.mxu0 }
 0x10a   :  { %v636_v52 = vadd.f32 %v8341_v36, %v582_v41 }
 0x10b   :  { %v406_v4 = vpop.f32.mrf.mxu0 }
 0x10c   :  { %v583_v35 = vmul.f32 %v8334_v33, %v406_v4  ;;  %v685_v2 = vmax.f32 %v636_v52, 0.0  ;;  %v633_v4 = vadd.f32 %v8341_v36, %v579_v56 }
 0x10d   :  { %v7029_v5 = vpop.f32.mrf.mxu0 }
 0x10e   :  { %v637_v46 = vadd.f32 %v8341_v36, %v583_v35 }
 0x10f   :  { %v411_v7 = vpop.f32.mrf.mxu0 }
 0x110   :  { %v584_v29 = vmul.f32 %v8334_v33, %v411_v7  ;;  %v686_v60 = vmax.f32 %v637_v46, 0.0 }
 0x111   :  { %v7032_v8 = vpop.f32.mrf.mxu0 }
 0x112   :  { %v638_v42 = vadd.f32 %v8341_v36, %v584_v29  ;;  %v8405_v5 = vpack.c.bf16 %v686_v60, %v685_v2  ;;  %v632_v8 = vadd.f32 %v8341_v36, %v578_v0 }
 0x113   :  { %v414_v9 = vpop.f32.mrf.mxu0 }
 0x114   :  { %v585_v24 = vmul.f32 %v8334_v33, %v414_v9  ;;  %v687_v53 = vmax.f32 %v638_v42, 0.0  ;;  %v683_v9 = vmax.f32 %v634_v61, 0.0 }
 0x115   :  { %v7033_v10 = vpop.f32.mrf.mxu0 }
 0x116   :  { %v639_v37 = vadd.f32 %v8341_v36, %v585_v24  ;;  %v682_v10 = vmax.f32 %v633_v4, 0.0 }
 0x117   :  { %v419_v11 = vpop.f32.mrf.mxu0 }
 0x118   :  { %v586_v20 = vmul.f32 %v8334_v33, %v419_v11  ;;  %v688_v47 = vmax.f32 %v639_v37, 0.0  ;;  %v8410_v11 = vpack.c.bf16 %v684_v59, %v683_v9 }
 0x119   :  { %v7036_v12 = vpop.f32.mrf.mxu0 }
 0x11a   :  { %v640_v30 = vadd.f32 %v8341_v36, %v586_v20  ;;  %v8397_v62 = vpack.c.bf16 %v688_v47, %v687_v53 }
 0x11b   :  { %v422_v13 = vpop.f32.mrf.mxu0 }
 0x11c   :  { %v587_v18 = vmul.f32 %v8334_v33, %v422_v13  ;;  %v689_v43 = vmax.f32 %v640_v30, 0.0  ;;  %v681_v13 = vmax.f32 %v632_v8, 0.0 }
 0x11d   :  { %v7037_v14 = vpop.f32.mrf.mxu0 }
 0x11e   :  { %v641_v26 = vadd.f32 %v8341_v36, %v587_v18 }
 0x11f   :  { %v427_v15 = vpop.f32.mrf.mxu0 }
 0x120   :  { %v588_v16 = vmul.f32 %v8334_v33, %v427_v15  ;;  %v690_v38 = vmax.f32 %v641_v26, 0.0  ;;  %v8414_v15 = vpack.c.bf16 %v682_v10, %v681_v13 }
 0x121   :  { %v7040_v17 = vpop.f32.mrf.mxu0 }
 0x122   :  { %v642_v21 = vadd.f32 %v8341_v36, %v588_v16  ;;  %v8387_v49 = vpack.c.bf16 %v690_v38, %v689_v43 }
 0x123   :  { %v430_v19 = vpop.f32.mrf.mxu0 }
 0x124   :  { %v589_v22 = vmul.f32 %v8334_v33, %v430_v19  ;;  %v691_v31 = vmax.f32 %v642_v21, 0.0 }
 0x125   :  { %v7041_v23 = vpop.f32.mrf.mxu0 }
 0x126   :  { %v643_v27 = vadd.f32 %v8341_v36, %v589_v22  ;;  %v8425_v22 = vld [vmem:[%s11194_s3 + $0x3c] ss:$8 sps:$4 sm:$0xff]  }
 0x127   :  { %v8371_v28 = vpop.f32.mrf.mxu0  ;;  %6319 = vmatprep.mubr.msk.bf16.mxu0 %vm791_vm4, %v8425_v22 }
 0x128   :  { %v692_v32 = vmax.f32 %v643_v27, 0.0  ;;  %v590_v10 = vmul.f32 %v8334_v33, %v8371_v28 }
 0x129   :  { %v7044_v34 = vpop.f32.mrf.mxu0 }
 0x12a   :  { %v8377_v39 = vpack.c.bf16 %v692_v32, %v691_v31 }
 0x12b   :  { %v8379_v40 = vpop.f32.mrf.mxu0 }
 0x12c   :  { %809 = vmatpush1.bf16.msra.mxu1 %v8377_v39 }
 0x12d   :  { %v7045_v44 = vpop.f32.mrf.mxu0  ;;  %810 = vmatprep.subr.bf16.mxu1 %v11209_v25 }
 0x12f   :  { %v8389_v50 = vpop.f32.mrf.mxu0 }
 0x130   :  { %811 = vmatpush1.bf16.msra.mxu1 %v8387_v49  ;;  %v592_v60 = vmul.f32 %v8334_v33, %v8389_v50 }
 0x131   :  { %v7048_v55 = vpop.f32.mrf.mxu0  ;;  %812 = vmatprep.subr.bf16.mxu1 %v11209_v25 }
 0x133   :  { %v446_v63 = vpop.f32.mrf.mxu0 }
 0x134   :  { %813 = vmatpush1.bf16.msra.mxu1 %v8397_v62  ;;  %v593_v47 = vmul.f32 %v8334_v33, %v446_v63 }
 0x135   :  { %v7049_v3 = vpop.f32.mrf.mxu0  ;;  %814 = vmatprep.subr.bf16.mxu1 %v11209_v25 }
 0x136   :  { %v591_v3 = vmul.f32 %v8334_v33, %v8379_v40  ;;  %v647_v4 = vadd.f32 %v8341_v36, %v593_v47 }
 0x137   :  { %v451_v7 = vpop.f32.mrf.mxu0 }
 0x138   :  { %815 = vmatpush1.bf16.msra.mxu1 %v8405_v5  ;;  %v594_v43 = vmul.f32 %v8334_v33, %v451_v7 }
 0x139   :  { %v7052_v54 = vpop.f32.mrf.mxu0  ;;  %816 = vmatprep.subr.bf16.mxu1 %v11209_v25 }
 0x13a   :  { %v648_v0 = vadd.f32 %v8341_v36, %v594_v43 }
 0x13b   :  { %v454_v12 = vpop.f32.mrf.mxu0 }
 0x13c   :  { %817 = vmatpush1.bf16.msra.mxu1 %v8410_v11  ;;  %v595_v34 = vmul.f32 %v8334_v33, %v454_v12  ;;  %v646_v12 = vadd.f32 %v8341_v36, %v592_v60  ;;  %v697_v13 = vmax.f32 %v648_v0, 0.0  ;;  %v8512_v60 = vld [vmem:[%s11194_s3 + $0x10] ss:$8 sps:$4 sm:$0xff]  }
 0x13d   :  { %v7053_v14 = vpop.f32.mrf.mxu0  ;;  %818 = vmatprep.subr.bf16.mxu1 %v11209_v25 }
 0x13e   :  { %v649_v51 = vadd.f32 %v8341_v36, %v595_v34 }
 0x13f   :  { %v459_v16 = vpop.f32.mrf.mxu0 }
 0x140   :  { %819 = vmatpush1.bf16.msra.mxu1 %v8414_v15  ;;  %v596_v30 = vmul.f32 %v8334_v33, %v459_v16  ;;  %v698_v59 = vmax.f32 %v649_v51, 0.0  ;;  %v645_v16 = vadd.f32 %v8341_v36, %v591_v3  ;;  %v8498_v51 = vld [vmem:[%s11194_s3 + $0x14] ss:$8 sps:$4 sm:$0xff]  }
 0x141   :  { %v7056_v17 = vpop.f32.mrf.mxu0  ;;  %820 = vmatprep.subr.bf16.mxu1 %v11209_v25  ;;  %v757_v3 = vld [vmem:[%s11194_s3 + $0x30] sm:$0x11] }
 0x142   :  { %v650_v44 = vadd.f32 %v8341_v36, %v596_v30  ;;  %v696_v17 = vmax.f32 %v647_v4, 0.0 }
 0x143   :  { %v462_v18 = vpop.f32.mrf.mxu0 }
 0x144   :  { %821 = vmatpush1.bf16.msra.mxu1 %v8354_v58  ;;  %v597_v24 = vmul.f32 %v8334_v33, %v462_v18  ;;  %v699_v61 = vmax.f32 %v650_v44, 0.0  ;;  %v8465_v18 = vpack.c.bf16 %v698_v59, %v697_v13  ;;  %v8528_v59 = vld [vmem:[%s11194_s3 + $0x20] ss:$8 sps:$4 sm:$0xff]  }
 0x145   :  { %v7057_v19 = vpop.f32.mrf.mxu0  ;;  %822 = vmatprep.subr.bf16.mxu1 %v11209_v25 }
 0x146   :  { %v651_v35 = vadd.f32 %v8341_v36, %v597_v24  ;;  %v644_v24 = vadd.f32 %v8341_v36, %v590_v10 }
 0x147   :  { %v467_v20 = vpop.f32.mrf.mxu0 }
 0x148   :  { %v598_v21 = vmul.f32 %v8334_v33, %v467_v20  ;;  %823 = vmatpush1.bf16.msra.mxu1 %v8347_v48  ;;  %v700_v52 = vmax.f32 %v651_v35, 0.0 }
 0x149   :  { %v7060_v23 = vpop.f32.mrf.mxu0  ;;  %830 = vmatprep.subr.bf16.mxu1 %v11209_v25 }
 0x14a   :  { %v652_v27 = vadd.f32 %v8341_v36, %v598_v21  ;;  %v8456_v7 = vpack.c.bf16 %v700_v52, %v699_v61  ;;  %v8517_v61 = vld [vmem:[%s11194_s3 + $0x24] ss:$8 sps:$4 sm:$0xff]  }
 0x14b   :  { %v470_v26 = vpop.f32.mrf.mxu0 }
 0x14c   :  { %v599_v29 = vmul.f32 %v8334_v33, %v470_v26  ;;  %v701_v38 = vmax.f32 %v652_v27, 0.0  ;;  %v695_v26 = vmax.f32 %v646_v12, 0.0  ;;  %v8535_v12 = vcombine.low %v757_v3, %v757_v3 }
 0x14d   :  { %v7061_v31 = vpop.f32.mrf.mxu0 }
 0x14e   :  { %v653_v32 = vadd.f32 %v8341_v36, %v599_v29  ;;  %v694_v31 = vmax.f32 %v645_v16, 0.0 }
 0x14f   :  { %v475_v37 = vpop.f32.mrf.mxu0 }
 0x150   :  { %v702_v41 = vmax.f32 %v653_v32, 0.0  ;;  %v600_v42 = vmul.f32 %v8334_v33, %v475_v37  ;;  %v8476_v32 = vpack.c.bf16 %v696_v17, %v695_v26 }
 0x151   :  { %v7064_v45 = vpop.f32.mrf.mxu0 }
 0x152   :  { %v738_v46 = vpack.c.bf16 %v702_v41, %v701_v38  ;;  %v654_v56 = vadd.f32 %v8341_v36, %v600_v42  ;;  %v693_v38 = vmax.f32 %v644_v24, 0.0 }
 0x153   :  { %v478_v53 = vpop.f32.mrf.mxu0 }
 0x154   :  { %v8443_v55 = vsel %vm804_vm5, %v738_v46, 0  ;;  %v601_v57 = vmul.f32 %v8334_v33, %v478_v53  ;;  %v703_v50 = vmax.f32 %v654_v56, 0.0  ;;  %v886_v20 = vrot.slane %v738_v46, 2  ;;  %v8492_v46 = vld [vmem:[%s11194_s3] ss:$8 sps:$4 sm:$0xff]  }
 0x155   :  { %v7065_v2 = vpop.f32.mrf.mxu0  ;;  %831 = vmatpush2.bf16.msra.mxu1 %v8443_v55  ;;  %v8484_v43 = vpack.c.bf16 %v694_v31, %v693_v38 }
 0x156   :  { %v655_v63 = vadd.f32 %v8341_v36, %v601_v57  ;;  %832 = vmatprep.subr.bf16.mxu1 %v11209_v25 }
 0x157   :  { %v483_v8 = vpop.f32.mrf.mxu0 }
 0x158   :  { %v704_v9 = vmax.f32 %v655_v63, 0.0  ;;  %v602_v54 = vmul.f32 %v8334_v33, %v483_v8 }
 0x159   :  { %v7068_v14 = vpop.f32.mrf.mxu0  ;;  %833 = vmatpush2.bf16.msra.mxu1 %v8456_v7 }
 0x15a   :  { %v739_v40 = vpack.c.bf16 %v704_v9, %v703_v50  ;;  %834 = vmatprep.subr.bf16.mxu1 %v11209_v25  ;;  %v656_v28 = vadd.f32 %v8341_v36, %v602_v54  ;;  %v8530_v50 = vcombine.high %v757_v3, %v757_v3 }
 0x15b   :  { %v486_v19 = vpop.f32.mrf.mxu0 }
 0x15c   :  { %v887_v21 = vrot.slane %v739_v40, 2  ;;  %v603_v23 = vmul.f32 %v8334_v33, %v486_v19  ;;  %v705_v35 = vmax.f32 %v656_v28, 0.0 }
 0x15d   :  { %v7069_v27 = vpop.f32.mrf.mxu0  ;;  %835 = vmatpush2.bf16.msra.mxu1 %v8465_v18 }
 0x15e   :  { %v8472_v29 = vsel %vm885_vm6, %v886_v20, %v887_v21  ;;  %v657_v30 = vadd.f32 %v8341_v36, %v603_v23  ;;  %836 = vmatprep.subr.bf16.mxu1 %v11209_v25 }
 0x15f   :  { %v8478_v34 = vpop.f32.mrf.mxu0 }
 0x160   :  { %v706_v37 = vmax.f32 %v657_v30, 0.0 }
 0x161   :  { %v7072_v41 = vpop.f32.mrf.mxu0  ;;  %837 = vmatpush2.bf16.msra.mxu1 %v8476_v32 }
 0x162   :  { %v8481_v42 = vpack.c.bf16 %v706_v37, %v705_v35  ;;  %838 = vmatprep.subr.bf16.mxu1 %v11209_v25 }
 0x163   :  { %v8486_v44 = vpop.f32.mrf.mxu0 }
 0x164   :  { %v889_v45 = vrot.slane %v8481_v42, 2 }
 0x165   :  { %v7073_v47 = vpop.f32.mrf.mxu0  ;;  %839 = vmatpush2.bf16.msra.mxu1 %v8484_v43 }
 0x166   :  { %v8503_v52 = vsel %vm885_vm6, %v887_v21, %v889_v45  ;;  %926 = vmatprep.subr.bf16.mxu1 %v11209_v25 }
 0x167   :  { %v499_v53 = vpop.f32.mrf.mxu0 }
 0x168   :  { %841 = vmatmul.mubr.bf16.vlgmr.msra.gmra.mxu1 %v8492_v46 }
 0x169   :  { %v7076_v56 = vpop.f32.mrf.mxu0  ;;  %6293 = vmatprep.mubr.msk.bf16.mxu1 %vm791_vm4, %v8498_v51 }
 0x16b   :  { %v502_v57 = vpop.f32.mrf.mxu0 }
 0x16d   :  { %v7077_v0 = vpop.f32.mrf.mxu0 }
 0x16f   :  { %v507_v2 = vpop.f32.mrf.mxu0 }
 0x170   :  { %849 = vmatmul.mubr.bf16.gmra.mxu1 %v8512_v60  ;;  %v608_v56 = vmul.f32 %v8334_v33, %v507_v2 }
 0x171   :  { %v7080_v63 = vpop.f32.mrf.mxu0  ;;  %6294 = vmatprep.mubr.msk.bf16.mxu1 %vm791_vm4, %v8517_v61 }
 0x172   :  { %v662_v2 = vadd.f32 %v8341_v36, %v608_v56 }
 0x173   :  { %v510_v4 = vpop.f32.mrf.mxu0 }
 0x175   :  { %v7081_v8 = vpop.f32.mrf.mxu0 }
 0x176   :  { %v607_v8 = vmul.f32 %v8334_v33, %v502_v57 }
 0x177   :  { %v515_v9 = vpop.f32.mrf.mxu0 }
 0x178   :  { %857 = vmatmul.mubr.bf16.gmra.mxu1 %v8528_v59  ;;  %v610_v27 = vmul.f32 %v8334_v33, %v515_v9  ;;  %v661_v57 = vadd.f32 %v8341_v36, %v607_v8 }
 0x179   :  { %v7084_v54 = vpop.f32.mrf.mxu0  ;;  %6295 = vmatprep.mubr.msk.bf16.mxu1 %vm791_vm4, %v8530_v50 }
 0x17a   :  { %v664_v0 = vadd.f32 %v8341_v36, %v610_v27 }
 0x17b   :  { %v518_v10 = vpop.f32.mrf.mxu0 }
 0x17c   :  { %v611_v28 = vmul.f32 %v8334_v33, %v518_v10 }
 0x17d   :  { %v7085_v13 = vpop.f32.mrf.mxu0 }
 0x17e   :  { %v665_v35 = vadd.f32 %v8341_v36, %v611_v28 }
 0x17f   :  { %v523_v14 = vpop.f32.mrf.mxu0 }
 0x180   :  { %865 = vmatmul.mubr.bf16.gmra.mxu1 %v8535_v12  ;;  %v612_v20 = vmul.f32 %v8334_v33, %v523_v14  ;;  %v714_v54 = vmax.f32 %v665_v35, 0.0 }
 0x181   :  { %v7088_v40 = vpop.f32.mrf.mxu0  ;;  %6296 = vmatprep.mubr.msk.bf16.mxu1 %vm791_vm4, %v8359_v6  ;;  %v609_v6 = vmul.f32 %v8334_v33, %v510_v4 }
 0x182   :  { %v666_v30 = vadd.f32 %v8341_v36, %v612_v20  ;;  %v605_v20 = vmul.f32 %v8334_v33, %v8486_v44 }
 0x183   :  { %v526_v16 = vpop.f32.mrf.mxu0  ;;  %v663_v4 = vadd.f32 %v8341_v36, %v609_v6  ;;  %v711_v6 = vmax.f32 %v662_v2, 0.0 }
 0x184   :  { %v613_v17 = vmul.f32 %v8334_v33, %v526_v16  ;;  %v715_v63 = vmax.f32 %v666_v30, 0.0  ;;  %v606_v16 = vmul.f32 %v8334_v33, %v499_v53  ;;  %v604_v53 = vmul.f32 %v8334_v33, %v8478_v34 }
 0x185   :  { %v7089_v19 = vpop.f32.mrf.mxu0  ;;  %v712_v28 = vmax.f32 %v663_v4, 0.0  ;;  %v659_v35 = vadd.f32 %v8341_v36, %v605_v20 }
 0x186   :  { %v667_v23 = vadd.f32 %v8341_v36, %v613_v17  ;;  %v713_v17 = vmax.f32 %v664_v0, 0.0  ;;  %v660_v30 = vadd.f32 %v8341_v36, %v606_v16 }
 0x187   :  { %v531_v21 = vpop.f32.mrf.mxu0 }
 0x188   :  { %v614_v24 = vmul.f32 %v8334_v33, %v531_v21  ;;  %v716_v37 = vmax.f32 %v667_v23, 0.0  ;;  %v744_v23 = vpack.c.bf16 %v714_v54, %v713_v17  ;;  %v709_v56 = vmax.f32 %v660_v30, 0.0 }
 0x189   :  { %v7092_v26 = vpop.f32.mrf.mxu0 }
 0x18a   :  { %v668_v38 = vadd.f32 %v8341_v36, %v614_v24  ;;  %v745_v10 = vpack.c.bf16 %v716_v37, %v715_v63  ;;  %v710_v37 = vmax.f32 %v661_v57, 0.0 }
 0x18b   :  { %v534_v31 = vpop.f32.mrf.mxu0 }
 0x18c   :  { %v615_v41 = vmul.f32 %v8334_v33, %v534_v31  ;;  %v717_v13 = vmax.f32 %v668_v38, 0.0  ;;  %v899_v24 = vrot.slane %v745_v10, 2  ;;  %v743_v38 = vpack.c.bf16 %v712_v28, %v711_v6 }
 0x18d   :  { %v7093_v47 = vpop.f32.mrf.mxu0  ;;  %v742_v8 = vpack.c.bf16 %v710_v37, %v709_v56 }
 0x18e   :  { %v669_v3 = vadd.f32 %v8341_v36, %v615_v41  ;;  %v897_v41 = vrot.slane %v744_v23, 2  ;;  %v658_v47 = vadd.f32 %v8341_v36, %v604_v53  ;;  %v895_v4 = vrot.slane %v743_v38, 2 }
 0x18f   :  { %v8556_v9 = vpop.f32.mrf.mxu0  ;;  %v893_v16 = vrot.slane %v742_v8, 2 }
 0x190   :  { %v718_v14 = vmax.f32 %v669_v3, 0.0  ;;  %v8583_v0 = vsel %vm885_vm6, %v897_v41, %v899_v24  ;;  %v708_v3 = vmax.f32 %v659_v35, 0.0  ;;  %v707_v10 = vmax.f32 %v658_v47, 0.0 }
 0x191   :  { %v7096_v40 = vpop.f32.mrf.mxu0  ;;  %v8597_v17 = vsel %vm885_vm6, %v893_v16, %v895_v4 }
 0x192   :  { %v8560_v19 = vpack.c.bf16 %v718_v14, %v717_v13  ;;  %v8590_v13 = vsel %vm885_vm6, %v895_v4, %v897_v41  ;;  %v741_v40 = vpack.c.bf16 %v708_v3, %v707_v10 }
 0x193   :  { %v8565_v21 = vpop.f32.mrf.mxu0 }
 0x194   :  { %v901_v26 = vrot.slane %v8560_v19, 2  ;;  %v891_v57 = vrot.slane %v741_v40, 2  ;;  %v617_v8 = vmul.f32 %v8334_v33, %v8565_v21  ;;  %v8688_v19 = vld [vmem:[%s11194_s3 + $0x4c] ss:$8 sps:$4 sm:$0xff]  }
 0x195   :  { %v7097_v27 = vpop.f32.mrf.mxu0 }
 0x196   :  { %v8574_v44 = vsel %vm885_vm6, %v899_v24, %v901_v26  ;;  %v8604_v23 = vsel %vm885_vm6, %v891_v57, %v893_v16  ;;  %v8616_v35 = vsel %vm885_vm6, %v889_v45, %v891_v57  ;;  %v671_v40 = vadd.f32 %v8341_v36, %v617_v8 }
 0x197   :  { %927 = vmatpush1.bf16.msra.mxu1 %v8574_v44  ;;  %1137 = vmatpush1.bf16.msra.mxu0 %v8574_v44  ;;  %v547_v31 = vpop.f32.mrf.mxu0 }
 0x198   :  { %928 = vmatprep.subr.bf16.mxu1 %v11209_v25  ;;  %1138 = vmatprep.subr.bf16.mxu0 %v11209_v25  ;;  %v618_v38 = vmul.f32 %v8334_v33, %v547_v31  ;;  %v616_v31 = vmul.f32 %v8334_v33, %v8556_v9 }
 0x199   :  { %v7100_v34 = vpop.f32.mrf.mxu0 }
 0x19a   :  { %v670_v9 = vadd.f32 %v8341_v36, %v616_v31  ;;  %v8870_v31 = vld [vmem:[%s11194_s3 + $0xac] ss:$8 sps:$4 sm:$0xff]  }
 0x19b   :  { %929 = vmatpush1.bf16.msra.mxu1 %v8583_v0  ;;  %1139 = vmatpush1.bf16.msra.mxu0 %v8583_v0  ;;  %v550_v63 = vpop.f32.mrf.mxu0 }
 0x19c   :  { %930 = vmatprep.subr.bf16.mxu1 %v11209_v25  ;;  %1140 = vmatprep.subr.bf16.mxu0 %v11209_v25  ;;  %v619_v34 = vmul.f32 %v8334_v33, %v550_v63  ;;  %v672_v63 = vadd.f32 %v8341_v36, %v618_v38 }
 0x19d   :  { %v7101_v54 = vpop.f32.mrf.mxu0 }
 0x19e   :  { %v673_v4 = vadd.f32 %v8341_v36, %v619_v34 }
 0x19f   :  { %931 = vmatpush1.bf16.msra.mxu1 %v8590_v13  ;;  %1141 = vmatpush1.bf16.msra.mxu0 %v8590_v13  ;;  %v555_v14 = vpop.f32.mrf.mxu0 }
 0x1a0   :  { %932 = vmatprep.subr.bf16.mxu1 %v11209_v25  ;;  %1142 = vmatprep.subr.bf16.mxu0 %v11209_v25  ;;  %v620_v27 = vmul.f32 %v8334_v33, %v555_v14  ;;  %v722_v21 = vmax.f32 %v673_v4, 0.0 }
 0x1a1   :  { %v7104_v2 = vpop.f32.mrf.mxu0 }
 0x1a2   :  { %v674_v47 = vadd.f32 %v8341_v36, %v620_v27 }
 0x1a3   :  { %933 = vmatpush1.bf16.msra.mxu1 %v8597_v17  ;;  %1143 = vmatpush1.bf16.msra.mxu0 %v8597_v17  ;;  %v558_v20 = vpop.f32.mrf.mxu0 }
 0x1a4   :  { %934 = vmatprep.subr.bf16.mxu1 %v11209_v25  ;;  %1144 = vmatprep.subr.bf16.mxu0 %v11209_v25  ;;  %v621_v53 = vmul.f32 %v8334_v33, %v558_v20  ;;  %v723_v54 = vmax.f32 %v674_v47, 0.0  ;;  %v719_v20 = vmax.f32 %v670_v9, 0.0  ;;  %v8825_v47 = vld [vmem:[%s11194_s3 + $0x94] ss:$8 sps:$4 sm:$0xff]  }
 0x1a5   :  { %v7105_v28 = vpop.f32.mrf.mxu0  ;;  %v8920_v9 = vld [vmem:[%s11194_s3 + $0xbc] ss:$8 sps:$4 sm:$0xff]  }
 0x1a6   :  { %v675_v56 = vadd.f32 %v8341_v36, %v621_v53 }
 0x1a7   :  { %935 = vmatpush1.bf16.msra.mxu1 %v8604_v23  ;;  %1145 = vmatpush1.bf16.msra.mxu0 %v8604_v23  ;;  %v563_v24 = vpop.f32.mrf.mxu0 }
 0x1a8   :  { %936 = vmatprep.subr.bf16.mxu1 %v11209_v25  ;;  %1146 = vmatprep.subr.bf16.mxu0 %v11209_v25  ;;  %v622_v30 = vmul.f32 %v8334_v33, %v563_v24  ;;  %v724_v10 = vmax.f32 %v675_v56, 0.0  ;;  %v721_v33 = vmax.f32 %v672_v63, 0.0  ;;  %v8840_v56 = vld [vmem:[%s11194_s3 + $0x90] ss:$8 sps:$4 sm:$0xff]  }
 0x1a9   :  { %v7108_v6 = vpop.f32.mrf.mxu0 }
 0x1aa   :  { %v676_v37 = vadd.f32 %v8341_v36, %v622_v30  ;;  %v749_v16 = vpack.c.bf16 %v724_v10, %v723_v54  ;;  %v720_v36 = vmax.f32 %v671_v40, 0.0  ;;  %v748_v57 = vpack.c.bf16 %v722_v21, %v721_v33  ;;  %v8909_v54 = vld [vmem:[%s11194_s3 + $0xa8] ss:$8 sps:$4 sm:$0xff]   ;;  %v8937_v21 = vld [vmem:[%s11194_s3 + $0xb8] ss:$8 sps:$4 sm:$0xff]  }
 0x1ab   :  { %937 = vmatpush1.bf16.msra.mxu1 %v8616_v35  ;;  %1147 = vmatpush1.bf16.msra.mxu0 %v8616_v35  ;;  %v566_v41 = vpop.f32.mrf.mxu0 }
 0x1ac   :  { %v725_v3 = vmax.f32 %v676_v37, 0.0  ;;  %938 = vmatprep.subr.bf16.mxu1 %v11209_v25  ;;  %1148 = vmatprep.subr.bf16.mxu0 %v11209_v25  ;;  %v907_v28 = vrot.slane %v749_v16, 2  ;;  %v747_v27 = vpack.c.bf16 %v720_v36, %v719_v20  ;;  %v905_v53 = vrot.slane %v748_v57, 2  ;;  %v8679_v41 = vld [vmem:[%s11194_s3 + $0x38] ss:$8 sps:$4 sm:$0xff]  }
 0x1ad   :  { %v7109_v42 = vpop.f32.mrf.mxu0  ;;  %v8948_v36 = vld [vmem:[%s11194_s3 + $0xcc] ss:$8 sps:$4 sm:$0xff]  }
 0x1ae   :  { %v750_v45 = vpack.c.bf16 %v725_v3, %v725_v3  ;;  %v8658_v30 = vsel %vm885_vm6, %v905_v53, %v907_v28  ;;  %v903_v6 = vrot.slane %v747_v27, 2  ;;  %v6329_v3 = vld [vmem:[%s11194_s3 + $0xa0] sm:$0x11]  ;;  %v8965_v27 = vld [vmem:[%s11194_s3 + $0xc8] ss:$8 sps:$4 sm:$0xff]  }
 0x1af   :  { %939 = vmatpush1.bf16.msra.mxu1 %v8503_v52  ;;  %1149 = vmatpush1.bf16.msra.mxu0 %v8503_v52  ;;  %v8849_v42 = vcombine.high %v6329_v3, %v6329_v3 }
 0x1b0   :  { %940 = vmatprep.subr.bf16.mxu1 %v11209_v25  ;;  %1150 = vmatprep.subr.bf16.mxu0 %v11209_v25  ;;  %v909_v14 = vrot.slane %v750_v45, 2  ;;  %v8665_v37 = vsel %vm885_vm6, %v903_v6, %v905_v53  ;;  %v8674_v38 = vsel %vm885_vm6, %v901_v26, %v903_v6  ;;  %v6306_v26 = vld [vmem:[%s11194_s3 + $0x68] sm:$0x11]  ;;  %v8861_v45 = vcombine.low %v6329_v3, %v6329_v3  ;;  %v6352_v53 = vld [vmem:[%s11194_s3 + $0xd8] sm:$0x11] }
 0x1b1   :  { %v8748_v34 = vcombine.low %v6306_v26, %v6306_v26 }
 0x1b2   :  { %v8642_v2 = vsel %vm804_vm5, %v909_v14, 0  ;;  %v8651_v24 = vsel %vm885_vm6, %v907_v28, %v909_v14 }
 0x1b3   :  { %941 = vmatpush1.bf16.msra.mxu1 %v8472_v29  ;;  %1151 = vmatpush1.bf16.msra.mxu0 %v8472_v29 }
 0x1b4   :  { %948 = vmatprep.subr.bf16.mxu1 %v11209_v25  ;;  %1158 = vmatprep.subr.bf16.mxu0 %v11209_v25 }
 0x1b7   :  { %949 = vmatpush2.bf16.msra.mxu1 %v8642_v2  ;;  %1159 = vmatpush2.bf16.msra.mxu0 %v8642_v2 }
 0x1b8   :  { %950 = vmatprep.subr.bf16.mxu1 %v11209_v25  ;;  %1160 = vmatprep.subr.bf16.mxu0 %v11209_v25 }
 0x1bb   :  { %951 = vmatpush2.bf16.msra.mxu1 %v8651_v24  ;;  %1161 = vmatpush2.bf16.msra.mxu0 %v8651_v24 }
 0x1bc   :  { %952 = vmatprep.subr.bf16.mxu1 %v11209_v25  ;;  %1162 = vmatprep.subr.bf16.mxu0 %v11209_v25 }
 0x1bf   :  { %953 = vmatpush2.bf16.msra.mxu1 %v8658_v30  ;;  %1163 = vmatpush2.bf16.msra.mxu0 %v8658_v30 }
 0x1c0   :  { %954 = vmatprep.subr.bf16.mxu1 %v11209_v25  ;;  %1164 = vmatprep.subr.bf16.mxu0 %v11209_v25 }
 0x1c3   :  { %955 = vmatpush2.bf16.msra.mxu1 %v8665_v37  ;;  %1165 = vmatpush2.bf16.msra.mxu0 %v8665_v37 }
 0x1c4   :  { %956 = vmatprep.subr.bf16.mxu1 %v11209_v25  ;;  %1166 = vmatprep.subr.bf16.mxu0 %v11209_v25 }
 0x1c7   :  { %957 = vmatpush2.bf16.msra.mxu1 %v8674_v38  ;;  %1167 = vmatpush2.bf16.msra.mxu0 %v8674_v38 }
 0x1c8   :  { %1072 = vmatprep.subr.bf16.mxu1 %v11209_v25  ;;  %1339 = vmatprep.subr.bf16.mxu0 %v11209_v25 }
 0x1ca   :  { %959 = vmatmul.mubr.bf16.vlgmr.msra.gmra.mxu1 %v8492_v46  ;;  %1169 = vmatmul.mubr.bf16.vlgmr.msra.gmra.mxu0 %v8679_v41  ;;  %v8703_v46 = vld [vmem:[%s11194_s3 + $0x48] ss:$8 sps:$4 sm:$0xff]  }
 0x1cb   :  { %1073 = vmatpush1.bf16.msra.mxu1 %v8377_v39  ;;  %1340 = vmatpush1.bf16.msra.mxu0 %v8574_v44 }
 0x1cc   :  { %1074 = vmatprep.subr.bf16.mxu1 %v11209_v25  ;;  %1341 = vmatprep.subr.bf16.mxu0 %v11209_v25 }
 0x1cd   :  { %6297 = vmatprep.mubr.msk.bf16.mxu1 %vm791_vm4, %v8498_v51  ;;  %6320 = vmatprep.mubr.msk.bf16.mxu0 %vm791_vm4, %v8688_v19  ;;  %v8712_v51 = vld [vmem:[%s11194_s3 + $0x5c] ss:$8 sps:$4 sm:$0xff]  }
 0x1cf   :  { %1075 = vmatpush1.bf16.msra.mxu1 %v8387_v49  ;;  %1342 = vmatpush1.bf16.msra.mxu0 %v8583_v0 }
 0x1d0   :  { %1076 = vmatprep.subr.bf16.mxu1 %v11209_v25  ;;  %1343 = vmatprep.subr.bf16.mxu0 %v11209_v25 }
 0x1d2   :  { %967 = vmatmul.mubr.bf16.gmra.mxu1 %v8512_v60  ;;  %1177 = vmatmul.mubr.bf16.gmra.mxu0 %v8703_v46  ;;  %v8727_v60 = vld [vmem:[%s11194_s3 + $0x58] ss:$8 sps:$4 sm:$0xff]  }
 0x1d3   :  { %1077 = vmatpush1.bf16.msra.mxu1 %v8397_v62  ;;  %1344 = vmatpush1.bf16.msra.mxu0 %v8590_v13 }
 0x1d4   :  { %1078 = vmatprep.subr.bf16.mxu1 %v11209_v25  ;;  %1345 = vmatprep.subr.bf16.mxu0 %v11209_v25 }
 0x1d5   :  { %6298 = vmatprep.mubr.msk.bf16.mxu1 %vm791_vm4, %v8517_v61  ;;  %6321 = vmatprep.mubr.msk.bf16.mxu0 %vm791_vm4, %v8712_v51  ;;  %v8736_v61 = vcombine.high %v6306_v26, %v6306_v26 }
 0x1d7   :  { %1079 = vmatpush1.bf16.msra.mxu1 %v8405_v5  ;;  %1346 = vmatpush1.bf16.msra.mxu0 %v8597_v17 }
 0x1d8   :  { %1080 = vmatprep.subr.bf16.mxu1 %v11209_v25  ;;  %1347 = vmatprep.subr.bf16.mxu0 %v11209_v25 }
 0x1da   :  { %975 = vmatmul.mubr.bf16.gmra.mxu1 %v8528_v59  ;;  %1185 = vmatmul.mubr.bf16.gmra.mxu0 %v8727_v60  ;;  %v8757_v59 = vld [vmem:[%s11194_s3 + $0x74] ss:$8 sps:$4 sm:$0xff]  }
 0x1db   :  { %1081 = vmatpush1.bf16.msra.mxu1 %v8410_v11  ;;  %1348 = vmatpush1.bf16.msra.mxu0 %v8604_v23 }
 0x1dc   :  { %1082 = vmatprep.subr.bf16.mxu1 %v11209_v25  ;;  %1349 = vmatprep.subr.bf16.mxu0 %v11209_v25 }
 0x1dd   :  { %6299 = vmatprep.mubr.msk.bf16.mxu1 %vm791_vm4, %v8530_v50  ;;  %6322 = vmatprep.mubr.msk.bf16.mxu0 %vm791_vm4, %v8736_v61  ;;  %v8801_v50 = vld [vmem:[%s11194_s3 + $0x84] ss:$8 sps:$4 sm:$0xff]  }
 0x1df   :  { %1083 = vmatpush1.bf16.msra.mxu1 %v8414_v15  ;;  %1350 = vmatpush1.bf16.msra.mxu0 %v8616_v35 }
 0x1e0   :  { %1084 = vmatprep.subr.bf16.mxu1 %v11209_v25  ;;  %1351 = vmatprep.subr.bf16.mxu0 %v11209_v25 }
 0x1e2   :  { %983 = vmatmul.mubr.bf16.gmra.mxu1 %v8535_v12  ;;  %1193 = vmatmul.mubr.bf16.gmra.mxu0 %v8748_v34  ;;  %v8816_v12 = vld [vmem:[%s11194_s3 + $0x80] ss:$8 sps:$4 sm:$0xff]  }
 0x1e3   :  { %1085 = vmatpush1.bf16.msra.mxu1 %v8354_v58  ;;  %1352 = vmatpush1.bf16.msra.mxu0 %v8503_v52 }
 0x1e4   :  { %1086 = vmatprep.subr.bf16.mxu1 %v11209_v25  ;;  %1353 = vmatprep.subr.bf16.mxu0 %v11209_v25 }
 0x1e5   :  { %6315 = vmatprep.mubr.msk.bf16.mxu1 %vm791_vm4, %v8425_v22  ;;  %6342 = vmatprep.mubr.msk.bf16.mxu0 %vm791_vm4, %v8757_v59  ;;  %v8792_v22 = vld [vmem:[%s11194_s3 + $0x70] ss:$8 sps:$4 sm:$0xff]  }
 0x1e7   :  { %1087 = vmatpush1.bf16.msra.mxu1 %v8347_v48  ;;  %1354 = vmatpush1.bf16.msra.mxu0 %v8472_v29 }
 0x1e8   :  { %1094 = vmatprep.subr.bf16.mxu1 %v11209_v25  ;;  %1361 = vmatprep.subr.bf16.mxu0 %v11209_v25 }
 0x1eb   :  { %1095 = vmatpush2.bf16.msra.mxu1 %v8443_v55  ;;  %1362 = vmatpush2.bf16.msra.mxu0 %v8642_v2 }
 0x1ec   :  { %1096 = vmatprep.subr.bf16.mxu1 %v11209_v25  ;;  %1363 = vmatprep.subr.bf16.mxu0 %v11209_v25 }
 0x1ef   :  { %1097 = vmatpush2.bf16.msra.mxu1 %v8456_v7  ;;  %1364 = vmatpush2.bf16.msra.mxu0 %v8651_v24 }
 0x1f0   :  { %1098 = vmatprep.subr.bf16.mxu1 %v11209_v25  ;;  %1365 = vmatprep.subr.bf16.mxu0 %v11209_v25 }
 0x1f3   :  { %1099 = vmatpush2.bf16.msra.mxu1 %v8465_v18  ;;  %1366 = vmatpush2.bf16.msra.mxu0 %v8658_v30 }
 0x1f4   :  { %1100 = vmatprep.subr.bf16.mxu1 %v11209_v25  ;;  %1367 = vmatprep.subr.bf16.mxu0 %v11209_v25 }
 0x1f7   :  { %1101 = vmatpush2.bf16.msra.mxu1 %v8476_v32  ;;  %1368 = vmatpush2.bf16.msra.mxu0 %v8665_v37 }
 0x1f8   :  { %1102 = vmatprep.subr.bf16.mxu1 %v11209_v25  ;;  %1369 = vmatprep.subr.bf16.mxu0 %v11209_v25 }
 0x1fb   :  { %1103 = vmatpush2.bf16.msra.mxu1 %v8484_v43  ;;  %1370 = vmatpush2.bf16.msra.mxu0 %v8674_v38 }
 0x1fc   :  { %1275 = vmatprep.subr.bf16.mxu1 %v11209_v25  ;;  %1542 = vmatprep.subr.bf16.mxu0 %v11209_v25 }
 0x1fe   :  { %1105 = vmatmul.mubr.bf16.vlgmr.msra.gmra.mxu1 %v8679_v41  ;;  %1372 = vmatmul.mubr.bf16.vlgmr.msra.gmra.mxu0 %v8792_v22 }
 0x1ff   :  { %1276 = vmatpush1.bf16.msra.mxu1 %v8377_v39  ;;  %1543 = vmatpush1.bf16.msra.mxu0 %v8574_v44 }
 0x200   :  { %1277 = vmatprep.subr.bf16.mxu1 %v11209_v25  ;;  %1544 = vmatprep.subr.bf16.mxu0 %v11209_v25 }
 0x201   :  { %6316 = vmatprep.mubr.msk.bf16.mxu1 %vm791_vm4, %v8688_v19  ;;  %6343 = vmatprep.mubr.msk.bf16.mxu0 %vm791_vm4, %v8801_v50  ;;  %v8976_v19 = vcombine.high %v6352_v53, %v6352_v53 }
 0x203   :  { %1278 = vmatpush1.bf16.msra.mxu1 %v8387_v49  ;;  %1545 = vmatpush1.bf16.msra.mxu0 %v8583_v0 }
 0x204   :  { %1279 = vmatprep.subr.bf16.mxu1 %v11209_v25  ;;  %1546 = vmatprep.subr.bf16.mxu0 %v11209_v25 }
 0x206   :  { %1113 = vmatmul.mubr.bf16.gmra.mxu1 %v8703_v46  ;;  %1380 = vmatmul.mubr.bf16.gmra.mxu0 %v8816_v12 }
 0x207   :  { %1280 = vmatpush1.bf16.msra.mxu1 %v8397_v62  ;;  %1547 = vmatpush1.bf16.msra.mxu0 %v8590_v13 }
 0x208   :  { %1281 = vmatprep.subr.bf16.mxu1 %v11209_v25  ;;  %1548 = vmatprep.subr.bf16.mxu0 %v11209_v25 }
 0x209   :  { %6317 = vmatprep.mubr.msk.bf16.mxu1 %vm791_vm4, %v8712_v51  ;;  %6344 = vmatprep.mubr.msk.bf16.mxu0 %vm791_vm4, %v8825_v47 }
 0x20b   :  { %1282 = vmatpush1.bf16.msra.mxu1 %v8405_v5  ;;  %1549 = vmatpush1.bf16.msra.mxu0 %v8597_v17 }
 0x20c   :  { %1283 = vmatprep.subr.bf16.mxu1 %v11209_v25  ;;  %1550 = vmatprep.subr.bf16.mxu0 %v11209_v25 }
 0x20e   :  { %1121 = vmatmul.mubr.bf16.gmra.mxu1 %v8727_v60  ;;  %1388 = vmatmul.mubr.bf16.gmra.mxu0 %v8840_v56  ;;  %v8988_v60 = vcombine.low %v6352_v53, %v6352_v53 }
 0x20f   :  { %1284 = vmatpush1.bf16.msra.mxu1 %v8410_v11  ;;  %1551 = vmatpush1.bf16.msra.mxu0 %v8604_v23 }
 0x210   :  { %1285 = vmatprep.subr.bf16.mxu1 %v11209_v25  ;;  %1552 = vmatprep.subr.bf16.mxu0 %v11209_v25 }
 0x211   :  { %6318 = vmatprep.mubr.msk.bf16.mxu1 %vm791_vm4, %v8736_v61  ;;  %6345 = vmatprep.mubr.msk.bf16.mxu0 %vm791_vm4, %v8849_v42  ;;  %v8997_v61 = vld [vmem:[%s11194_s3 + $0xe4] ss:$8 sps:$4 sm:$0xff]  }
 0x213   :  { %1286 = vmatpush1.bf16.msra.mxu1 %v8414_v15  ;;  %1553 = vmatpush1.bf16.msra.mxu0 %v8616_v35 }
 0x214   :  { %1287 = vmatprep.subr.bf16.mxu1 %v11209_v25  ;;  %1554 = vmatprep.subr.bf16.mxu0 %v11209_v25 }
 0x216   :  { %1129 = vmatmul.mubr.bf16.gmra.mxu1 %v8748_v34  ;;  %1396 = vmatmul.mubr.bf16.gmra.mxu0 %v8861_v45  ;;  %v9032_v34 = vld [vmem:[%s11194_s3 + $0xe0] ss:$8 sps:$4 sm:$0xff]  }
 0x217   :  { %1288 = vmatpush1.bf16.msra.mxu1 %v8354_v58  ;;  %1555 = vmatpush1.bf16.msra.mxu0 %v8503_v52 }
 0x218   :  { %1289 = vmatprep.subr.bf16.mxu1 %v11209_v25  ;;  %1556 = vmatprep.subr.bf16.mxu0 %v11209_v25 }
 0x219   :  { %6338 = vmatprep.mubr.msk.bf16.mxu1 %vm791_vm4, %v8757_v59  ;;  %6365 = vmatprep.mubr.msk.bf16.mxu0 %vm791_vm4, %v8870_v31  ;;  %v9041_v59 = vld [vmem:[%s11194_s3 + $0xf4] ss:$8 sps:$4 sm:$0xff]  }
 0x21b   :  { %1290 = vmatpush1.bf16.msra.mxu1 %v8347_v48  ;;  %1557 = vmatpush1.bf16.msra.mxu0 %v8472_v29 }
 0x21c   :  { %1297 = vmatprep.subr.bf16.mxu1 %v11209_v25  ;;  %1564 = vmatprep.subr.bf16.mxu0 %v11209_v25 }
 0x21f   :  { %1298 = vmatpush2.bf16.msra.mxu1 %v8443_v55  ;;  %1565 = vmatpush2.bf16.msra.mxu0 %v8642_v2 }
 0x220   :  { %1299 = vmatprep.subr.bf16.mxu1 %v11209_v25  ;;  %1566 = vmatprep.subr.bf16.mxu0 %v11209_v25 }
 0x223   :  { %1300 = vmatpush2.bf16.msra.mxu1 %v8456_v7  ;;  %1567 = vmatpush2.bf16.msra.mxu0 %v8651_v24 }
 0x224   :  { %1301 = vmatprep.subr.bf16.mxu1 %v11209_v25  ;;  %1568 = vmatprep.subr.bf16.mxu0 %v11209_v25 }
 0x227   :  { %1302 = vmatpush2.bf16.msra.mxu1 %v8465_v18  ;;  %1569 = vmatpush2.bf16.msra.mxu0 %v8658_v30 }
 0x228   :  { %1303 = vmatprep.subr.bf16.mxu1 %v11209_v25  ;;  %1570 = vmatprep.subr.bf16.mxu0 %v11209_v25  ;;  %v8898_v8 = vpop.f32.mrf.mxu1 }
 0x229   :  { %11220 = vst [vmem:[#allocation9_spill] sm:$0xff] %v8898_v8 }
 0x22a   :  { %v844_v63 = vpop.f32.mrf.mxu1 }
 0x22b   :  { %1304 = vmatpush2.bf16.msra.mxu1 %v8476_v32  ;;  %1571 = vmatpush2.bf16.msra.mxu0 %v8665_v37 }
 0x22c   :  { %1305 = vmatprep.subr.bf16.mxu1 %v11209_v25  ;;  %1572 = vmatprep.subr.bf16.mxu0 %v11209_v25  ;;  %v8904_v4 = vpop.f32.mrf.mxu1 }
 0x22d   :  { %11221 = vst [vmem:[#allocation10_spill] sm:$0xff] %v8904_v4  ;;  %v9363_v4 = vld [vmem:[%s11194_s3 + $0x174] ss:$8 sps:$4 sm:$0xff]  }
 0x22e   :  { %v847_v10 = vpop.f32.mrf.mxu1 }
 0x22f   :  { %1306 = vmatpush2.bf16.msra.mxu1 %v8484_v43  ;;  %1573 = vmatpush2.bf16.msra.mxu0 %v8674_v38 }
 0x230   :  { %1478 = vmatprep.subr.bf16.mxu1 %v11209_v25  ;;  %1745 = vmatprep.subr.bf16.mxu0 %v11209_v25  ;;  %v8915_v14 = vpop.f32.mrf.mxu1 }
 0x231   :  { %11222 = vst [vmem:[#allocation11_spill] sm:$0xff] %v8915_v14 }
 0x232   :  { %1308 = vmatmul.mubr.bf16.vlgmr.msra.gmra.mxu1 %v8792_v22  ;;  %1575 = vmatmul.mubr.bf16.vlgmr.msra.gmra.mxu0 %v8909_v54  ;;  %v852_v40 = vpop.f32.mrf.mxu1  ;;  %v9056_v22 = vld [vmem:[%s11194_s3 + $0xf0] ss:$8 sps:$4 sm:$0xff]  }
 0x233   :  { %1479 = vmatpush1.bf16.msra.mxu1 %v8377_v39  ;;  %1746 = vmatpush1.bf16.msra.mxu0 %v8574_v44 }
 0x234   :  { %1480 = vmatprep.subr.bf16.mxu1 %v11209_v25  ;;  %1747 = vmatprep.subr.bf16.mxu0 %v11209_v25  ;;  %v8928_v33 = vpop.f32.mrf.mxu1 }
 0x235   :  { %11223 = vst [vmem:[#allocation12_spill] sm:$0xff] %v8928_v33  ;;  %6339 = vmatprep.mubr.msk.bf16.mxu1 %vm791_vm4, %v8801_v50  ;;  %6366 = vmatprep.mubr.msk.bf16.mxu0 %vm791_vm4, %v8920_v9  ;;  %v9065_v50 = vld [vmem:[%s11194_s3 + $0x104] ss:$8 sps:$4 sm:$0xff]  }
 0x236   :  { %v855_v16 = vpop.f32.mrf.mxu1 }
 0x237   :  { %1481 = vmatpush1.bf16.msra.mxu1 %v8387_v49  ;;  %1748 = vmatpush1.bf16.msra.mxu0 %v8583_v0 }
 0x238   :  { %1482 = vmatprep.subr.bf16.mxu1 %v11209_v25  ;;  %1749 = vmatprep.subr.bf16.mxu0 %v11209_v25  ;;  %v8943_v20 = vpop.f32.mrf.mxu1 }
 0x239   :  { %11224 = vst [vmem:[#allocation13_spill] sm:$0xff] %v8943_v20 }
 0x23a   :  { %1316 = vmatmul.mubr.bf16.gmra.mxu1 %v8816_v12  ;;  %1583 = vmatmul.mubr.bf16.gmra.mxu0 %v8937_v21  ;;  %v860_v57 = vpop.f32.mrf.mxu1  ;;  %v9080_v12 = vld [vmem:[%s11194_s3 + $0x100] ss:$8 sps:$4 sm:$0xff]  }
 0x23b   :  { %1483 = vmatpush1.bf16.msra.mxu1 %v8397_v62  ;;  %1750 = vmatpush1.bf16.msra.mxu0 %v8590_v13 }
 0x23c   :  { %1484 = vmatprep.subr.bf16.mxu1 %v11209_v25  ;;  %1751 = vmatprep.subr.bf16.mxu0 %v11209_v25  ;;  %v8956_v28 = vpop.f32.mrf.mxu1 }
 0x23d   :  { %11225 = vst [vmem:[#allocation14_spill] sm:$0xff] %v8956_v28  ;;  %6340 = vmatprep.mubr.msk.bf16.mxu1 %vm791_vm4, %v8825_v47  ;;  %6367 = vmatprep.mubr.msk.bf16.mxu0 %vm791_vm4, %v8948_v36  ;;  %v6375_v47 = vld [vmem:[%s11194_s3 + $0x110] sm:$0x11] }
 0x23e   :  { %v863_v6 = vpop.f32.mrf.mxu1  ;;  %v9101_v3 = vcombine.low %v6375_v47, %v6375_v47 }
 0x23f   :  { %1485 = vmatpush1.bf16.msra.mxu1 %v8405_v5  ;;  %1752 = vmatpush1.bf16.msra.mxu0 %v8597_v17 }
 0x240   :  { %1486 = vmatprep.subr.bf16.mxu1 %v11209_v25  ;;  %1753 = vmatprep.subr.bf16.mxu0 %v11209_v25  ;;  %v8974_v41 = vpop.f32.mrf.mxu1 }
 0x241   :  { %11226 = vst [vmem:[#allocation15_spill] sm:$0xff] %v8974_v41  ;;  %v9518_v41 = vld [vmem:[%s11194_s3 + $0x1ac] ss:$8 sps:$4 sm:$0xff]  }
 0x242   :  { %1324 = vmatmul.mubr.bf16.gmra.mxu1 %v8840_v56  ;;  %1591 = vmatmul.mubr.bf16.gmra.mxu0 %v8965_v27  ;;  %v868_v46 = vpop.f32.mrf.mxu1  ;;  %v9089_v56 = vcombine.high %v6375_v47, %v6375_v47 }
 0x243   :  { %1487 = vmatpush1.bf16.msra.mxu1 %v8410_v11  ;;  %1754 = vmatpush1.bf16.msra.mxu0 %v8604_v23 }
 0x244   :  { %1488 = vmatprep.subr.bf16.mxu1 %v11209_v25  ;;  %1755 = vmatprep.subr.bf16.mxu0 %v11209_v25  ;;  %v869_v51 = vpop.f32.mrf.mxu1 }
 0x245   :  { %6341 = vmatprep.mubr.msk.bf16.mxu1 %vm791_vm4, %v8849_v42  ;;  %6368 = vmatprep.mubr.msk.bf16.mxu0 %vm791_vm4, %v8976_v19  ;;  %v9110_v42 = vld [vmem:[%s11194_s3 + $0x11c] ss:$8 sps:$4 sm:$0xff]  }
 0x246   :  { %v870_v26 = vpop.f32.mrf.mxu1 }
 0x247   :  { %1489 = vmatpush1.bf16.msra.mxu1 %v8414_v15  ;;  %1756 = vmatpush1.bf16.msra.mxu0 %v8616_v35 }
 0x248   :  { %1490 = vmatprep.subr.bf16.mxu1 %v11209_v25  ;;  %1757 = vmatprep.subr.bf16.mxu0 %v11209_v25 }
 0x24a   :  { %1332 = vmatmul.mubr.bf16.gmra.mxu1 %v8861_v45  ;;  %1599 = vmatmul.mubr.bf16.gmra.mxu0 %v8988_v60 }
 0x24b   :  { %1491 = vmatpush1.bf16.msra.mxu1 %v8354_v58  ;;  %1758 = vmatpush1.bf16.msra.mxu0 %v8503_v52 }
 0x24c   :  { %1492 = vmatprep.subr.bf16.mxu1 %v11209_v25  ;;  %1759 = vmatprep.subr.bf16.mxu0 %v11209_v25 }
 0x24d   :  { %6361 = vmatprep.mubr.msk.bf16.mxu1 %vm791_vm4, %v8870_v31  ;;  %6388 = vmatprep.mubr.msk.bf16.mxu0 %vm791_vm4, %v8997_v61 }
 0x24f   :  { %1493 = vmatpush1.bf16.msra.mxu1 %v8347_v48  ;;  %1760 = vmatpush1.bf16.msra.mxu0 %v8472_v29 }
 0x250   :  { %1500 = vmatprep.subr.bf16.mxu1 %v11209_v25  ;;  %1767 = vmatprep.subr.bf16.mxu0 %v11209_v25 }
 0x253   :  { %1501 = vmatpush2.bf16.msra.mxu1 %v8443_v55  ;;  %1768 = vmatpush2.bf16.msra.mxu0 %v8642_v2 }
 0x254   :  { %1502 = vmatprep.subr.bf16.mxu1 %v11209_v25  ;;  %1769 = vmatprep.subr.bf16.mxu0 %v11209_v25 }
 0x257   :  { %1503 = vmatpush2.bf16.msra.mxu1 %v8456_v7  ;;  %1770 = vmatpush2.bf16.msra.mxu0 %v8651_v24 }
 0x258   :  { %1504 = vmatprep.subr.bf16.mxu1 %v11209_v25  ;;  %1771 = vmatprep.subr.bf16.mxu0 %v11209_v25 }
 0x25b   :  { %1505 = vmatpush2.bf16.msra.mxu1 %v8465_v18  ;;  %1772 = vmatpush2.bf16.msra.mxu0 %v8658_v30 }
 0x25c   :  { %1506 = vmatprep.subr.bf16.mxu1 %v11209_v25  ;;  %1773 = vmatprep.subr.bf16.mxu0 %v11209_v25 }
 0x25f   :  { %1507 = vmatpush2.bf16.msra.mxu1 %v8476_v32  ;;  %1774 = vmatpush2.bf16.msra.mxu0 %v8665_v37 }
 0x260   :  { %1508 = vmatprep.subr.bf16.mxu1 %v11209_v25  ;;  %1775 = vmatprep.subr.bf16.mxu0 %v11209_v25 }
 0x263   :  { %1509 = vmatpush2.bf16.msra.mxu1 %v8484_v43  ;;  %1776 = vmatpush2.bf16.msra.mxu0 %v8674_v38 }
 0x264   :  { %1681 = vmatprep.subr.bf16.mxu1 %v11209_v25  ;;  %1954 = vmatprep.subr.bf16.mxu0 %v11209_v25 }
 0x266   :  { %1511 = vmatmul.mubr.bf16.vlgmr.msra.gmra.mxu1 %v8909_v54  ;;  %1778 = vmatmul.mubr.bf16.vlgmr.msra.gmra.mxu0 %v9032_v34 }
 0x267   :  { %1682 = vmatpush1.bf16.msra.mxu1 %v8377_v39  ;;  %1955 = vmatpush1.bf16.msra.mxu0 %v8574_v44 }
 0x268   :  { %1683 = vmatprep.subr.bf16.mxu1 %v11209_v25  ;;  %1956 = vmatprep.subr.bf16.mxu0 %v11209_v25 }
 0x269   :  { %6362 = vmatprep.mubr.msk.bf16.mxu1 %vm791_vm4, %v8920_v9  ;;  %6389 = vmatprep.mubr.msk.bf16.mxu0 %vm791_vm4, %v9041_v59 }
 0x26b   :  { %1684 = vmatpush1.bf16.msra.mxu1 %v8387_v49  ;;  %1957 = vmatpush1.bf16.msra.mxu0 %v8583_v0 }
 0x26c   :  { %1685 = vmatprep.subr.bf16.mxu1 %v11209_v25  ;;  %1958 = vmatprep.subr.bf16.mxu0 %v11209_v25 }
 0x26e   :  { %1519 = vmatmul.mubr.bf16.gmra.mxu1 %v8937_v21  ;;  %1786 = vmatmul.mubr.bf16.gmra.mxu0 %v9056_v22 }
 0x26f   :  { %1686 = vmatpush1.bf16.msra.mxu1 %v8397_v62  ;;  %1959 = vmatpush1.bf16.msra.mxu0 %v8590_v13 }
 0x270   :  { %1687 = vmatprep.subr.bf16.mxu1 %v11209_v25  ;;  %1960 = vmatprep.subr.bf16.mxu0 %v11209_v25 }
 0x271   :  { %6390 = vmatprep.mubr.msk.bf16.mxu0 %vm791_vm4, %v9065_v50  ;;  %6363 = vmatprep.mubr.msk.bf16.mxu1 %vm791_vm4, %v8948_v36 }
 0x273   :  { %1688 = vmatpush1.bf16.msra.mxu1 %v8405_v5  ;;  %1961 = vmatpush1.bf16.msra.mxu0 %v8597_v17 }
 0x274   :  { %1689 = vmatprep.subr.bf16.mxu1 %v11209_v25  ;;  %1962 = vmatprep.subr.bf16.mxu0 %v11209_v25 }
 0x276   :  { %1794 = vmatmul.mubr.bf16.gmra.mxu0 %v9080_v12  ;;  %1527 = vmatmul.mubr.bf16.gmra.mxu1 %v8965_v27 }
 0x277   :  { %1690 = vmatpush1.bf16.msra.mxu1 %v8410_v11  ;;  %1963 = vmatpush1.bf16.msra.mxu0 %v8604_v23 }
 0x278   :  { %1691 = vmatprep.subr.bf16.mxu1 %v11209_v25  ;;  %1964 = vmatprep.subr.bf16.mxu0 %v11209_v25 }
 0x279   :  { %6391 = vmatprep.mubr.msk.bf16.mxu0 %vm791_vm4, %v9089_v56  ;;  %6364 = vmatprep.mubr.msk.bf16.mxu1 %vm791_vm4, %v8976_v19 }
 0x27b   :  { %1692 = vmatpush1.bf16.msra.mxu1 %v8414_v15  ;;  %1965 = vmatpush1.bf16.msra.mxu0 %v8616_v35 }
 0x27c   :  { %1693 = vmatprep.subr.bf16.mxu1 %v11209_v25  ;;  %1966 = vmatprep.subr.bf16.mxu0 %v11209_v25 }
 0x27e   :  { %1802 = vmatmul.mubr.bf16.gmra.mxu0 %v9101_v3  ;;  %1535 = vmatmul.mubr.bf16.gmra.mxu1 %v8988_v60 }
 0x27f   :  { %1694 = vmatpush1.bf16.msra.mxu1 %v8354_v58  ;;  %1967 = vmatpush1.bf16.msra.mxu0 %v8503_v52 }
 0x280   :  { %1695 = vmatprep.subr.bf16.mxu1 %v11209_v25  ;;  %1968 = vmatprep.subr.bf16.mxu0 %v11209_v25 }
 0x281   :  { %6411 = vmatprep.mubr.msk.bf16.mxu0 %vm791_vm4, %v9110_v42  ;;  %6384 = vmatprep.mubr.msk.bf16.mxu1 %vm791_vm4, %v8997_v61 }
 0x283   :  { %1696 = vmatpush1.bf16.msra.mxu1 %v8347_v48  ;;  %1969 = vmatpush1.bf16.msra.mxu0 %v8472_v29 }
 0x284   :  { %1703 = vmatprep.subr.bf16.mxu1 %v11209_v25  ;;  %1976 = vmatprep.subr.bf16.mxu0 %v11209_v25 }
 0x287   :  { %1704 = vmatpush2.bf16.msra.mxu1 %v8443_v55  ;;  %1977 = vmatpush2.bf16.msra.mxu0 %v8642_v2 }
 0x288   :  { %1705 = vmatprep.subr.bf16.mxu1 %v11209_v25  ;;  %1978 = vmatprep.subr.bf16.mxu0 %v11209_v25 }
 0x28a   :  { %v9130_v45 = vpop.f32.mrf.mxu1  ;;  %v9132_v31 = vpop.f32.mrf.mxu0 }
 0x28b   :  { %11227 = vst [vmem:[#allocation16_spill] sm:$0xff] %v9130_v45  ;;  %1706 = vmatpush2.bf16.msra.mxu1 %v8456_v7  ;;  %1979 = vmatpush2.bf16.msra.mxu0 %v8651_v24  ;;  %v11208_v10 = vrot.slane %v9132_v31, 7  ;;  %v11205_v21 = vrot.slane %v9130_v45, 7 }
 0x28c   :  { %1707 = vmatprep.subr.bf16.mxu1 %v11209_v25  ;;  %1980 = vmatprep.subr.bf16.mxu0 %v11209_v25  ;;  %v962_v63 = vpop.f32.mrf.mxu1  ;;  %v1172_v54 = vpop.f32.mrf.mxu0 }
 0x28d   :  { %v9167_v54 = vld [vmem:[%s11194_s3 + $0x118] ss:$8 sps:$4 sm:$0xff]  }
 0x28e   :  { %v963_v9 = vpop.f32.mrf.mxu1  ;;  %v1173_v40 = vpop.f32.mrf.mxu0 }
 0x28f   :  { %1708 = vmatpush2.bf16.msra.mxu1 %v8465_v18  ;;  %1981 = vmatpush2.bf16.msra.mxu0 %v8658_v30  ;;  %v999_v16 = vrot.slane %v963_v9, 7  ;;  %v1208_v36 = vrot.slane %v1173_v40, 7 }
 0x290   :  { %1709 = vmatprep.subr.bf16.mxu1 %v11209_v25  ;;  %1982 = vmatprep.subr.bf16.mxu0 %v11209_v25  ;;  %v965_v57 = vpop.f32.mrf.mxu1  ;;  %v1175_v27 = vpop.f32.mrf.mxu0 }
 0x291   :  { %v9147_v53 = vsel %vm997_vm7, %v11205_v21, %v999_v16  ;;  %v9152_v6 = vsel %vm997_vm7, %v11208_v10, %v1208_v36 }
 0x292   :  { %11228 = vst [vmem:[#allocation17_spill] sm:$0xff] %v9147_v53  ;;  %v968_v19 = vpop.f32.mrf.mxu1  ;;  %v1178_v46 = vpop.f32.mrf.mxu0 }
 0x293   :  { %1710 = vmatpush2.bf16.msra.mxu1 %v8476_v32  ;;  %1983 = vmatpush2.bf16.msra.mxu0 %v8665_v37  ;;  %v1001_v51 = vrot.slane %v968_v19, 7  ;;  %v1210_v60 = vrot.slane %v1178_v46, 7  ;;  %v9176_v19 = vld [vmem:[%s11194_s3 + $0x12c] ss:$8 sps:$4 sm:$0xff]  }
 0x294   :  { %1711 = vmatprep.subr.bf16.mxu1 %v11209_v25  ;;  %1984 = vmatprep.subr.bf16.mxu0 %v11209_v25  ;;  %v970_v26 = vpop.f32.mrf.mxu1  ;;  %v1180_v61 = vpop.f32.mrf.mxu0 }
 0x295   :  { %v9159_v47 = vsel %vm997_vm7, %v999_v16, %v1001_v51  ;;  %v9162_v63 = vsel %vm997_vm7, %v1208_v36, %v1210_v60 }
 0x296   :  { %11229 = vst [vmem:[#allocation18_spill] sm:$0xff] %v9159_v47  ;;  %v971_v9 = vpop.f32.mrf.mxu1  ;;  %v1181_v40 = vpop.f32.mrf.mxu0 }
 0x297   :  { %1712 = vmatpush2.bf16.msra.mxu1 %v8484_v43  ;;  %1985 = vmatpush2.bf16.msra.mxu0 %v8674_v38  ;;  %v1003_v57 = vrot.slane %v971_v9, 7  ;;  %v1212_v27 = vrot.slane %v1181_v40, 7  ;;  %v9214_v40 = vld [vmem:[%s11194_s3 + $0x13c] ss:$8 sps:$4 sm:$0xff]  }
 0x298   :  { %1890 = vmatprep.subr.bf16.mxu1 %v11209_v25  ;;  %2157 = vmatprep.subr.bf16.mxu0 %v11209_v25  ;;  %v973_v16 = vpop.f32.mrf.mxu1  ;;  %v1183_v36 = vpop.f32.mrf.mxu0 }
 0x299   :  { %v9179_v46 = vsel %vm997_vm7, %v1001_v51, %v1003_v57  ;;  %v9182_v26 = vsel %vm997_vm7, %v1210_v60, %v1212_v27 }
 0x29a   :  { %11230 = vst [vmem:[#allocation19_spill] sm:$0xff] %v9179_v46  ;;  %1987 = vmatmul.mubr.bf16.vlgmr.msra.gmra.mxu0 %v9167_v54  ;;  %1714 = vmatmul.mubr.bf16.vlgmr.msra.gmra.mxu1 %v9032_v34  ;;  %v976_v61 = vpop.f32.mrf.mxu1  ;;  %v1186_v9 = vpop.f32.mrf.mxu0 }
 0x29b   :  { %1891 = vmatpush1.bf16.msra.mxu1 %v8377_v39  ;;  %2158 = vmatpush1.bf16.msra.mxu0 %v8574_v44  ;;  %v1005_v16 = vrot.slane %v976_v61, 7  ;;  %v1214_v36 = vrot.slane %v1186_v9, 7  ;;  %v9205_v61 = vld [vmem:[%s11194_s3 + $0x128] ss:$8 sps:$4 sm:$0xff]  }
 0x29c   :  { %1892 = vmatprep.subr.bf16.mxu1 %v11209_v25  ;;  %2159 = vmatprep.subr.bf16.mxu0 %v11209_v25  ;;  %v978_v51 = vpop.f32.mrf.mxu1  ;;  %v1188_v60 = vpop.f32.mrf.mxu0 }
 0x29d   :  { %6412 = vmatprep.mubr.msk.bf16.mxu0 %vm791_vm4, %v9176_v19  ;;  %v9195_v34 = vsel %vm997_vm7, %v1003_v57, %v1005_v16  ;;  %6385 = vmatprep.mubr.msk.bf16.mxu1 %vm791_vm4, %v9041_v59  ;;  %v9200_v21 = vsel %vm997_vm7, %v1212_v27, %v1214_v36 }
 0x29e   :  { %11231 = vst [vmem:[#allocation20_spill] sm:$0xff] %v9195_v34  ;;  %v979_v9 = vpop.f32.mrf.mxu1  ;;  %v1189_v51 = vpop.f32.mrf.mxu0 }
 0x29f   :  { %1893 = vmatpush1.bf16.msra.mxu1 %v8387_v49  ;;  %2160 = vmatpush1.bf16.msra.mxu0 %v8583_v0  ;;  %v1007_v60 = vrot.slane %v979_v9, 7  ;;  %v1216_v57 = vrot.slane %v1189_v51, 7 }
 0x2a0   :  { %1894 = vmatprep.subr.bf16.mxu1 %v11209_v25  ;;  %2161 = vmatprep.subr.bf16.mxu0 %v11209_v25  ;;  %v981_v59 = vpop.f32.mrf.mxu1  ;;  %v1191_v27 = vpop.f32.mrf.mxu0 }
 0x2a1   :  { %v9217_v1 = vsel %vm997_vm7, %v1005_v16, %v1007_v60  ;;  %v9220_v10 = vsel %vm997_vm7, %v1214_v36, %v1216_v57  ;;  %v11233_v16 = vmov 0  }
 0x2a2   :  { %11232 = vst [vmem:[#allocation21_spill] sm:$0xff] %v9217_v1  ;;  %1995 = vmatmul.mubr.bf16.gmra.mxu0 %v9205_v61  ;;  %v984_v9 = vpop.f32.mrf.mxu1  ;;  %1722 = vmatmul.mubr.bf16.gmra.mxu1 %v9056_v22  ;;  %v1194_v51 = vpop.f32.mrf.mxu0 }
 0x2a3   :  { %1895 = vmatpush1.bf16.msra.mxu1 %v8397_v62  ;;  %2162 = vmatpush1.bf16.msra.mxu0 %v8590_v13  ;;  %v1009_v27 = vrot.slane %v984_v9, 7  ;;  %v1218_v25 = vrot.slane %v1194_v51, 7  ;;  %v9243_v9 = vld [vmem:[%s11194_s3 + $0x138] ss:$8 sps:$4 sm:$0xff]  }
 0x2a4   :  { %1896 = vmatprep.subr.bf16.mxu1 %v11233_v16  ;;  %2163 = vmatprep.subr.bf16.mxu0 %v11233_v16  ;;  %v986_v36 = vpop.f32.mrf.mxu1  ;;  %v1196_v20 = vpop.f32.mrf.mxu0 }
 0x2a5   :  { %6413 = vmatprep.mubr.msk.bf16.mxu0 %vm791_vm4, %v9214_v40  ;;  %v9233_v22 = vsel %vm997_vm7, %v1007_v60, %v1009_v27  ;;  %6386 = vmatprep.mubr.msk.bf16.mxu1 %vm791_vm4, %v9065_v50  ;;  %v9238_v59 = vsel %vm997_vm7, %v1216_v57, %v1218_v25  ;;  %v6398_v20 = vld [vmem:[%s11194_s3 + $0x148] sm:$0x11] }
 0x2a6   :  { %11234 = vst [vmem:[#allocation22_spill] sm:$0xff] %v9233_v22  ;;  %v987_v51 = vpop.f32.mrf.mxu1  ;;  %v1197_v36 = vpop.f32.mrf.mxu0  ;;  %v9252_v60 = vcombine.high %v6398_v20, %v6398_v20  ;;  %v9264_v57 = vcombine.low %v6398_v20, %v6398_v20 }
 0x2a7   :  { %1897 = vmatpush1.bf16.msra.mxu1 %v8405_v5  ;;  %2164 = vmatpush1.bf16.msra.mxu0 %v8597_v17 }
 0x2a8   :  { %1898 = vmatprep.subr.bf16.mxu1 %v11233_v16  ;;  %2165 = vmatprep.subr.bf16.mxu0 %v11233_v16  ;;  %v988_v25 = vpop.f32.mrf.mxu1  ;;  %v1198_v50 = vpop.f32.mrf.mxu0 }
 0x2aa   :  { %2003 = vmatmul.mubr.bf16.gmra.mxu0 %v9243_v9  ;;  %1730 = vmatmul.mubr.bf16.gmra.mxu1 %v9080_v12  ;;  %v9273_v12 = vld [vmem:[%s11194_s3 + $0x154] ss:$8 sps:$4 sm:$0xff]  }
 0x2ab   :  { %1899 = vmatpush1.bf16.msra.mxu1 %v8410_v11  ;;  %2166 = vmatpush1.bf16.msra.mxu0 %v8604_v23 }
 0x2ac   :  { %1900 = vmatprep.subr.bf16.mxu1 %v11233_v16  ;;  %2167 = vmatprep.subr.bf16.mxu0 %v11233_v16 }
 0x2ad   :  { %6414 = vmatprep.mubr.msk.bf16.mxu0 %vm791_vm4, %v9252_v60  ;;  %6387 = vmatprep.mubr.msk.bf16.mxu1 %vm791_vm4, %v9089_v56 }
 0x2af   :  { %1901 = vmatpush1.bf16.msra.mxu1 %v8414_v15  ;;  %2168 = vmatpush1.bf16.msra.mxu0 %v8616_v35 }
 0x2b0   :  { %1902 = vmatprep.subr.bf16.mxu1 %v11233_v16  ;;  %2169 = vmatprep.subr.bf16.mxu0 %v11233_v16 }
 0x2b2   :  { %2011 = vmatmul.mubr.bf16.gmra.mxu0 %v9264_v57  ;;  %1738 = vmatmul.mubr.bf16.gmra.mxu1 %v9101_v3 }
 0x2b3   :  { %1903 = vmatpush1.bf16.msra.mxu1 %v8354_v58  ;;  %2170 = vmatpush1.bf16.msra.mxu0 %v8503_v52 }
 0x2b4   :  { %1904 = vmatprep.subr.bf16.mxu1 %v11233_v16  ;;  %2171 = vmatprep.subr.bf16.mxu0 %v11233_v16 }
 0x2b5   :  { %6407 = vmatprep.mubr.msk.bf16.mxu1 %vm791_vm4, %v9110_v42  ;;  %6434 = vmatprep.mubr.msk.bf16.mxu0 %vm791_vm4, %v9273_v12 }
 0x2b7   :  { %1905 = vmatpush1.bf16.msra.mxu1 %v8347_v48  ;;  %2172 = vmatpush1.bf16.msra.mxu0 %v8472_v29 }
 0x2b8   :  { %1912 = vmatprep.subr.bf16.mxu1 %v11233_v16  ;;  %2179 = vmatprep.subr.bf16.mxu0 %v11233_v16 }
 0x2bb   :  { %1913 = vmatpush2.bf16.msra.mxu1 %v8443_v55  ;;  %2180 = vmatpush2.bf16.msra.mxu0 %v8642_v2 }
 0x2bc   :  { %1914 = vmatprep.subr.bf16.mxu1 %v11233_v16  ;;  %2181 = vmatprep.subr.bf16.mxu0 %v11233_v16 }
 0x2be   :  { %v1106_v56 = vpop.f32.mrf.mxu1  ;;  %v9293_v3 = vpop.f32.mrf.mxu0 }
 0x2bf   :  { %1915 = vmatpush2.bf16.msra.mxu1 %v8456_v7  ;;  %2182 = vmatpush2.bf16.msra.mxu0 %v8651_v24  ;;  %v11211_v20 = vrot.slane %v9293_v3, 7 }
 0x2c0   :  { %v1108_v42 = vpop.f32.mrf.mxu1  ;;  %1916 = vmatprep.subr.bf16.mxu1 %v11233_v16  ;;  %2183 = vmatprep.subr.bf16.mxu0 %v11233_v16  ;;  %v1375_v27 = vpop.f32.mrf.mxu0 }
 0x2c2   :  { %v1109_v51 = vpop.f32.mrf.mxu1  ;;  %v1376_v36 = vpop.f32.mrf.mxu0 }
 0x2c3   :  { %v7380_v25 = vpack.i.bf16 %v1109_v51, %v1106_v56  ;;  %1917 = vmatpush2.bf16.msra.mxu1 %v8465_v18  ;;  %2184 = vmatpush2.bf16.msra.mxu0 %v8658_v30  ;;  %v1411_v50 = vrot.slane %v1376_v36, 7 }
 0x2c4   :  { %v1111_v22 = vpop.f32.mrf.mxu1  ;;  %1918 = vmatprep.subr.bf16.mxu1 %v11233_v16  ;;  %2185 = vmatprep.subr.bf16.mxu0 %v11233_v16  ;;  %v1378_v42 = vpop.f32.mrf.mxu0 }
 0x2c5   :  { %7381 = vrot.lane.b32.xlu0 %v7380_v25, %s8091_s16  ;;  %v9308_v27 = vsel %vm997_vm7, %v11211_v20, %v1411_v50  ;;  %v9320_v20 = vld [vmem:[%s11194_s3 + $0x150] ss:$8 sps:$4 sm:$0xff]  }
 0x2c6   :  { %v1114_v56 = vpop.f32.mrf.mxu1  ;;  %v1381_v51 = vpop.f32.mrf.mxu0 }
 0x2c7   :  { %1919 = vmatpush2.bf16.msra.mxu1 %v8476_v32  ;;  %2186 = vmatpush2.bf16.msra.mxu0 %v8665_v37  ;;  %v1413_v22 = vrot.slane %v1381_v51, 7 }
 0x2c8   :  { %v1116_v36 = vpop.f32.mrf.mxu1  ;;  %1920 = vmatprep.subr.bf16.mxu1 %v11233_v16  ;;  %2187 = vmatprep.subr.bf16.mxu0 %v11233_v16  ;;  %v1383_v42 = vpop.f32.mrf.mxu0 }
 0x2c9   :  { %v9315_v25 = vsel %vm997_vm7, %v1411_v50, %v1413_v22  ;;  %v9330_v42 = vld [vmem:[%s11194_s3 + $0x164] ss:$8 sps:$4 sm:$0xff]  }
 0x2ca   :  { %v1117_v28 = vpop.f32.mrf.mxu1  ;;  %v1384_v14 = vpop.f32.mrf.mxu0 }
 0x2cb   :  { %v7385_v33 = vpack.i.bf16 %v1117_v28, %v1114_v56  ;;  %1921 = vmatpush2.bf16.msra.mxu1 %v8484_v43  ;;  %2188 = vmatpush2.bf16.msra.mxu0 %v8674_v38  ;;  %v1415_v51 = vrot.slane %v1384_v14, 7 }
 0x2cc   :  { %v1119_v36 = vpop.f32.mrf.mxu1  ;;  %2093 = vmatprep.subr.bf16.mxu1 %v11233_v16  ;;  %2360 = vmatprep.subr.bf16.mxu0 %v11233_v16  ;;  %v1386_v50 = vpop.f32.mrf.mxu0 }
 0x2cd   :  { %7386 = vrot.lane.b32.xlu1 %v7385_v33, %s8091_s16  ;;  %v9333_v28 = vsel %vm997_vm7, %v1413_v22, %v1415_v51 }
 0x2ce   :  { %v1122_v56 = vpop.f32.mrf.mxu1  ;;  %1923 = vmatmul.mubr.bf16.vlgmr.msra.gmra.mxu1 %v9167_v54  ;;  %2190 = vmatmul.mubr.bf16.vlgmr.msra.gmra.mxu0 %v9320_v20  ;;  %v1389_v14 = vpop.f32.mrf.mxu0 }
 0x2cf   :  { %2094 = vmatpush1.bf16.msra.mxu1 %v8377_v39  ;;  %2361 = vmatpush1.bf16.msra.mxu0 %v8574_v44  ;;  %v1417_v33 = vrot.slane %v1389_v14, 7  ;;  %v9353_v14 = vld [vmem:[%s11194_s3 + $0x160] ss:$8 sps:$4 sm:$0xff]  }
 0x2d0   :  { %v1124_v50 = vpop.f32.mrf.mxu1  ;;  %2095 = vmatprep.subr.bf16.mxu1 %v11233_v16  ;;  %2362 = vmatprep.subr.bf16.mxu0 %v11233_v16  ;;  %v1391_v22 = vpop.f32.mrf.mxu0 }
 0x2d1   :  { %6408 = vmatprep.mubr.msk.bf16.mxu1 %vm791_vm4, %v9176_v19  ;;  %6435 = vmatprep.mubr.msk.bf16.mxu0 %vm791_vm4, %v9330_v42  ;;  %v9348_v54 = vsel %vm997_vm7, %v1415_v51, %v1417_v33 }
 0x2d2   :  { %11235 = vst [vmem:[#allocation23_spill] sm:$0xff] %v9348_v54  ;;  %v1125_v36 = vpop.f32.mrf.mxu1  ;;  %v1392_v50 = vpop.f32.mrf.mxu0 }
 0x2d3   :  { %v7390_v8 = vpack.i.bf16 %v1125_v36, %v1122_v56  ;;  %2096 = vmatpush1.bf16.msra.mxu1 %v8387_v49  ;;  %2363 = vmatpush1.bf16.msra.mxu0 %v8583_v0  ;;  %v1419_v22 = vrot.slane %v1392_v50, 7 }
 0x2d4   :  { %2097 = vmatprep.subr.bf16.mxu1 %v11233_v16  ;;  %2364 = vmatprep.subr.bf16.mxu0 %v11233_v16  ;;  %v1127_v19 = vpop.f32.mrf.mxu1  ;;  %v1394_v51 = vpop.f32.mrf.mxu0 }
 0x2d5   :  { %7391 = vrot.lane.b32.xlu1 %v7390_v8, %s8091_s16  ;;  %v9366_v56 = vsel %vm997_vm7, %v1417_v33, %v1419_v22  ;;  %v11237_v8 = vrot.slane %v9132_v31, 7 }
 0x2d6   :  { %11236 = vst [vmem:[#allocation24_spill] sm:$0xff] %v9366_v56  ;;  %1931 = vmatmul.mubr.bf16.gmra.mxu1 %v9205_v61  ;;  %2198 = vmatmul.mubr.bf16.gmra.mxu0 %v9353_v14  ;;  %v1130_v36 = vpop.f32.mrf.mxu1  ;;  %v1397_v50 = vpop.f32.mrf.mxu0 }
 0x2d7   :  { %2098 = vmatpush1.bf16.msra.mxu1 %v8397_v62  ;;  %2365 = vmatpush1.bf16.msra.mxu0 %v8590_v13  ;;  %v9377_v51 = vsel %vm997_vm7, %v1130_v36, %v11237_v8  ;;  %v1421_v33 = vrot.slane %v1397_v50, 7  ;;  %v9393_v36 = vld [vmem:[%s11194_s3 + $0x170] ss:$8 sps:$4 sm:$0xff]   ;;  %v6421_v50 = vld [vmem:[%s11194_s3 + $0x180] sm:$0x11] }
 0x2d8   :  { %2099 = vmatprep.subr.bf16.mxu1 %v11233_v16  ;;  %2366 = vmatprep.subr.bf16.mxu0 %v11233_v16  ;;  %v1132_v34 = vpop.f32.mrf.mxu1  ;;  %v1399_v1 = vpop.f32.mrf.mxu0  ;;  %v9402_v8 = vcombine.high %v6421_v50, %v6421_v50 }
 0x2d9   :  { %6409 = vmatprep.mubr.msk.bf16.mxu1 %vm791_vm4, %v9214_v40  ;;  %6436 = vmatprep.mubr.msk.bf16.mxu0 %vm791_vm4, %v9363_v4  ;;  %v9388_v31 = vsel %vm997_vm7, %v1419_v22, %v1421_v33  ;;  %v9414_v33 = vcombine.low %v6421_v50, %v6421_v50 }
 0x2da   :  { %v1133_v34 = vpop.f32.mrf.mxu1  ;;  %v1400_v1 = vpop.f32.mrf.mxu0 }
 0x2db   :  { %2100 = vmatpush1.bf16.msra.mxu1 %v8405_v5  ;;  %2367 = vmatpush1.bf16.msra.mxu0 %v8597_v17 }
 0x2dc   :  { %2101 = vmatprep.subr.bf16.mxu1 %v11233_v16  ;;  %2368 = vmatprep.subr.bf16.mxu0 %v11233_v16  ;;  %v1134_v40 = vpop.f32.mrf.mxu1  ;;  %v1401_v22 = vpop.f32.mrf.mxu0 }
 0x2de   :  { %1939 = vmatmul.mubr.bf16.gmra.mxu1 %v9243_v9  ;;  %2206 = vmatmul.mubr.bf16.gmra.mxu0 %v9393_v36  ;;  %v9423_v9 = vld [vmem:[%s11194_s3 + $0x18c] ss:$8 sps:$4 sm:$0xff]  }
 0x2df   :  { %2102 = vmatpush1.bf16.msra.mxu1 %v8410_v11  ;;  %2369 = vmatpush1.bf16.msra.mxu0 %v8604_v23 }
 0x2e0   :  { %2103 = vmatprep.subr.bf16.mxu1 %v11233_v16  ;;  %2370 = vmatprep.subr.bf16.mxu0 %v11233_v16 }
 0x2e1   :  { %6410 = vmatprep.mubr.msk.bf16.mxu1 %vm791_vm4, %v9252_v60  ;;  %6437 = vmatprep.mubr.msk.bf16.mxu0 %vm791_vm4, %v9402_v8 }
 0x2e3   :  { %2104 = vmatpush1.bf16.msra.mxu1 %v8414_v15  ;;  %2371 = vmatpush1.bf16.msra.mxu0 %v8616_v35 }
 0x2e4   :  { %2105 = vmatprep.subr.bf16.mxu1 %v11233_v16  ;;  %2372 = vmatprep.subr.bf16.mxu0 %v11233_v16 }
 0x2e6   :  { %1947 = vmatmul.mubr.bf16.gmra.mxu1 %v9264_v57  ;;  %2214 = vmatmul.mubr.bf16.gmra.mxu0 %v9414_v33 }
 0x2e7   :  { %2106 = vmatpush1.bf16.msra.mxu1 %v8354_v58  ;;  %2373 = vmatpush1.bf16.msra.mxu0 %v8503_v52 }
 0x2e8   :  { %2107 = vmatprep.subr.bf16.mxu1 %v11233_v16  ;;  %2374 = vmatprep.subr.bf16.mxu0 %v11233_v16 }
 0x2e9   :  { %6430 = vmatprep.mubr.msk.bf16.mxu1 %vm791_vm4, %v9273_v12  ;;  %6457 = vmatprep.mubr.msk.bf16.mxu0 %vm791_vm4, %v9423_v9 }
 0x2eb   :  { %2108 = vmatpush1.bf16.msra.mxu1 %v8347_v48  ;;  %2375 = vmatpush1.bf16.msra.mxu0 %v8472_v29 }
 0x2ec   :  { %2115 = vmatprep.subr.bf16.mxu1 %v11233_v16  ;;  %2382 = vmatprep.subr.bf16.mxu0 %v11233_v16 }
 0x2ef   :  { %2116 = vmatpush2.bf16.msra.mxu1 %v8443_v55  ;;  %2383 = vmatpush2.bf16.msra.mxu0 %v8642_v2 }
 0x2f0   :  { %2117 = vmatprep.subr.bf16.mxu1 %v11233_v16  ;;  %2384 = vmatprep.subr.bf16.mxu0 %v11233_v16 }
 0x2f2   :  { %v1309_v60 = vpop.f32.mrf.mxu1  ;;  %v9443_v57 = vpop.f32.mrf.mxu0 }
 0x2f3   :  { %2118 = vmatpush2.bf16.msra.mxu1 %v8456_v7  ;;  %2385 = vmatpush2.bf16.msra.mxu0 %v8651_v24  ;;  %v11212_v34 = vrot.slane %v9443_v57, 7 }
 0x2f4   :  { %v1311_v12 = vpop.f32.mrf.mxu1  ;;  %2119 = vmatprep.subr.bf16.mxu1 %v11233_v16  ;;  %2386 = vmatprep.subr.bf16.mxu0 %v11233_v16  ;;  %v1578_v50 = vpop.f32.mrf.mxu0 }
 0x2f6   :  { %v1312_v1 = vpop.f32.mrf.mxu1  ;;  %v1579_v40 = vpop.f32.mrf.mxu0 }
 0x2f7   :  { %v7395_v22 = vpack.i.bf16 %v1312_v1, %v1309_v60  ;;  %2120 = vmatpush2.bf16.msra.mxu1 %v8465_v18  ;;  %2387 = vmatpush2.bf16.msra.mxu0 %v8658_v30  ;;  %v1614_v19 = vrot.slane %v1579_v40, 7 }
 0x2f8   :  { %v1314_v61 = vpop.f32.mrf.mxu1  ;;  %2121 = vmatprep.subr.bf16.mxu1 %v11233_v16  ;;  %2388 = vmatprep.subr.bf16.mxu0 %v11233_v16  ;;  %v1581_v12 = vpop.f32.mrf.mxu0 }
 0x2f9   :  { %7396 = vrot.lane.b32.xlu1 %v7395_v22, %s8084_s30  ;;  %v9458_v50 = vsel %vm997_vm7, %v11212_v34, %v1614_v19  ;;  %v9470_v34 = vld [vmem:[%s11194_s3 + $0x188] ss:$8 sps:$4 sm:$0xff]  }
 0x2fa   :  { %v1317_v47 = vpop.f32.mrf.mxu1  ;;  %v1584_v60 = vpop.f32.mrf.mxu0 }
 0x2fb   :  { %2122 = vmatpush2.bf16.msra.mxu1 %v8476_v32  ;;  %2389 = vmatpush2.bf16.msra.mxu0 %v8665_v37  ;;  %v1616_v1 = vrot.slane %v1584_v60, 7 }
 0x2fc   :  { %v1319_v61 = vpop.f32.mrf.mxu1  ;;  %2123 = vmatprep.subr.bf16.mxu1 %v11233_v16  ;;  %2390 = vmatprep.subr.bf16.mxu0 %v11233_v16  ;;  %v1586_v40 = vpop.f32.mrf.mxu0 }
 0x2fd   :  { %v9465_v22 = vsel %vm997_vm7, %v1614_v19, %v1616_v1  ;;  %v9480_v40 = vld [vmem:[%s11194_s3 + $0x19c] ss:$8 sps:$4 sm:$0xff]  }
 0x2fe   :  { %v1320_v12 = vpop.f32.mrf.mxu1  ;;  %v1587_v46 = vpop.f32.mrf.mxu0 }
 0x2ff   :  { %v7400_v53 = vpack.i.bf16 %v1320_v12, %v1317_v47  ;;  %2124 = vmatpush2.bf16.msra.mxu1 %v8484_v43  ;;  %2391 = vmatpush2.bf16.msra.mxu0 %v8674_v38  ;;  %v1618_v60 = vrot.slane %v1587_v46, 7 }
 0x300   :  { %2296 = vmatprep.subr.bf16.mxu1 %v11233_v16  ;;  %2563 = vmatprep.subr.bf16.mxu0 %v11233_v16  ;;  %v1322_v61 = vpop.f32.mrf.mxu1  ;;  %v1589_v19 = vpop.f32.mrf.mxu0 }
 0x301   :  { %7401 = vrot.lane.b32.xlu1 %v7400_v53, %s8084_s30  ;;  %v9483_v47 = vsel %vm997_vm7, %v1616_v1, %v1618_v60 }
 0x302   :  { %2126 = vmatmul.mubr.bf16.vlgmr.msra.gmra.mxu1 %v9320_v20  ;;  %2393 = vmatmul.mubr.bf16.vlgmr.msra.gmra.mxu0 %v9470_v34  ;;  %v9487_v46 = vpop.f32.mrf.mxu1  ;;  %v1592_v12 = vpop.f32.mrf.mxu0 }
 0x303   :  { %2297 = vmatpush1.bf16.msra.mxu1 %v8377_v39  ;;  %2564 = vmatpush1.bf16.msra.mxu0 %v8574_v44  ;;  %v1620_v53 = vrot.slane %v1592_v12, 7  ;;  %v9505_v44 = vld [vmem:[%s11194_s3 + $0x198] ss:$8 sps:$4 sm:$0xff]  }
 0x304   :  { %2298 = vmatprep.subr.bf16.mxu1 %v11233_v16  ;;  %2565 = vmatprep.subr.bf16.mxu0 %v11233_v16  ;;  %v1327_v1 = vpop.f32.mrf.mxu1  ;;  %v1594_v19 = vpop.f32.mrf.mxu0 }
 0x305   :  { %6431 = vmatprep.mubr.msk.bf16.mxu1 %vm791_vm4, %v9330_v42  ;;  %6458 = vmatprep.mubr.msk.bf16.mxu0 %vm791_vm4, %v9480_v40  ;;  %v9500_v20 = vsel %vm997_vm7, %v1618_v60, %v1620_v53 }
 0x306   :  { %v9507_v12 = vpop.f32.mrf.mxu1  ;;  %v1595_v61 = vpop.f32.mrf.mxu0 }
 0x307   :  { %2299 = vmatpush1.bf16.msra.mxu1 %v8387_v49  ;;  %2566 = vmatpush1.bf16.msra.mxu0 %v8583_v0  ;;  %v1622_v1 = vrot.slane %v1595_v61, 7 }
 0x308   :  { %2300 = vmatprep.subr.bf16.mxu1 %v11233_v16  ;;  %2567 = vmatprep.subr.bf16.mxu0 %v11233_v16  ;;  %v1330_v60 = vpop.f32.mrf.mxu1  ;;  %v1597_v19 = vpop.f32.mrf.mxu0 }
 0x309   :  { %v9521_v45 = vsel %vm997_vm7, %v1620_v53, %v1622_v1  ;;  %v11238_v60 = vrot.slane %v9293_v3, 7  ;;  %v9548_v3 = vld [vmem:[%s11194_s3 + $0x1a8] ss:$8 sps:$4 sm:$0xff]  }
 0x30a   :  { %2134 = vmatmul.mubr.bf16.gmra.mxu1 %v9353_v14  ;;  %2401 = vmatmul.mubr.bf16.gmra.mxu0 %v9505_v44  ;;  %v1333_v0 = vpop.f32.mrf.mxu1  ;;  %v1600_v61 = vpop.f32.mrf.mxu0 }
 0x30b   :  { %2301 = vmatpush1.bf16.msra.mxu1 %v8397_v62  ;;  %2568 = vmatpush1.bf16.msra.mxu0 %v8590_v13  ;;  %v9532_v19 = vsel %vm997_vm7, %v1333_v0, %v11238_v60  ;;  %v1624_v53 = vrot.slane %v1600_v61, 7 }
 0x30c   :  { %2302 = vmatprep.subr.bf16.mxu1 %v11233_v16  ;;  %2569 = vmatprep.subr.bf16.mxu0 %v11233_v16  ;;  %v1335_v14 = vpop.f32.mrf.mxu1  ;;  %v1602_v54 = vpop.f32.mrf.mxu0 }
 0x30d   :  { %6432 = vmatprep.mubr.msk.bf16.mxu1 %vm791_vm4, %v9363_v4  ;;  %6459 = vmatprep.mubr.msk.bf16.mxu0 %vm791_vm4, %v9518_v41  ;;  %v9543_v13 = vsel %vm997_vm7, %v1622_v1, %v1624_v53  ;;  %v6444_v54 = vld [vmem:[%s11194_s3 + $0x1b8] sm:$0x11] }
 0x30e   :  { %v1336_v0 = vpop.f32.mrf.mxu1  ;;  %v1603_v61 = vpop.f32.mrf.mxu0  ;;  %v9557_v60 = vcombine.high %v6444_v54, %v6444_v54 }
 0x30f   :  { %2303 = vmatpush1.bf16.msra.mxu1 %v8405_v5  ;;  %2570 = vmatpush1.bf16.msra.mxu0 %v8597_v17  ;;  %v9569_v17 = vcombine.low %v6444_v54, %v6444_v54 }
 0x310   :  { %2304 = vmatprep.subr.bf16.mxu1 %v11233_v16  ;;  %2571 = vmatprep.subr.bf16.mxu0 %v11233_v16  ;;  %v1337_v4 = vpop.f32.mrf.mxu1  ;;  %v1604_v1 = vpop.f32.mrf.mxu0 }
 0x312   :  { %2142 = vmatmul.mubr.bf16.gmra.mxu1 %v9393_v36  ;;  %2409 = vmatmul.mubr.bf16.gmra.mxu0 %v9548_v3 }
 0x313   :  { %2305 = vmatpush1.bf16.msra.mxu1 %v8410_v11  ;;  %2572 = vmatpush1.bf16.msra.mxu0 %v8604_v23  ;;  %v9588_v23 = vld [vmem:[%s11194_s3 + $0x1c4] ss:$8 sps:$4 sm:$0xff]  }
 0x314   :  { %2306 = vmatprep.subr.bf16.mxu1 %v11233_v16  ;;  %2573 = vmatprep.subr.bf16.mxu0 %v11233_v16 }
 0x315   :  { %6460 = vmatprep.mubr.msk.bf16.mxu0 %vm791_vm4, %v9557_v60  ;;  %6433 = vmatprep.mubr.msk.bf16.mxu1 %vm791_vm4, %v9402_v8 }
 0x317   :  { %2307 = vmatpush1.bf16.msra.mxu1 %v8414_v15  ;;  %2574 = vmatpush1.bf16.msra.mxu0 %v8616_v35 }
 0x318   :  { %2308 = vmatprep.subr.bf16.mxu1 %v11233_v16  ;;  %2575 = vmatprep.subr.bf16.mxu0 %v11233_v16 }
 0x31a   :  { %2417 = vmatmul.mubr.bf16.gmra.mxu0 %v9569_v17  ;;  %2150 = vmatmul.mubr.bf16.gmra.mxu1 %v9414_v33 }
 0x31b   :  { %2309 = vmatpush1.bf16.msra.mxu1 %v8354_v58  ;;  %2576 = vmatpush1.bf16.msra.mxu0 %v8503_v52 }
 0x31c   :  { %2310 = vmatprep.subr.bf16.mxu1 %v11233_v16  ;;  %2577 = vmatprep.subr.bf16.mxu0 %v11233_v16 }
 0x31d   :  { %6453 = vmatprep.mubr.msk.bf16.mxu1 %vm791_vm4, %v9423_v9  ;;  %6480 = vmatprep.mubr.msk.bf16.mxu0 %vm791_vm4, %v9588_v23 }
 0x31f   :  { %2311 = vmatpush1.bf16.msra.mxu1 %v8347_v48  ;;  %2578 = vmatpush1.bf16.msra.mxu0 %v8472_v29 }
 0x320   :  { %2318 = vmatprep.subr.bf16.mxu1 %v11233_v16  ;;  %2585 = vmatprep.subr.bf16.mxu0 %v11233_v16 }
 0x323   :  { %2319 = vmatpush2.bf16.msra.mxu1 %v8443_v55  ;;  %2586 = vmatpush2.bf16.msra.mxu0 %v8642_v2 }
 0x324   :  { %2320 = vmatprep.subr.bf16.mxu1 %v11233_v16  ;;  %2587 = vmatprep.subr.bf16.mxu0 %v11233_v16 }
 0x326   :  { %v1512_v29 = vpop.f32.mrf.mxu1  ;;  %v9598_v52 = vpop.f32.mrf.mxu0 }
 0x327   :  { %2321 = vmatpush2.bf16.msra.mxu1 %v8456_v7  ;;  %2588 = vmatpush2.bf16.msra.mxu0 %v8651_v24  ;;  %v1816_v8 = vrot.slane %v9598_v52, 7 }
 0x328   :  { %v1514_v35 = vpop.f32.mrf.mxu1  ;;  %2322 = vmatprep.subr.bf16.mxu1 %v11233_v16  ;;  %2589 = vmatprep.subr.bf16.mxu0 %v11233_v16  ;;  %v1781_v36 = vpop.f32.mrf.mxu0 }
 0x32a   :  { %v1515_v2 = vpop.f32.mrf.mxu1  ;;  %v1782_v33 = vpop.f32.mrf.mxu0 }
 0x32b   :  { %v7405_v9 = vpack.i.bf16 %v1515_v2, %v1512_v29  ;;  %2323 = vmatpush2.bf16.msra.mxu1 %v8465_v18  ;;  %2590 = vmatpush2.bf16.msra.mxu0 %v8658_v30  ;;  %v1817_v53 = vrot.slane %v1782_v33, 7 }
 0x32c   :  { %v1517_v14 = vpop.f32.mrf.mxu1  ;;  %2324 = vmatprep.subr.bf16.mxu1 %v11233_v16  ;;  %2591 = vmatprep.subr.bf16.mxu0 %v11233_v16  ;;  %v1784_v24 = vpop.f32.mrf.mxu0 }
 0x32d   :  { %7406 = vrot.lane.b32.xlu1 %v7405_v9, %s8092_s6  ;;  %v9613_v54 = vsel %vm997_vm7, %v1816_v8, %v1817_v53  ;;  %v9628_v14 = vld [vmem:[%s11194_s3 + $0x1c0] ss:$8 sps:$4 sm:$0xff]   ;;  %v11239_v24 = vmov 0.0  }
 0x32e   :  { %v1520_v0 = vpop.f32.mrf.mxu1  ;;  %v1787_v61 = vpop.f32.mrf.mxu0 }
 0x32f   :  { %2325 = vmatpush2.bf16.msra.mxu1 %v8476_v32  ;;  %2592 = vmatpush2.bf16.msra.mxu0 %v8665_v37  ;;  %v1819_v30 = vrot.slane %v1787_v61, 7  ;;  %v9641_v61 = vld [vmem:[%s11194_s3 + $0x1d4] ss:$8 sps:$4 sm:$0xff]  }
 0x330   :  { %v1522_v4 = vpop.f32.mrf.mxu1  ;;  %2326 = vmatprep.subr.bf16.mxu1 %v11233_v16  ;;  %2593 = vmatprep.subr.bf16.mxu0 %v11233_v16  ;;  %v1789_v1 = vpop.f32.mrf.mxu0 }
 0x331   :  { %v9620_v29 = vsel %vm997_vm7, %v1817_v53, %v1819_v30 }
 0x332   :  { %v1523_v35 = vpop.f32.mrf.mxu1  ;;  %v1790_v36 = vpop.f32.mrf.mxu0 }
 0x333   :  { %v7410_v2 = vpack.i.bf16 %v1523_v35, %v1520_v0  ;;  %2327 = vmatpush2.bf16.msra.mxu1 %v8484_v43  ;;  %2594 = vmatpush2.bf16.msra.mxu0 %v8674_v38  ;;  %v1821_v33 = vrot.slane %v1790_v36, 7 }
 0x334   :  { %2499 = vmatprep.subr.bf16.mxu1 %v11233_v16  ;;  %v1792_v37 = vpop.f32.mrf.mxu0  ;;  %v1525_v9 = vpop.f32.mrf.mxu1  ;;  %7110 = vmatprep.subr.bf16.mxu0 %v11239_v24 }
 0x335   :  { %7411 = vrot.lane.b32.xlu1 %v7410_v2, %s8092_s6  ;;  %v9633_v53 = vsel %vm997_vm7, %v1819_v30, %v1821_v33  ;;  %v9662_v9 = vld [vmem:[%s11194_s3 + $0x1d0] ss:$8 sps:$4 sm:$0xff]  }
 0x336   :  { %2329 = vmatmul.mubr.bf16.vlgmr.msra.gmra.mxu1 %v9470_v34  ;;  %v1795_v38 = vpop.f32.mrf.mxu0  ;;  %v9636_v0 = vpop.f32.mrf.mxu1  ;;  %2596 = vmatmul.mubr.bf16.vlgmr.msra.gmra.mxu0 %v9628_v14 }
 0x337   :  { %2500 = vmatpush1.bf16.msra.mxu1 %v8377_v39  ;;  %6454 = vmatprep.mubr.msk.bf16.mxu1 %vm791_vm4, %v9480_v40  ;;  %v1823_v4 = vrot.slane %v1795_v38, 7 }
 0x338   :  { %2501 = vmatprep.subr.bf16.mxu1 %v11233_v16  ;;  %v1797_v30 = vpop.f32.mrf.mxu0  ;;  %v1530_v34 = vpop.f32.mrf.mxu1  ;;  %6481 = vmatprep.mubr.msk.bf16.mxu0 %vm791_vm4, %v9641_v61 }
 0x339   :  { %v9651_v1 = vsel %vm997_vm7, %v1821_v33, %v1823_v4  ;;  %v9671_v30 = vld [vmem:[%s11194_s3 + $0x1e4] ss:$8 sps:$4 sm:$0xff]  }
 0x33a   :  { %11240 = vst [vmem:[#allocation25_spill] sm:$0xff] %v9651_v1  ;;  %v1798_v35 = vpop.f32.mrf.mxu0  ;;  %v9653_v36 = vpop.f32.mrf.mxu1 }
 0x33b   :  { %2502 = vmatpush1.bf16.msra.mxu1 %v8387_v49  ;;  %v1825_v39 = vrot.slane %v1798_v35, 7 }
 0x33c   :  { %2503 = vmatprep.subr.bf16.mxu1 %v11233_v16  ;;  %v1800_v2 = vpop.f32.mrf.mxu0  ;;  %v1533_v37 = vpop.f32.mrf.mxu1 }
 0x33d   :  { %v9665_v33 = vsel %vm997_vm7, %v1823_v4, %v1825_v39  ;;  %v11241_v4 = vrot.slane %v9443_v57, 7  ;;  %v6467_v57 = vld [vmem:[%s11194_s3 + $0x1f0] sm:$0x11] }
 0x33e   :  { %2337 = vmatmul.mubr.bf16.gmra.mxu1 %v9505_v44  ;;  %v1803_v38 = vpop.f32.mrf.mxu0  ;;  %v1536_v49 = vpop.f32.mrf.mxu1  ;;  %2604 = vmatmul.mubr.bf16.gmra.mxu0 %v9662_v9 }
 0x33f   :  { %2504 = vmatpush1.bf16.msra.mxu1 %v8397_v62  ;;  %6455 = vmatprep.mubr.msk.bf16.mxu1 %vm791_vm4, %v9518_v41  ;;  %v1827_v34 = vrot.slane %v1803_v38, 7  ;;  %v9680_v35 = vsel %vm997_vm7, %v1536_v49, %v11241_v4 }
 0x340   :  { %2505 = vmatprep.subr.bf16.mxu1 %v11233_v16  ;;  %v1805_v44 = vpop.f32.mrf.mxu0  ;;  %v1538_v37 = vpop.f32.mrf.mxu1  ;;  %6482 = vmatprep.mubr.msk.bf16.mxu0 %vm791_vm4, %v9671_v30 }
 0x341   :  { %v9688_v62 = vsel %vm997_vm7, %v1825_v39, %v1827_v34  ;;  %v9698_v44 = vld [vmem:[%s11194_s3 + $0x1e0] ss:$8 sps:$4 sm:$0xff]   ;;  %v9701_v39 = vcombine.high %v6467_v57, %v6467_v57 }
 0x342   :  { %11242 = vst [vmem:[#allocation26_spill] sm:$0xff] %v9688_v62  ;;  %v1806_v41 = vpop.f32.mrf.mxu0  ;;  %v1539_v38 = vpop.f32.mrf.mxu1 }
 0x343   :  { %2506 = vmatpush1.bf16.msra.mxu1 %v8405_v5  ;;  %v9712_v5 = vcombine.low %v6467_v57, %v6467_v57 }
 0x344   :  { %2507 = vmatprep.subr.bf16.mxu1 %v11233_v16  ;;  %v1807_v49 = vpop.f32.mrf.mxu0  ;;  %v1540_v4 = vpop.f32.mrf.mxu1 }
 0x346   :  { %2345 = vmatmul.mubr.bf16.gmra.mxu1 %v9548_v3  ;;  %2612 = vmatmul.mubr.bf16.gmra.mxu0 %v9698_v44 }
 0x347   :  { %2508 = vmatpush1.bf16.msra.mxu1 %v8410_v11  ;;  %6456 = vmatprep.mubr.msk.bf16.mxu1 %vm791_vm4, %v9557_v60 }
 0x348   :  { %2509 = vmatprep.subr.bf16.mxu1 %v11233_v16  ;;  %6483 = vmatprep.mubr.msk.bf16.mxu0 %vm791_vm4, %v9701_v39 }
 0x34b   :  { %2510 = vmatpush1.bf16.msra.mxu1 %v8414_v15 }
 0x34c   :  { %2511 = vmatprep.subr.bf16.mxu1 %v11233_v16 }
 0x34e   :  { %2353 = vmatmul.mubr.bf16.gmra.mxu1 %v9569_v17  ;;  %2620 = vmatmul.mubr.bf16.gmra.mxu0 %v9712_v5 }
 0x34f   :  { %2512 = vmatpush1.bf16.msra.mxu1 %v8354_v58  ;;  %6476 = vmatprep.mubr.msk.bf16.mxu1 %vm791_vm4, %v9588_v23 }
 0x350   :  { %2513 = vmatprep.subr.bf16.mxu1 %v11233_v16  ;;  %7114 = vmatprep.mubr.msk.bf16.mxu0 %vm8088_vm1, %v11239_v24 }
 0x353   :  { %2514 = vmatpush1.bf16.msra.mxu1 %v8347_v48 }
 0x354   :  { %2521 = vmatprep.subr.bf16.mxu1 %v11233_v16 }
 0x357   :  { %2522 = vmatpush2.bf16.msra.mxu1 %v8443_v55 }
 0x358   :  { %2523 = vmatprep.subr.bf16.mxu1 %v11233_v16 }
 0x35a   :  { %v9726_v11 = vpop.f32.mrf.mxu0  ;;  %v9728_v15 = vpop.f32.mrf.mxu1 }
 0x35b   :  { %2524 = vmatpush2.bf16.msra.mxu1 %v8456_v7  ;;  %v11217_v60 = vrot.slane %v9726_v11, 7 }
 0x35c   :  { %v1990_v58 = vpop.f32.mrf.mxu0  ;;  %2525 = vmatprep.subr.bf16.mxu1 %v11233_v16  ;;  %v1717_v3 = vpop.f32.mrf.mxu1 }
 0x35e   :  { %v1991_v17 = vpop.f32.mrf.mxu0  ;;  %v9733_v48 = vpop.f32.mrf.mxu1 }
 0x35f   :  { %v2026_v23 = vrot.slane %v1991_v17, 7  ;;  %2526 = vmatpush2.bf16.msra.mxu1 %v8465_v18 }
 0x360   :  { %v1993_v55 = vpop.f32.mrf.mxu0  ;;  %2527 = vmatprep.subr.bf16.mxu1 %v11233_v16  ;;  %v1720_v34 = vpop.f32.mrf.mxu1 }
 0x361   :  { %v9740_v7 = vsel %vm997_vm7, %v11217_v60, %v2026_v23 }
 0x362   :  { %v1996_v37 = vpop.f32.mrf.mxu0  ;;  %v9742_v41 = vpop.f32.mrf.mxu1 }
 0x363   :  { %v2028_v38 = vrot.slane %v1996_v37, 7  ;;  %2528 = vmatpush2.bf16.msra.mxu1 %v8476_v32 }
 0x364   :  { %v1998_v57 = vpop.f32.mrf.mxu0  ;;  %2529 = vmatprep.subr.bf16.mxu1 %v11233_v16  ;;  %v1725_v49 = vpop.f32.mrf.mxu1 }
 0x365   :  { %v9747_v18 = vsel %vm997_vm7, %v2026_v23, %v2028_v38 }
 0x366   :  { %v1999_v4 = vpop.f32.mrf.mxu0  ;;  %v9749_v58 = vpop.f32.mrf.mxu1 }
 0x367   :  { %v2030_v3 = vrot.slane %v1999_v4, 7  ;;  %2530 = vmatpush2.bf16.msra.mxu1 %v8484_v43 }
 0x368   :  { %v2001_v17 = vpop.f32.mrf.mxu0  ;;  %v1728_v55 = vpop.f32.mrf.mxu1 }
 0x369   :  { %v9753_v34 = vsel %vm997_vm7, %v2028_v38, %v2030_v3 }
 0x36a   :  { %v2004_v37 = vpop.f32.mrf.mxu0  ;;  %v9755_v32 = vpop.f32.mrf.mxu1  ;;  %2532 = vmatmul.mubr.bf16.vlgmr.msra.gmra.mxu1 %v9628_v14 }
 0x36b   :  { %v2032_v57 = vrot.slane %v2004_v37, 7  ;;  %6477 = vmatprep.mubr.msk.bf16.mxu1 %vm791_vm4, %v9641_v61 }
 0x36c   :  { %v2006_v49 = vpop.f32.mrf.mxu0  ;;  %v1733_v4 = vpop.f32.mrf.mxu1 }
 0x36d   :  { %v9763_v43 = vsel %vm997_vm7, %v2030_v3, %v2032_v57 }
 0x36e   :  { %v2007_v17 = vpop.f32.mrf.mxu0  ;;  %v9765_v38 = vpop.f32.mrf.mxu1 }
 0x36f   :  { %v2034_v55 = vrot.slane %v2007_v17, 7 }
 0x370   :  { %v2009_v42 = vpop.f32.mrf.mxu0  ;;  %v1736_v2 = vpop.f32.mrf.mxu1 }
 0x371   :  { %v9768_v14 = vsel %vm997_vm7, %v2032_v57, %v2034_v55 }
 0x372   :  { %v2012_v56 = vpop.f32.mrf.mxu0  ;;  %v1739_v23 = vpop.f32.mrf.mxu1  ;;  %2540 = vmatmul.mubr.bf16.gmra.mxu1 %v9662_v9 }
 0x373   :  { %v2036_v37 = vrot.slane %v2012_v56, 7  ;;  %v9776_v3 = vsel %vm997_vm7, %v1739_v23, %v1816_v8  ;;  %6478 = vmatprep.mubr.msk.bf16.mxu1 %vm791_vm4, %v9671_v30 }
 0x374   :  { %v1741_v42 = vpop.f32.mrf.mxu1  ;;  %v2014_v2 = vpop.f32.mrf.mxu0 }
 0x375   :  { %v9781_v57 = vsel %vm997_vm7, %v2034_v55, %v2036_v37 }
 0x376   :  { %v1742_v49 = vpop.f32.mrf.mxu1  ;;  %v2015_v4 = vpop.f32.mrf.mxu0 }
 0x378   :  { %v1743_v17 = vpop.f32.mrf.mxu1  ;;  %v2016_v56 = vpop.f32.mrf.mxu0 }
 0x37a   :  { %2548 = vmatmul.mubr.bf16.gmra.mxu1 %v9698_v44 }
 0x37b   :  { %6479 = vmatprep.mubr.msk.bf16.mxu1 %vm791_vm4, %v9701_v39 }
 0x382   :  { %2556 = vmatmul.mubr.bf16.gmra.mxu1 %v9712_v5 }
 0x38e   :  { %v1924_v52 = vpop.f32.mrf.mxu1  ;;  %v9789_v8 = vpop.f32.mrf.mxu0 }
 0x38f   :  { %v11216_v55 = vrot.slane %v9789_v8, 7 }
 0x390   :  { %v1926_v30 = vpop.f32.mrf.mxu1  ;;  %v2193_v23 = vpop.f32.mrf.mxu0 }
 0x392   :  { %v1927_v37 = vpop.f32.mrf.mxu1  ;;  %v2194_v42 = vpop.f32.mrf.mxu0 }
 0x393   :  { %v7415_v2 = vpack.i.bf16 %v1927_v37, %v1924_v52  ;;  %v2229_v49 = vrot.slane %v2194_v42, 7 }
 0x394   :  { %v1929_v4 = vpop.f32.mrf.mxu1  ;;  %v2196_v17 = vpop.f32.mrf.mxu0 }
 0x395   :  { %7416 = vrot.lane.b32.xlu0 %v7415_v2, %s8091_s16  ;;  %v9796_v44 = vsel %vm997_vm7, %v11216_v55, %v2229_v49 }
 0x396   :  { %v1932_v39 = vpop.f32.mrf.mxu1  ;;  %v2199_v5 = vpop.f32.mrf.mxu0 }
 0x397   :  { %v2231_v56 = vrot.slane %v2199_v5, 7 }
 0x398   :  { %v1934_v30 = vpop.f32.mrf.mxu1  ;;  %v2201_v23 = vpop.f32.mrf.mxu0 }
 0x399   :  { %v9799_v9 = vsel %vm997_vm7, %v2229_v49, %v2231_v56 }
 0x39a   :  { %v1935_v61 = vpop.f32.mrf.mxu1  ;;  %v2202_v52 = vpop.f32.mrf.mxu0 }
 0x39b   :  { %v7420_v37 = vpack.i.bf16 %v1935_v61, %v1932_v39  ;;  %v2233_v42 = vrot.slane %v2202_v52, 7 }
 0x39c   :  { %v1937_v4 = vpop.f32.mrf.mxu1  ;;  %v2204_v17 = vpop.f32.mrf.mxu0 }
 0x39d   :  { %7421 = vrot.lane.b32.xlu0 %v7420_v37, %s8091_s16  ;;  %v9803_v2 = vsel %vm997_vm7, %v2231_v56, %v2233_v42 }
 0x39e   :  { %v1940_v55 = vpop.f32.mrf.mxu1  ;;  %v2207_v40 = vpop.f32.mrf.mxu0 }
 0x39f   :  { %v2235_v30 = vrot.slane %v2207_v40, 7 }
 0x3a0   :  { %v1942_v23 = vpop.f32.mrf.mxu1  ;;  %v2209_v49 = vpop.f32.mrf.mxu0 }
 0x3a1   :  { %v9808_v60 = vsel %vm997_vm7, %v2233_v42, %v2235_v30  ;;  %v11243_v23 = vrot.slane %v9726_v11, 7 }
 0x3a2   :  { %v1943_v61 = vpop.f32.mrf.mxu1  ;;  %v2210_v39 = vpop.f32.mrf.mxu0 }
 0x3a3   :  { %v7425_v52 = vpack.i.bf16 %v1943_v61, %v1940_v55  ;;  %v2237_v4 = vrot.slane %v2210_v39, 7 }
 0x3a4   :  { %v1945_v17 = vpop.f32.mrf.mxu1  ;;  %v2212_v37 = vpop.f32.mrf.mxu0 }
 0x3a5   :  { %7426 = vrot.lane.b32.xlu0 %v7425_v52, %s8091_s16  ;;  %v9812_v56 = vsel %vm997_vm7, %v2235_v30, %v2237_v4 }
 0x3a6   :  { %v1948_v16 = vpop.f32.mrf.mxu1  ;;  %v2215_v62 = vpop.f32.mrf.mxu0 }
 0x3a7   :  { %v2039_v42 = vsel %vm997_vm7, %v1948_v16, %v11243_v23  ;;  %v2239_v49 = vrot.slane %v2215_v62, 7 }
 0x3a8   :  { %v7445_v55 = vpack.i.bf16 %v9740_v7, %v2039_v42  ;;  %v1950_v61 = vpop.f32.mrf.mxu1  ;;  %v2217_v39 = vpop.f32.mrf.mxu0 }
 0x3a9   :  { %v9821_v17 = vsel %vm997_vm7, %v2237_v4, %v2239_v49 }
 0x3aa   :  { %7446 = vrot.lane.b32.xlu0 %v7445_v55, %s8091_s16  ;;  %v1951_v30 = vpop.f32.mrf.mxu1  ;;  %v2218_v52 = vpop.f32.mrf.mxu0  ;;  %v7565_v37 = vpack.i.bf16 %v9388_v31, %v9821_v17 }
 0x3ac   :  { %v1952_v40 = vpop.f32.mrf.mxu1  ;;  %v2219_v5 = vpop.f32.mrf.mxu0 }
 0x3c2   :  { %v2127_v11 = vpop.f32.mrf.mxu1  ;;  %v9826_v1 = vpop.f32.mrf.mxu0 }
 0x3c3   :  { %v11219_v7 = vrot.slane %v9826_v1, 7 }
 0x3c4   :  { %v2129_v16 = vpop.f32.mrf.mxu1  ;;  %v2396_v62 = vpop.f32.mrf.mxu0 }
 0x3c5   :  { %v11244_v62 = vpack.i.bf16 %v9507_v12, %v9487_v46 }
 0x3c6   :  { %v2130_v23 = vpop.f32.mrf.mxu1  ;;  %v2397_v42 = vpop.f32.mrf.mxu0 }
 0x3c7   :  { %v7430_v4 = vpack.i.bf16 %v2130_v23, %v2127_v11  ;;  %v2432_v49 = vrot.slane %v2397_v42, 7 }
 0x3c8   :  { %v2132_v61 = vpop.f32.mrf.mxu1  ;;  %v2399_v55 = vpop.f32.mrf.mxu0 }
 0x3c9   :  { %7431 = vrot.lane.b32.xlu1 %v7430_v4, %s8084_s30  ;;  %v9833_v40 = vsel %vm997_vm7, %v11219_v7, %v2432_v49 }
 0x3ca   :  { %v2135_v5 = vpop.f32.mrf.mxu1  ;;  %v2402_v39 = vpop.f32.mrf.mxu0 }
 0x3cb   :  { %v2434_v30 = vrot.slane %v2402_v39, 7  ;;  %v11245_v39 = vpack.i.bf16 %v9653_v36, %v9636_v0  ;;  %v11246_v0 = vpack.i.bf16 %v9152_v6, %v9377_v51  ;;  %v7742_v6 = vld [vmem:[%s11195_s4 + $0x70] sm:$0xff]   ;;  %v11247_v51 = vpack.i.bf16 %v9308_v27, %v9532_v19 }
 0x3cc   :  { %v2137_v52 = vpop.f32.mrf.mxu1  ;;  %v2404_v16 = vpop.f32.mrf.mxu0 }
 0x3cd   :  { %7436 = vrot.lane.b32.xlu1 %v11244_v62, %s8084_s30  ;;  %v9840_v11 = vsel %vm997_vm7, %v2432_v49, %v2434_v30 }
 0x3ce   :  { %v2138_v23 = vpop.f32.mrf.mxu1  ;;  %v2405_v42 = vpop.f32.mrf.mxu0 }
 0x3cf   :  { %v7455_v4 = vpack.i.bf16 %v2138_v23, %v2135_v5  ;;  %v2436_v61 = vrot.slane %v2405_v42, 7 }
 0x3d0   :  { %v2140_v55 = vpop.f32.mrf.mxu1  ;;  %v2407_v7 = vpop.f32.mrf.mxu0 }
 0x3d1   :  { %7441 = vrot.lane.b32.xlu1 %v11245_v39, %s8092_s6  ;;  %7456 = vrot.lane.b32.xlu0 %v7455_v4, %s8084_s30  ;;  %v9848_v52 = vsel %vm997_vm7, %v2434_v30, %v2436_v61  ;;  %v7740_v7 = vld [vmem:[%s11195_s4 + $0x78] sm:$0xff]  }
 0x3d2   :  { %v2143_v46 = vpop.f32.mrf.mxu1  ;;  %v2410_v12 = vpop.f32.mrf.mxu0  ;;  %v7520_v49 = vpack.i.bf16 %v9848_v52, %v9840_v11  ;;  %v7741_v30 = vld [vmem:[%s11195_s4 + $0x38] sm:$0xff]   ;;  %6767 = vmatprep.subr.bf16.mxu1 %v7740_v7  ;;  %v11263_v11 = vpack.i.bf16 %v9238_v59, %v9781_v57 }
 0x3d3   :  { %v2438_v16 = vrot.slane %v2410_v12, 7  ;;  %6768 = vmatpush3.bf16.msra.mxu1 %v7741_v30  ;;  %v11248_v30 = vrot.slane %v9789_v8, 7 }
 0x3d4   :  { %v2145_v5 = vpop.f32.mrf.mxu1  ;;  %v2412_v62 = vpop.f32.mrf.mxu0  ;;  %6769 = vmatprep.subr.bf16.mxu1 %v7742_v6 }
 0x3d5   :  { %7451 = vrot.lane.b32.xlu1 %v11246_v0, %s8091_s16  ;;  %v9860_v36 = vsel %vm997_vm7, %v2436_v61, %v2438_v16 }
 0x3d6   :  { %v2146_v23 = vpop.f32.mrf.mxu1  ;;  %v2413_v42 = vpop.f32.mrf.mxu0 }
 0x3d7   :  { %v7460_v4 = vpack.i.bf16 %v2146_v23, %v2143_v46  ;;  %v2440_v55 = vrot.slane %v2413_v42, 7  ;;  %v7743_v46 = vld [vmem:[%s11195_s4 + $0x30] sm:$0xff]   ;;  %v7744_v23 = vld [vmem:[%s11195_s4 + $0x68] sm:$0xff]  }
 0x3d8   :  { %v2415_v39 = vpop.f32.mrf.mxu0  ;;  %v2148_v12 = vpop.f32.mrf.mxu1  ;;  %6770 = vmatpush3.bf16.msra.mxu1 %v7743_v46  ;;  %v7756_v46 = vld [vmem:[%s11195_s4 + $0x88] sm:$0xff]  }
 0x3d9   :  { %7476 = vrot.lane.b32.xlu1 %v11247_v51, %s8084_s30  ;;  %7461 = vrot.lane.b32.xlu0 %v7460_v4, %s8084_s30  ;;  %v9874_v61 = vsel %vm997_vm7, %v2438_v16, %v2440_v55  ;;  %v11249_v4 = vpack.i.bf16 %v9458_v50, %v9680_v35  ;;  %v7745_v39 = vld [vmem:[%s11195_s4 + $0x28] sm:$0xff]   ;;  %v7746_v35 = vld [vmem:[%s11195_s4 + $0x60] sm:$0xff]  }
 0x3da   :  { %v2418_v5 = vpop.f32.mrf.mxu0  ;;  %v2151_v62 = vpop.f32.mrf.mxu1  ;;  %v7550_v7 = vpack.i.bf16 %v9874_v61, %v9860_v36  ;;  %6771 = vmatprep.subr.bf16.mxu1 %v7744_v23  ;;  %7111 = vmatpush3.bf16.msra.mxu0 %v7756_v46  ;;  %v11252_v23 = vpack.i.bf16 %v9483_v47, %v9465_v22  ;;  %v7754_v22 = vld [vmem:[%s11195_s4 + $0x40] sm:$0xff]  }
 0x3db   :  { %v2442_v0 = vrot.slane %v2418_v5, 7  ;;  %v9884_v27 = vsel %vm997_vm7, %v2151_v62, %v11248_v30  ;;  %v11250_v5 = vpack.i.bf16 %v9182_v26, %v9162_v63  ;;  %v7747_v62 = vld [vmem:[%s11195_s4 + $0x20] sm:$0xff]   ;;  %7112 = vmatprep.subr.bf16.mxu0 %v11239_v24  ;;  %v7748_v30 = vld [vmem:[%s11195_s4 + $0x58] sm:$0xff]   ;;  %v11251_v63 = vpack.i.bf16 %v9333_v28, %v9315_v25  ;;  %v7751_v25 = vld [vmem:[%s11195_s4 + $0x10] sm:$0xff]  }
 0x3dc   :  { %v2153_v19 = vpop.f32.mrf.mxu1  ;;  %v7470_v16 = vpack.i.bf16 %v9796_v44, %v9884_v27  ;;  %v2420_v42 = vpop.f32.mrf.mxu0  ;;  %6772 = vmatpush3.bf16.msra.mxu1 %v7745_v39  ;;  %v7749_v26 = vld [vmem:[%s11195_s4 + $0x18] sm:$0xff]   ;;  %v7752_v28 = vld [vmem:[%s11195_s4 + $0x48] sm:$0xff]   ;;  %v7755_v47 = vld [vmem:[%s11195_s4] sm:$0xff]  }
 0x3dd   :  { %7481 = vrot.lane.b32.xlu1 %v11249_v4, %s8092_s6  ;;  %v9896_v8 = vsel %vm997_vm7, %v2440_v55, %v2442_v0  ;;  %6773 = vmatprep.subr.bf16.mxu1 %v7746_v35  ;;  %v7757_v0 = vld [vmem:[%s11195_s4 + $0x80] sm:$0xff]   ;;  %v7750_v19 = vld [vmem:[%s11195_s4 + $0x50] sm:$0xff]   ;;  %v7753_v42 = vld [vmem:[%s11195_s4 + $0x8] sm:$0xff]   ;;  %v11253_v4 = vpack.i.bf16 %v9220_v10, %v9200_v21  ;;  %v11257_v10 = vpack.i.bf16 %v9521_v45, %v9500_v20 }
 0x3de   :  { %v2154_v12 = vpop.f32.mrf.mxu1  ;;  %v7570_v6 = vpack.i.bf16 %v9543_v13, %v9896_v8  ;;  %v2421_v51 = vpop.f32.mrf.mxu0  ;;  %7113 = vmatpush3.bf16.msra.mxu0 %v7757_v0  ;;  %v11254_v39 = vld [vmem:[#allocation24_spill] sm:$0xff] }
 0x3df   :  { %7178 = vmatprep.subr.bf16.mxu0 %v11239_v24  ;;  %v11255_v12 = vld [vmem:[#allocation23_spill] sm:$0xff] }
 0x3e0   :  { %v2155_v50 = vpop.f32.mrf.mxu1  ;;  %v2422_v55 = vpop.f32.mrf.mxu0  ;;  %6774 = vmatpush3.bf16.msra.mxu1 %v7747_v62  ;;  %v11256_v51 = vpack.i.bf16 %v11254_v39, %v11255_v12 }
 0x3e1   :  { %7496 = vrot.lane.b32.xlu1 %v11250_v5, %s8091_s16  ;;  %6775 = vmatprep.subr.bf16.mxu1 %v7748_v30 }
 0x3e4   :  { %6776 = vmatpush3.bf16.msra.mxu1 %v7749_v26 }
 0x3e5   :  { %7511 = vrot.lane.b32.xlu1 %v11251_v63, %s8084_s30  ;;  %6777 = vmatprep.subr.bf16.mxu1 %v7750_v19 }
 0x3e8   :  { %6778 = vmatpush3.bf16.msra.mxu1 %v7751_v25 }
 0x3e9   :  { %7526 = vrot.lane.b32.xlu1 %v11252_v23, %s8092_s6  ;;  %6779 = vmatprep.subr.bf16.mxu1 %v7752_v28 }
 0x3ec   :  { %6780 = vmatpush3.bf16.msra.mxu1 %v7753_v42 }
 0x3ed   :  { %7536 = vrot.lane.b32.xlu1 %v11253_v4, %s8091_s16  ;;  %6781 = vmatprep.subr.bf16.mxu1 %v7754_v22 }
 0x3f0   :  { %6782 = vmatpush3.bf16.msra.mxu1 %v7755_v47 }
 0x3f1   :  { %7546 = vrot.lane.b32.xlu1 %v11256_v51, %s8084_s30  ;;  %7142 = vmatprep.subr.bf16.mxu1 %v11239_v24 }
 0x3f5   :  { %7556 = vrot.lane.b32.xlu1 %v11257_v10, %s8092_s6  ;;  %v11258_v10 = vpack.i.bf16 %v9753_v34, %v9747_v18  ;;  %v11259_v34 = vrot.slane %v9826_v1, 7 }
 0x3f6   :  { %v2330_v21 = vpop.f32.mrf.mxu1  ;;  %v9966_v46 = vpop.f32.mrf.mxu0 }
 0x3f7   :  { %v2634_v0 = vrot.slane %v9966_v46, 7 }
 0x3f8   :  { %v2332_v50 = vpop.f32.mrf.mxu1  ;;  %v2599_v35 = vpop.f32.mrf.mxu0 }
 0x3f9   :  { %7566 = vrot.lane.b32.xlu1 %v7565_v37, %s8084_s30 }
 0x3fa   :  { %v2333_v55 = vpop.f32.mrf.mxu1  ;;  %v2600_v5 = vpop.f32.mrf.mxu0 }
 0x3fb   :  { %v7465_v62 = vpack.i.bf16 %v2333_v55, %v2330_v21  ;;  %v2635_v30 = vrot.slane %v2600_v5, 7 }
 0x3fc   :  { %v2335_v63 = vpop.f32.mrf.mxu1  ;;  %v2602_v26 = vpop.f32.mrf.mxu0 }
 0x3fd   :  { %7466 = vrot.lane.b32.xlu0 %v7465_v62, %s8092_s6  ;;  %v9977_v45 = vsel %vm997_vm7, %v2634_v0, %v2635_v30 }
 0x3fe   :  { %v2338_v20 = vpop.f32.mrf.mxu1  ;;  %v2605_v19 = vpop.f32.mrf.mxu0 }
 0x3ff   :  { %v2637_v28 = vrot.slane %v2605_v19, 7 }
 0x400   :  { %v2340_v23 = vpop.f32.mrf.mxu1  ;;  %v2607_v31 = vpop.f32.mrf.mxu0 }
 0x401   :  { %7471 = vrot.lane.b32.xlu0 %v7470_v16, %s8084_s30  ;;  %v9985_v47 = vsel %vm997_vm7, %v2635_v30, %v2637_v28 }
 0x402   :  { %v2341_v17 = vpop.f32.mrf.mxu1  ;;  %v2608_v37 = vpop.f32.mrf.mxu0 }
 0x403   :  { %v7485_v25 = vpack.i.bf16 %v2341_v17, %v2338_v20  ;;  %v2639_v42 = vrot.slane %v2608_v37, 7  ;;  %v11260_v17 = vpack.i.bf16 %v9803_v2, %v9799_v9  ;;  %v11261_v9 = vpack.i.bf16 %v9768_v14, %v9763_v43 }
 0x404   :  { %v2343_v4 = vpop.f32.mrf.mxu1  ;;  %v2610_v22 = vpop.f32.mrf.mxu0  ;;  %v11262_v2 = vpack.i.bf16 %v9812_v56, %v9808_v60 }
 0x405   :  { %7486 = vrot.lane.b32.xlu0 %v7485_v25, %s8092_s6  ;;  %v9988_v39 = vsel %vm997_vm7, %v2637_v28, %v2639_v42 }
 0x406   :  { %v2346_v12 = vpop.f32.mrf.mxu1  ;;  %v3026_v44 = vpack.c.bf16 %v9988_v39, %v9985_v47  ;;  %v2613_v27 = vpop.f32.mrf.mxu0 }
 0x407   :  { %v2641_v55 = vrot.slane %v2613_v27, 7 }
 0x408   :  { %v2348_v16 = vpop.f32.mrf.mxu1  ;;  %v2615_v51 = vpop.f32.mrf.mxu0 }
 0x409   :  { %7491 = vrot.lane.b32.xlu0 %v11258_v10, %s8091_s16  ;;  %v9998_v63 = vsel %vm997_vm7, %v2639_v42, %v2641_v55 }
 0x40a   :  { %v2349_v21 = vpop.f32.mrf.mxu1  ;;  %v2616_v50 = vpop.f32.mrf.mxu0 }
 0x40b   :  { %v7500_v35 = vpack.i.bf16 %v2349_v21, %v2346_v12  ;;  %v2643_v5 = vrot.slane %v2616_v50, 7 }
 0x40c   :  { %v2351_v62 = vpop.f32.mrf.mxu1  ;;  %v2618_v30 = vpop.f32.mrf.mxu0 }
 0x40d   :  { %7501 = vrot.lane.b32.xlu0 %v7500_v35, %s8092_s6  ;;  %v10001_v26 = vsel %vm997_vm7, %v2641_v55, %v2643_v5 }
 0x40e   :  { %v2354_v20 = vpop.f32.mrf.mxu1  ;;  %v3029_v18 = vpack.c.bf16 %v10001_v26, %v9998_v63  ;;  %v2621_v25 = vpop.f32.mrf.mxu0 }
 0x40f   :  { %v2445_v19 = vsel %vm997_vm7, %v2354_v20, %v11259_v34  ;;  %v2645_v28 = vrot.slane %v2621_v25, 7 }
 0x410   :  { %v7515_v23 = vpack.i.bf16 %v9833_v40, %v2445_v19  ;;  %v2356_v31 = vpop.f32.mrf.mxu1  ;;  %v2623_v4 = vpop.f32.mrf.mxu0 }
 0x411   :  { %7506 = vrot.lane.b32.xlu0 %v11260_v17, %s8084_s30  ;;  %v10015_v22 = vsel %vm997_vm7, %v2643_v5, %v2645_v28  ;;  %v10029_v40 = vpop.permute.xlu1 %7386  ;;  %v11264_v4 = vld [vmem:[#allocation16_spill] sm:$0xff] }
 0x412   :  { %v2357_v37 = vpop.f32.mrf.mxu1  ;;  %v2624_v1 = vpop.f32.mrf.mxu0  ;;  %v11265_v46 = vrot.slane %v11264_v4, 7  ;;  %v3032_v26 = vpack.c.bf16 %v10015_v22, %v10015_v22 }
 0x413   :  { %v11266_v1 = vld [vmem:[#allocation15_spill] sm:$0xff] }
 0x414   :  { %v2358_v42 = vpop.f32.mrf.mxu1  ;;  %v2625_v12 = vpop.f32.mrf.mxu0 }
 0x415   :  { %7516 = vrot.lane.b32.xlu0 %v7515_v23, %s8092_s6  ;;  %v10035_v27 = vpop.permute.xlu1 %7391  ;;  %v11267_v12 = vld [vmem:[#allocation17_spill] sm:$0xff] }
 0x419   :  { %7521 = vrot.lane.b32.xlu0 %v7520_v49, %s8092_s6  ;;  %v10041_v14 = vpop.permute.xlu1 %7396 }
 0x41d   :  { %7531 = vrot.lane.b32.xlu0 %v11261_v9, %s8091_s16  ;;  %v10047_v56 = vpop.permute.xlu1 %7401 }
 0x421   :  { %7541 = vrot.lane.b32.xlu0 %v11262_v2, %s8084_s30  ;;  %v10052_v59 = vpop.permute.xlu1 %7406 }
 0x425   :  { %7551 = vrot.lane.b32.xlu0 %v7550_v7, %s8092_s6  ;;  %v10054_v16 = vpop.permute.xlu1 %7411 }
 0x429   :  { %7561 = vrot.lane.b32.xlu0 %v11263_v11, %s8091_s16 }
 0x42a   :  { %v2533_v43 = vpop.f32.mrf.mxu1 }
 0x42c   :  { %v2535_v52 = vpop.f32.mrf.mxu1 }
 0x42d   :  { %7571 = vrot.lane.b32.xlu0 %v7570_v6, %s8092_s6  ;;  %v10082_v52 = vpop.permute.xlu0 %7381 }
 0x42e   :  { %v2536_v60 = vpop.f32.mrf.mxu1 }
 0x42f   :  { %v3014_v49 = vpack.c.bf16 %v2536_v60, %v2533_v43 }
 0x430   :  { %v2538_v36 = vpop.f32.mrf.mxu1 }
 0x431   :  { %7115 = vmatmul.mubr.msk.bf16.vlgmr.msra.gmra.mxu0 %vm2931_vm8, %v3014_v49 }
 0x432   :  { %v2541_v61 = vpop.f32.mrf.mxu1  ;;  %7118 = vmatprep.mubr.msk.bf16.mxu0 %vm8088_vm1, %v11239_v24 }
 0x434   :  { %v2543_v57 = vpop.f32.mrf.mxu1 }
 0x436   :  { %v2544_v7 = vpop.f32.mrf.mxu1 }
 0x437   :  { %v3017_v13 = vpack.c.bf16 %v2544_v7, %v2541_v61 }
 0x438   :  { %v2546_v8 = vpop.f32.mrf.mxu1 }
 0x439   :  { %7119 = vmatmul.mubr.msk.bf16.gmra.mxu0 %vm2931_vm8, %v3017_v13  ;;  %v7417_v13 = vpop.permute.xlu0 %7416 }
 0x43a   :  { %v2549_v6 = vpop.f32.mrf.mxu1  ;;  %7122 = vmatprep.mubr.msk.bf16.mxu0 %vm8088_vm1, %v11239_v24 }
 0x43b   :  { %v10059_v51 = vpop.permute.xlu1 %7431 }
 0x43c   :  { %v2551_v10 = vpop.f32.mrf.mxu1 }
 0x43d   :  { %v10100_v47 = vpop.permute.xlu0 %7421 }
 0x43e   :  { %v2552_v21 = vpop.f32.mrf.mxu1 }
 0x43f   :  { %v10061_v50 = vpop.permute.xlu1 %7436  ;;  %v3020_v35 = vpack.c.bf16 %v2552_v21, %v2549_v6 }
 0x440   :  { %v2554_v55 = vpop.f32.mrf.mxu1 }
 0x441   :  { %7123 = vmatmul.mubr.msk.bf16.gmra.mxu0 %vm2931_vm8, %v3020_v35  ;;  %v11268_v35 = vld [vmem:[#allocation19_spill] sm:$0xff] }
 0x442   :  { %v2557_v5 = vpop.f32.mrf.mxu1  ;;  %7126 = vmatprep.mubr.msk.bf16.mxu0 %vm8088_vm1, %v11239_v24 }
 0x443   :  { %v10066_v62 = vpop.permute.xlu1 %7441  ;;  %v2654_v30 = vsel %vm997_vm7, %v2557_v5, %v2634_v0  ;;  %v1018_v0 = vsel %vm997_vm7, %v11266_v1, %v11265_v46  ;;  %v11269_v5 = vld [vmem:[#allocation18_spill] sm:$0xff] }
 0x444   :  { %v2559_v20 = vpop.f32.mrf.mxu1  ;;  %v3023_v34 = vpack.c.bf16 %v9977_v45, %v2654_v30 }
 0x446   :  { %v2560_v19 = vpop.f32.mrf.mxu1 }
 0x447   :  { %v7452_v23 = vpop.permute.xlu1 %7451  ;;  %v10112_v19 = vpop.permute.xlu0 %7426 }
 0x448   :  { %v2561_v31 = vpop.f32.mrf.mxu1  ;;  %v7454_v37 = vunpack.i.h.bf16 %v7452_v23  ;;  %v7453_v25 = vunpack.i.l.bf16 %v7452_v23 }
 0x449   :  { %7127 = vmatmul.mubr.msk.bf16.gmra.mxu0 %vm2931_vm8, %v3023_v34 }
 0x44a   :  { %7130 = vmatprep.mubr.msk.bf16.mxu0 %vm8088_vm1, %v11239_v24  ;;  %v2939_v9 = vsel %vm2931_vm8, %v11267_v12, %v7454_v37  ;;  %v2938_v2 = vsel %vm2931_vm8, %v1018_v0, %v7453_v25 }
 0x44b   :  { %v7477_v17 = vpop.permute.xlu1 %7476  ;;  %v10129_v25 = vpop.permute.xlu0 %7446 }
 0x44c   :  { %v7479_v28 = vunpack.i.h.bf16 %v7477_v17  ;;  %v7478_v42 = vunpack.i.l.bf16 %v7477_v17 }
 0x44e   :  { %v2953_v60 = vsel %vm2945_vm9, %v2939_v9, %v7479_v28  ;;  %v2952_v49 = vsel %vm2945_vm9, %v2938_v2, %v7478_v42  ;;  %v11271_v9 = vld [vmem:[#allocation20_spill] sm:$0xff] }
 0x44f   :  { %v7482_v45 = vpop.permute.xlu1 %7481  ;;  %v10131_v1 = vpop.permute.xlu0 %7456 }
 0x450   :  { %v7484_v11 = vunpack.i.h.bf16 %v7482_v45  ;;  %v7483_v43 = vunpack.i.l.bf16 %v7482_v45  ;;  %v11270_v45 = vld [vmem:[#allocation21_spill] sm:$0xff] }
 0x451   :  { %7131 = vmatmul.mubr.msk.bf16.gmra.mxu0 %vm2931_vm8, %v3026_v44 }
 0x452   :  { %v10091_v36 = vsel %vm2959_vm10, %v2953_v60, %v7484_v11  ;;  %v10094_v61 = vsel %vm2959_vm10, %v2952_v49, %v7483_v43  ;;  %7134 = vmatprep.mubr.msk.bf16.mxu0 %vm8088_vm1, %v11239_v24 }
 0x453   :  { %v3021_v57 = vpack.c.bf16 %v10091_v36, %v10094_v61  ;;  %v7497_v7 = vpop.permute.xlu1 %7496  ;;  %v11278_v61 = vld [vmem:[#allocation25_spill] sm:$0xff] }
 0x454   :  { %v7499_v6 = vunpack.i.h.bf16 %v7497_v7  ;;  %v7498_v10 = vunpack.i.l.bf16 %v7497_v7  ;;  %v7384_v7 = vunpack.i.h.bf16 %v10082_v52 }
 0x456   :  { %v2941_v55 = vsel %vm2931_vm8, %v11268_v35, %v7499_v6  ;;  %v2940_v30 = vsel %vm2931_vm8, %v11269_v5, %v7498_v10  ;;  %v7418_v5 = vunpack.i.l.bf16 %v7417_v13 }
 0x457   :  { %v7512_v8 = vpop.permute.xlu1 %7511 }
 0x458   :  { %v7514_v39 = vunpack.i.h.bf16 %v7512_v8  ;;  %v7513_v44 = vunpack.i.l.bf16 %v7512_v8  ;;  %v7383_v8 = vunpack.i.l.bf16 %v10082_v52  ;;  %v7408_v52 = vunpack.i.l.bf16 %v10052_v59 }
 0x459   :  { %7135 = vmatmul.mubr.msk.bf16.gmra.mxu0 %vm2931_vm8, %v3029_v18 }
 0x45a   :  { %7138 = vmatprep.mubr.msk.bf16.mxu0 %vm8088_vm1, %v11239_v24  ;;  %v2954_v23 = vsel %vm2945_vm9, %v2940_v30, %v7513_v44  ;;  %v2955_v63 = vsel %vm2945_vm9, %v2941_v55, %v7514_v39  ;;  %v7399_v39 = vunpack.i.h.bf16 %v10041_v14  ;;  %v7398_v44 = vunpack.i.l.bf16 %v10041_v14 }
 0x45b   :  { %v7527_v21 = vpop.permute.xlu1 %7526  ;;  %v7419_v55 = vunpack.i.h.bf16 %v7417_v13  ;;  %v7409_v30 = vunpack.i.h.bf16 %v10052_v59  ;;  %v2973_v59 = vsel %vm2931_vm8, %v9728_v15, %v7418_v5  ;;  %v7404_v15 = vunpack.i.h.bf16 %v10047_v56  ;;  %v11274_v5 = vld [vmem:[#allocation12_spill] sm:$0xff] }
 0x45c   :  { %v7529_v20 = vunpack.i.h.bf16 %v7527_v21  ;;  %v7528_v34 = vunpack.i.l.bf16 %v7527_v21  ;;  %v10149_v21 = vpop.permute.xlu0 %7461 }
 0x45d   :  { %v2974_v13 = vsel %vm2931_vm8, %v9733_v48, %v7419_v55  ;;  %v7458_v55 = vunpack.i.l.bf16 %v10131_v1 }
 0x45e   :  { %v10119_v18 = vsel %vm2959_vm10, %v2955_v63, %v7529_v20  ;;  %v10122_v31 = vsel %vm2959_vm10, %v2954_v23, %v7528_v34  ;;  %v7434_v20 = vunpack.i.h.bf16 %v10059_v51  ;;  %v7433_v34 = vunpack.i.l.bf16 %v10059_v51  ;;  %v11272_v23 = vld [vmem:[#allocation10_spill] sm:$0xff] }
 0x45f   :  { %v3024_v17 = vpack.c.bf16 %v10119_v18, %v10122_v31  ;;  %v7537_v37 = vpop.permute.xlu1 %7536  ;;  %v2933_v63 = vsel %vm2931_vm8, %v11272_v23, %v7384_v7  ;;  %v7424_v7 = vunpack.i.h.bf16 %v10100_v47 }
 0x460   :  { %v7539_v42 = vunpack.i.h.bf16 %v7537_v37  ;;  %v7538_v22 = vunpack.i.l.bf16 %v7537_v37  ;;  %v2947_v37 = vsel %vm2945_vm9, %v2933_v63, %v7399_v39  ;;  %v7414_v39 = vunpack.i.h.bf16 %v10054_v16 }
 0x461   :  { %7139 = vmatmul.mubr.msk.bf16.gmra.mxu0 %vm2931_vm8, %v3032_v26  ;;  %v11273_v26 = vld [vmem:[#allocation9_spill] sm:$0xff]  ;;  %v2961_v51 = vsel %vm2959_vm10, %v2947_v37, %v7409_v30  ;;  %v11275_v30 = vld [vmem:[#allocation11_spill] sm:$0xff] }
 0x462   :  { %7186 = vmatprep.mubr.msk.bf16.mxu0 %vm8088_vm1, %v11239_v24  ;;  %v2943_v12 = vsel %vm2931_vm8, %v11270_v45, %v7539_v42  ;;  %v2942_v2 = vsel %vm2931_vm8, %v11271_v9, %v7538_v22  ;;  %v2932_v14 = vsel %vm2931_vm8, %v11273_v26, %v7383_v8  ;;  %v2986_v45 = vsel %vm2945_vm9, %v2973_v59, %v7433_v34 }
 0x463   :  { %v7547_v28 = vpop.permute.xlu1 %7546  ;;  %v7388_v9 = vunpack.i.l.bf16 %v10029_v40  ;;  %v7423_v8 = vunpack.i.l.bf16 %v10100_v47 }
 0x464   :  { %v7549_v4 = vunpack.i.h.bf16 %v7547_v28  ;;  %v7548_v46 = vunpack.i.l.bf16 %v7547_v28  ;;  %v2946_v28 = vsel %vm2945_vm9, %v2932_v14, %v7398_v44  ;;  %v7459_v44 = vunpack.i.h.bf16 %v10131_v1 }
 0x465   :  { %v2975_v23 = vsel %vm2931_vm8, %v9742_v41, %v7423_v8  ;;  %v7429_v41 = vunpack.i.h.bf16 %v10112_v19 }
 0x466   :  { %v2956_v60 = vsel %vm2945_vm9, %v2942_v2, %v7548_v46  ;;  %v2957_v49 = vsel %vm2945_vm9, %v2943_v12, %v7549_v4  ;;  %v2960_v46 = vsel %vm2959_vm10, %v2946_v28, %v7408_v52  ;;  %v7389_v12 = vunpack.i.h.bf16 %v10029_v40 }
 0x467   :  { %v7557_v0 = vpop.permute.xlu1 %7556  ;;  %v7413_v40 = vunpack.i.l.bf16 %v10054_v16  ;;  %v2934_v52 = vsel %vm2931_vm8, %v11275_v30, %v7388_v9  ;;  %v2976_v16 = vsel %vm2931_vm8, %v9749_v58, %v7424_v7  ;;  %v2988_v28 = vsel %vm2945_vm9, %v2975_v23, %v7458_v55 }
 0x468   :  { %v7559_v11 = vunpack.i.h.bf16 %v7557_v0  ;;  %v7558_v43 = vunpack.i.l.bf16 %v7557_v0  ;;  %v2987_v0 = vsel %vm2945_vm9, %v2974_v13, %v7434_v20  ;;  %v2989_v37 = vsel %vm2945_vm9, %v2976_v16, %v7459_v44 }
 0x469   :  { %v7393_v58 = vunpack.i.l.bf16 %v10035_v27  ;;  %v7443_v9 = vunpack.i.l.bf16 %v10066_v62 }
 0x46a   :  { %v10142_v6 = vsel %vm2959_vm10, %v2957_v49, %v7559_v11  ;;  %v10145_v10 = vsel %vm2959_vm10, %v2956_v60, %v7558_v43  ;;  %v7403_v11 = vunpack.i.l.bf16 %v10047_v56  ;;  %v3012_v49 = vpack.c.bf16 %v2961_v51, %v2960_v46 }
 0x46b   :  { %v3027_v35 = vpack.c.bf16 %v10142_v6, %v10145_v10  ;;  %v2935_v56 = vsel %vm2931_vm8, %v11274_v5, %v7389_v12  ;;  %v7444_v12 = vunpack.i.h.bf16 %v10066_v62  ;;  %v7567_v31 = vpop.permute.xlu1 %7566 }
 0x46c   :  { %v2949_v20 = vsel %vm2945_vm9, %v2935_v56, %v7404_v15  ;;  %v2948_v47 = vsel %vm2945_vm9, %v2934_v52, %v7403_v11  ;;  %v11277_v15 = vld [vmem:[#allocation13_spill] sm:$0xff]  ;;  %v7448_v56 = vunpack.i.l.bf16 %v10129_v25 }
 0x46d   :  { %v2963_v26 = vsel %vm2959_vm10, %v2949_v20, %v7414_v39  ;;  %v2962_v14 = vsel %vm2959_vm10, %v2948_v47, %v7413_v40  ;;  %v2936_v11 = vsel %vm2931_vm8, %v11277_v15, %v7393_v58 }
 0x46e   :  { %v3015_v46 = vpack.c.bf16 %v2963_v26, %v2962_v14  ;;  %v2979_v23 = vsel %vm2931_vm8, %v9776_v3, %v7448_v56 }
 0x46f   :  { %v7467_v42 = vpop.permute.xlu0 %7466 }
 0x470   :  { %v7469_v22 = vunpack.i.h.bf16 %v7467_v42  ;;  %v7468_v4 = vunpack.i.l.bf16 %v7467_v42  ;;  %v7394_v42 = vunpack.i.h.bf16 %v10035_v27  ;;  %v11276_v27 = vld [vmem:[#allocation14_spill] sm:$0xff] }
 0x472   :  { %v2999_v2 = vsel %vm2959_vm10, %v2986_v45, %v7468_v4  ;;  %v3000_v48 = vsel %vm2959_vm10, %v2987_v0, %v7469_v22  ;;  %v7428_v22 = vunpack.i.l.bf16 %v10112_v19  ;;  %v7439_v0 = vunpack.i.h.bf16 %v10061_v50 }
 0x473   :  { %v10177_v43 = vpop.permute.xlu0 %7471  ;;  %v3013_v60 = vpack.c.bf16 %v3000_v48, %v2999_v2  ;;  %v7438_v45 = vunpack.i.l.bf16 %v10061_v50  ;;  %v7464_v2 = vunpack.i.h.bf16 %v10149_v21  ;;  %v7463_v48 = vunpack.i.l.bf16 %v10149_v21 }
 0x474   :  { %v2937_v19 = vsel %vm2931_vm8, %v11276_v27, %v7394_v42  ;;  %v2977_v50 = vsel %vm2931_vm8, %v9755_v32, %v7428_v22  ;;  %v7449_v32 = vunpack.i.h.bf16 %v10129_v25  ;;  %v7474_v47 = vunpack.i.h.bf16 %v10177_v43 }
 0x475   :  { %3230 = vmatprep.mubr.bf16.mxu1 %v3013_v60  ;;  %v2978_v60 = vsel %vm2931_vm8, %v9765_v38, %v7429_v41  ;;  %v2951_v62 = vsel %vm2945_vm9, %v2937_v19, %v7439_v0  ;;  %v2950_v7 = vsel %vm2945_vm9, %v2936_v11, %v7438_v45  ;;  %v2990_v55 = vsel %vm2945_vm9, %v2977_v50, %v7463_v48 }
 0x476   :  { %3231 = vmatmul.mubr.bf16.vlgmr.msra.gmra.mxu1 %v3012_v49  ;;  %v2964_v39 = vsel %vm2959_vm10, %v2950_v7, %v7443_v9  ;;  %v2965_v40 = vsel %vm2959_vm10, %v2951_v62, %v7444_v12  ;;  %v2991_v44 = vsel %vm2945_vm9, %v2978_v60, %v7464_v2  ;;  %v2980_v16 = vsel %vm2931_vm8, %v9613_v54, %v7449_v32 }
 0x477   :  { %v7487_v34 = vpop.permute.xlu0 %7486  ;;  %v3018_v20 = vpack.c.bf16 %v2965_v40, %v2964_v39  ;;  %v11280_v39 = vld [vmem:[#allocation26_spill] sm:$0xff] }
 0x478   :  { %v7489_v1 = vunpack.i.h.bf16 %v7487_v34  ;;  %v7488_v63 = vunpack.i.l.bf16 %v7487_v34  ;;  %v7473_v34 = vunpack.i.l.bf16 %v10177_v43 }
 0x47a   :  { %v3001_v13 = vsel %vm2959_vm10, %v2988_v28, %v7488_v63  ;;  %v3002_v59 = vsel %vm2959_vm10, %v2989_v37, %v7489_v1  ;;  %v2993_v37 = vsel %vm2945_vm9, %v2980_v16, %v7474_v47  ;;  %v2992_v28 = vsel %vm2945_vm9, %v2979_v23, %v7473_v34 }
 0x47b   :  { %v7492_v4 = vpop.permute.xlu0 %7491  ;;  %v3016_v51 = vpack.c.bf16 %v3002_v59, %v3001_v13 }
 0x47c   :  { %v7494_v63 = vunpack.i.h.bf16 %v7492_v4  ;;  %v7493_v26 = vunpack.i.l.bf16 %v7492_v4 }
 0x47d   :  { %3238 = vmatprep.mubr.bf16.mxu1 %v3016_v51 }
 0x47e   :  { %3239 = vmatmul.mubr.bf16.gmra.mxu1 %v3015_v46  ;;  %v2982_v3 = vsel %vm2931_vm8, %v9633_v53, %v7494_v63  ;;  %v2981_v41 = vsel %vm2931_vm8, %v9620_v29, %v7493_v26 }
 0x47f   :  { %v7502_v49 = vpop.permute.xlu0 %7501 }
 0x480   :  { %v7504_v21 = vunpack.i.h.bf16 %v7502_v49  ;;  %v7503_v8 = vunpack.i.l.bf16 %v7502_v49 }
 0x482   :  { %v3003_v38 = vsel %vm2959_vm10, %v2990_v55, %v7503_v8  ;;  %v3004_v5 = vsel %vm2959_vm10, %v2991_v44, %v7504_v21  ;;  %v7569_v44 = vunpack.i.h.bf16 %v7567_v31  ;;  %v7568_v55 = vunpack.i.l.bf16 %v7567_v31 }
 0x483   :  { %v7507_v30 = vpop.permute.xlu0 %7506  ;;  %v3019_v52 = vpack.c.bf16 %v3004_v5, %v3003_v38 }
 0x484   :  { %v7509_v42 = vunpack.i.h.bf16 %v7507_v30  ;;  %v7508_v13 = vunpack.i.l.bf16 %v7507_v30 }
 0x485   :  { %3246 = vmatprep.mubr.bf16.mxu1 %v3019_v52 }
 0x486   :  { %3247 = vmatmul.mubr.bf16.gmra.mxu1 %v3018_v20  ;;  %v2995_v51 = vsel %vm2945_vm9, %v2982_v3, %v7509_v42  ;;  %v2994_v46 = vsel %vm2945_vm9, %v2981_v41, %v7508_v13 }
 0x487   :  { %v7517_v1 = vpop.permute.xlu0 %7516 }
 0x488   :  { %v7519_v14 = vunpack.i.h.bf16 %v7517_v1  ;;  %v7518_v25 = vunpack.i.l.bf16 %v7517_v1 }
 0x48a   :  { %v3005_v43 = vsel %vm2959_vm10, %v2992_v28, %v7518_v25  ;;  %v3006_v59 = vsel %vm2959_vm10, %v2993_v37, %v7519_v14 }
 0x48b   :  { %v7522_v58 = vpop.permute.xlu0 %7521  ;;  %v3022_v54 = vpack.c.bf16 %v3006_v59, %v3005_v43 }
 0x48c   :  { %v7524_v22 = vunpack.i.h.bf16 %v7522_v58  ;;  %v7523_v4 = vunpack.i.l.bf16 %v7522_v58 }
 0x48d   :  { %3254 = vmatprep.mubr.bf16.mxu1 %v3022_v54 }
 0x48e   :  { %3255 = vmatmul.mubr.bf16.gmra.mxu1 %v3021_v57  ;;  %v3007_v0 = vsel %vm2959_vm10, %v2994_v46, %v7523_v4  ;;  %v3008_v45 = vsel %vm2959_vm10, %v2995_v51, %v7524_v22 }
 0x48f   :  { %v7532_v12 = vpop.permute.xlu0 %7531  ;;  %v3025_v53 = vpack.c.bf16 %v3008_v45, %v3007_v0 }
 0x490   :  { %v7534_v29 = vunpack.i.h.bf16 %v7532_v12  ;;  %v7533_v2 = vunpack.i.l.bf16 %v7532_v12 }
 0x491   :  { %3262 = vmatprep.mubr.bf16.mxu1 %v3025_v53 }
 0x492   :  { %v2984_v36 = vsel %vm2931_vm8, %v9665_v33, %v7534_v29  ;;  %v2983_v57 = vsel %vm2931_vm8, %v11278_v61, %v7533_v2  ;;  %v11279_v33 = vld [vmem:[#allocation22_spill] sm:$0xff] }
 0x493   :  { %v7542_v9 = vpop.permute.xlu0 %7541 }
 0x494   :  { %v7544_v48 = vunpack.i.h.bf16 %v7542_v9  ;;  %v7543_v27 = vunpack.i.l.bf16 %v7542_v9 }
 0x496   :  { %3263 = vmatmul.mubr.bf16.gmra.mxu1 %v3024_v17  ;;  %v2996_v60 = vsel %vm2945_vm9, %v2983_v57, %v7543_v27  ;;  %v2997_v50 = vsel %vm2945_vm9, %v2984_v36, %v7544_v48 }
 0x497   :  { %v7552_v19 = vpop.permute.xlu0 %7551 }
 0x498   :  { %v7554_v15 = vunpack.i.h.bf16 %v7552_v19  ;;  %v7553_v11 = vunpack.i.l.bf16 %v7552_v19 }
 0x49a   :  { %v3009_v49 = vsel %vm2959_vm10, %v2996_v60, %v7553_v11  ;;  %v3010_v62 = vsel %vm2959_vm10, %v2997_v50, %v7554_v15 }
 0x49b   :  { %v7562_v7 = vpop.permute.xlu0 %7561  ;;  %v3028_v18 = vpack.c.bf16 %v3010_v62, %v3009_v49 }
 0x49c   :  { %v7564_v17 = vunpack.i.h.bf16 %v7562_v7  ;;  %v7563_v21 = vunpack.i.l.bf16 %v7562_v7 }
 0x49d   :  { %3270 = vmatprep.mubr.bf16.mxu1 %v3028_v18 }
 0x49e   :  { %v2944_v8 = vsel %vm2931_vm8, %v11279_v33, %v7564_v17  ;;  %v2985_v40 = vsel %vm2931_vm8, %v11280_v39, %v7563_v21  ;;  %3271 = vmatmul.mubr.bf16.gmra.mxu1 %v3027_v35  ;;  %v10291_v21 = vld [vmem:[%s11196_s5] ss:$0 sm:$0xff] }
 0x49f   :  { %v7572_v38 = vpop.permute.xlu0 %7571  ;;  %v2958_v56 = vsel %vm2945_vm9, %v2944_v8, %v7569_v44  ;;  %v2998_v30 = vsel %vm2945_vm9, %v2985_v40, %v7568_v55 }
 0x4a0   :  { %v7574_v5 = vunpack.i.h.bf16 %v7572_v38  ;;  %v7573_v32 = vunpack.i.l.bf16 %v7572_v38 }
 0x4a2   :  { %v2972_v52 = vsel %vm2959_vm10, %v2958_v56, %v7574_v5  ;;  %v3011_v20 = vsel %vm2959_vm10, %v2998_v30, %v7573_v32  ;;  %v10297_v56 = vld [vmem:[%s11196_s5 + $0x1] ss:$0 sm:$0xff] }
 0x4a3   :  { %v3030_v47 = vpack.c.bf16 %v2972_v52, %v2972_v52  ;;  %v3031_v34 = vpack.c.bf16 %v3011_v20, %v3011_v20 }
 0x4a5   :  { %3278 = vmatprep.mubr.bf16.mxu1 %v3031_v34 }
 0x4a6   :  { %3279 = vmatmul.mubr.bf16.gmra.mxu1 %v3030_v47 }
 0x4a7   :  { %7150 = vmatprep.mubr.msk.bf16.mxu1 %vm8088_vm1, %v11239_v24 }
 0x4f1   :  { %v10274_v6 = vpop.f32.mrf.mxu0 }
 0x4f3   :  { %v7116_v10 = vpop.f32.mrf.mxu0 }
 0x4f5   :  { %v10276_v35 = vpop.f32.mrf.mxu0 }
 0x4f7   :  { %v7117_v16 = vpop.f32.mrf.mxu0 }
 0x4f9   :  { %v3328_v23 = vpop.f32.mrf.mxu0 }
 0x4fb   :  { %v7120_v1 = vpop.f32.mrf.mxu0 }
 0x4fd   :  { %v3331_v63 = vpop.f32.mrf.mxu0 }
 0x4ff   :  { %v7121_v26 = vpop.f32.mrf.mxu0 }
 0x501   :  { %v3336_v14 = vpop.f32.mrf.mxu0 }
 0x503   :  { %v7124_v25 = vpop.f32.mrf.mxu0 }
 0x505   :  { %v3339_v37 = vpop.f32.mrf.mxu0 }
 0x507   :  { %v7125_v28 = vpop.f32.mrf.mxu0 }
 0x509   :  { %v3344_v42 = vpop.f32.mrf.mxu0 }
 0x50b   :  { %v7128_v13 = vpop.f32.mrf.mxu0 }
 0x50d   :  { %v3347_v43 = vpop.f32.mrf.mxu0 }
 0x50f   :  { %v7129_v59 = vpop.f32.mrf.mxu0 }
 0x510   :  { %v11281_v59 = vmov 0  }
 0x511   :  { %v10278_v58 = vpop.f32.mrf.mxu0 }
 0x513   :  { %v7132_v54 = vpop.f32.mrf.mxu0 }
 0x514   :  { %v10309_v54 = vsel %vm997_vm7, 65535, %v11281_v59 }
 0x515   :  { %v10280_v3 = vpop.f32.mrf.mxu0 }
 0x517   :  { %v7133_v41 = vpop.f32.mrf.mxu0 }
 0x519   :  { %v10282_v22 = vpop.f32.mrf.mxu0 }
 0x51b   :  { %v7136_v4 = vpop.f32.mrf.mxu0 }
 0x51d   :  { %v10284_v51 = vpop.f32.mrf.mxu0 }
 0x51f   :  { %v7137_v46 = vpop.f32.mrf.mxu0 }
 0x521   :  { %v10286_v0 = vpop.f32.mrf.mxu0 }
 0x523   :  { %v7140_v45 = vpop.f32.mrf.mxu0 }
 0x525   :  { %v3371_v12 = vpop.f32.mrf.mxu0 }
 0x527   :  { %v7141_v53 = vpop.f32.mrf.mxu0 }
 0x536   :  { %v6783_v9 = vpop.f32.mrf.mxu1 }
 0x538   :  { %v6784_v29 = vpop.f32.mrf.mxu1 }
 0x539   :  { %v6785_v1 = vadd.f32 %v6784_v29, %v6783_v9 }
 0x53a   :  { %v6786_v2 = vpop.f32.mrf.mxu1 }
 0x53c   :  { %v6787_v48 = vpop.f32.mrf.mxu1 }
 0x53d   :  { %v6788_v30 = vadd.f32 %v6787_v48, %v6786_v2 }
 0x53e   :  { %v6789_v27 = vpop.f32.mrf.mxu1 }
 0x540   :  { %v6790_v19 = vpop.f32.mrf.mxu1 }
 0x541   :  { %v6791_v38 = vadd.f32 %v6790_v19, %v6789_v27 }
 0x542   :  { %v6792_v36 = vpop.f32.mrf.mxu1 }
 0x543   :  { %v3329_v26 = vadd.f32 %v6791_v38, %v3328_v23  ;;  %v3321_v23 = vadd.f32 %v6785_v1, %v10274_v6 }
 0x544   :  { %v6793_v61 = vpop.f32.mrf.mxu1 }
 0x545   :  { %v6794_v8 = vadd.f32 %v6793_v61, %v6792_v36  ;;  %v3381_v46 = vmul.f32 %v10291_v21, %v3329_v26  ;;  %v3379_v36 = vmul.f32 %v10291_v21, %v3321_v23 }
 0x546   :  { %v6795_v57 = vpop.f32.mrf.mxu1 }
 0x547   :  { %v3332_v20 = vadd.f32 %v6794_v8, %v3331_v63  ;;  %v3399_v61 = vadd.f32 %v10297_v56, %v3381_v46 }
 0x548   :  { %v6796_v15 = vpop.f32.mrf.mxu1 }
 0x549   :  { %v6797_v31 = vadd.f32 %v6796_v15, %v6795_v57 }
 0x54a   :  { %v6798_v11 = vpop.f32.mrf.mxu1 }
 0x54b   :  { %v3337_v5 = vadd.f32 %v6797_v31, %v3336_v14 }
 0x54c   :  { %v6799_v60 = vpop.f32.mrf.mxu1 }
 0x54d   :  { %v6800_v62 = vadd.f32 %v6799_v60, %v6798_v11  ;;  %v3383_v14 = vmul.f32 %v10291_v21, %v3337_v5 }
 0x54e   :  { %v6801_v50 = vpop.f32.mrf.mxu1 }
 0x54f   :  { %v3340_v39 = vadd.f32 %v6800_v62, %v3339_v37  ;;  %v3324_v37 = vadd.f32 %v6788_v30, %v10276_v35  ;;  %v3401_v45 = vadd.f32 %v10297_v56, %v3383_v14  ;;  %v7758_v14 = vld [vmem:[#allocation3] sm:$0xff]  }
 0x550   :  { %v6802_v49 = vpop.f32.mrf.mxu1 }
 0x551   :  { %v6803_v7 = vadd.f32 %v6802_v49, %v6801_v50  ;;  %v3384_v47 = vmul.f32 %v10291_v21, %v3340_v39  ;;  %v3380_v12 = vmul.f32 %v10291_v21, %v3324_v37  ;;  %v3414_v57 = vmax.f32 %v3401_v45, 0.0 }
 0x552   :  { %v6804_v18 = vpop.f32.mrf.mxu1 }
 0x553   :  { %v3345_v17 = vadd.f32 %v6803_v7, %v3344_v42  ;;  %v3382_v42 = vmul.f32 %v10291_v21, %v3332_v20  ;;  %v3402_v63 = vadd.f32 %v10297_v56, %v3384_v47  ;;  %v3398_v15 = vadd.f32 %v10297_v56, %v3380_v12 }
 0x554   :  { %v6805_v33 = vpop.f32.mrf.mxu1 }
 0x555   :  { %v3385_v40 = vmul.f32 %v10291_v21, %v3345_v17  ;;  %v6806_v44 = vadd.f32 %v6805_v33, %v6804_v18  ;;  %v3400_v29 = vadd.f32 %v10297_v56, %v3382_v42  ;;  %v3415_v2 = vmax.f32 %v3402_v63, 0.0 }
 0x556   :  { %v6807_v55 = vpop.f32.mrf.mxu1  ;;  %v3397_v17 = vadd.f32 %v10297_v56, %v3379_v36  ;;  %v3412_v33 = vmax.f32 %v3399_v61, 0.0  ;;  %v7759_v61 = vld [vmem:[#allocation3 + $0x8] sm:$0xff]  }
 0x557   :  { %v3348_v32 = vadd.f32 %v6806_v44, %v3347_v43  ;;  %v3403_v34 = vadd.f32 %v10297_v56, %v3385_v40  ;;  %v3413_v49 = vmax.f32 %v3400_v29, 0.0 }
 0x558   :  { %v6808_v52 = vpop.f32.mrf.mxu1  ;;  %v3410_v30 = vmax.f32 %v3397_v17, 0.0 }
 0x559   :  { %v3386_v10 = vmul.f32 %v10291_v21, %v3348_v32  ;;  %v3416_v13 = vmax.f32 %v3403_v34, 0.0  ;;  %v6809_v53 = vadd.f32 %v6808_v52, %v6807_v55  ;;  %v10339_v40 = vpack.c.bf16 %v3413_v49, %v3412_v33  ;;  %v7766_v49 = vld [vmem:[#allocation3 + $0x40] sm:$0xff]  }
 0x55a   :  { %v6810_v16 = vpop.f32.mrf.mxu1 }
 0x55b   :  { %v3404_v25 = vadd.f32 %v10297_v56, %v3386_v10  ;;  %v3353_v11 = vadd.f32 %v6809_v53, %v10278_v58  ;;  %v3411_v58 = vmax.f32 %v3398_v15, 0.0  ;;  %v7762_v15 = vld [vmem:[#allocation3 + $0x20] sm:$0xff]  }
 0x55c   :  { %v6811_v28 = vpop.f32.mrf.mxu1 }
 0x55d   :  { %v3417_v43 = vmax.f32 %v3404_v25, 0.0  ;;  %v6812_v41 = vadd.f32 %v6811_v28, %v6810_v16  ;;  %v10349_v34 = vpack.c.bf16 %v3411_v58, %v3410_v30  ;;  %v7771_v30 = vld [vmem:[#allocation5 + $0x68] sm:$0xff]  }
 0x55e   :  { %v6813_v4 = vpop.f32.mrf.mxu1 }
 0x55f   :  { %v10314_v35 = vpack.c.bf16 %v3417_v43, %v3416_v13  ;;  %v3356_v27 = vadd.f32 %v6812_v41, %v10280_v3  ;;  %v10330_v3 = vpack.c.bf16 %v3415_v2, %v3414_v57  ;;  %v7761_v57 = vld [vmem:[#allocation3 + $0x18] sm:$0xff]  }
 0x560   :  { %v6814_v9 = vpop.f32.mrf.mxu1 }
 0x561   :  { %v10320_v48 = vand.u32 %v10309_v54, %v10314_v35  ;;  %v6815_v6 = vadd.f32 %v6814_v9, %v6813_v4  ;;  %v3388_v7 = vmul.f32 %v10291_v21, %v3356_v27  ;;  %v3490_v45 = vshll.u32 %v10314_v35, 16 }
 0x562   :  { %v6816_v19 = vpop.f32.mrf.mxu1  ;;  %v3488_v27 = vshrl.u32 %v10314_v35, 16  ;;  %v7760_v35 = vld [vmem:[#allocation3 + $0x10] sm:$0xff]  }
 0x563   :  { %7143 = vmatpush3.bf16.msra.mxu1 %v10320_v48  ;;  %v3361_v60 = vadd.f32 %v6815_v6, %v10282_v22  ;;  %v3387_v22 = vmul.f32 %v10291_v21, %v3353_v11  ;;  %v3406_v5 = vadd.f32 %v10297_v56, %v3388_v7  ;;  %v7763_v11 = vld [vmem:[#allocation3 + $0x28] sm:$0xff]  }
 0x564   :  { %v6817_v50 = vpop.f32.mrf.mxu1  ;;  %7144 = vmatprep.subr.bf16.mxu1 %v11239_v24 }
 0x565   :  { %v6818_v62 = vadd.f32 %v6817_v50, %v6816_v19  ;;  %v3389_v18 = vmul.f32 %v10291_v21, %v3361_v60  ;;  %v3405_v20 = vadd.f32 %v10297_v56, %v3387_v22  ;;  %v3419_v26 = vmax.f32 %v3406_v5, 0.0  ;;  %v7764_v60 = vld [vmem:[#allocation3 + $0x30] sm:$0xff]   ;;  %v7765_v50 = vld [vmem:[#allocation3 + $0x38] sm:$0xff]  }
 0x566   :  { %v6819_v31 = vpop.f32.mrf.mxu1 }
 0x567   :  { %v3364_v8 = vadd.f32 %v6818_v62, %v10284_v51  ;;  %7145 = vmatpush3.bf16.msra.mxu1 %v10330_v3  ;;  %v3407_v44 = vadd.f32 %v10297_v56, %v3389_v18 }
 0x568   :  { %v6820_v39 = vpop.f32.mrf.mxu1  ;;  %7146 = vmatprep.subr.bf16.mxu1 %v11239_v24 }
 0x569   :  { %v3390_v55 = vmul.f32 %v10291_v21, %v3364_v8  ;;  %v6821_v38 = vadd.f32 %v6820_v39, %v6819_v31  ;;  %v3420_v10 = vmax.f32 %v3407_v44, 0.0  ;;  %v7768_v44 = vld [vmem:[#allocation5 + $0x38] sm:$0xff]  }
 0x56a   :  { %v6822_v32 = vpop.f32.mrf.mxu1 }
 0x56b   :  { %v3408_v51 = vadd.f32 %v10297_v56, %v3390_v55  ;;  %v3369_v52 = vadd.f32 %v6821_v38, %v10286_v0  ;;  %7147 = vmatpush3.bf16.msra.mxu1 %v10339_v40  ;;  %v3418_v0 = vmax.f32 %v3405_v20, 0.0  ;;  %v7769_v55 = vld [vmem:[#allocation5 + $0x70] sm:$0xff]  }
 0x56c   :  { %v6823_v47 = vpop.f32.mrf.mxu1  ;;  %7148 = vmatprep.subr.bf16.mxu1 %v11239_v24  ;;  %v7770_v32 = vld [vmem:[#allocation5 + $0x30] sm:$0xff]  }
 0x56d   :  { %v3421_v16 = vmax.f32 %v3408_v51, 0.0  ;;  %v3391_v1 = vmul.f32 %v10291_v21, %v3369_v52  ;;  %v3427_v42 = vpack.c.bf16 %v3419_v26, %v3418_v0  ;;  %v7777_v0 = vld [vmem:[#allocation5 + $0x50] sm:$0xff]  }
 0x56f   :  { %v3428_v25 = vpack.c.bf16 %v3421_v16, %v3420_v10  ;;  %v3409_v37 = vadd.f32 %v10297_v56, %v3391_v1  ;;  %7149 = vmatpush3.bf16.msra.mxu1 %v10349_v34  ;;  %v3495_v41 = vshll.u32 %v3427_v42, 16  ;;  %v3499_v9 = vshrl.u32 %v3427_v42, 16  ;;  %v7773_v16 = vld [vmem:[#allocation5 + $0x60] sm:$0xff]  }
 0x570   :  { %7154 = vmatprep.subr.bf16.mxu1 %v11239_v24 }
 0x571   :  { %v3422_v28 = vmax.f32 %v3409_v37, 0.0  ;;  %v3503_v63 = vshll.u32 %v3428_v25, 16  ;;  %v3507_v23 = vshrl.u32 %v3428_v25, 16  ;;  %v3497_v12 = vrot.slane %v3495_v41, 1  ;;  %v7775_v25 = vld [vmem:[#allocation5 + $0x58] sm:$0xff]  }
 0x572   :  { %7151 = vmatmul.mubr.msk.bf16.vlgmr.msra.gmra.mxu1 %vm3437_vm11, %v7758_v14  ;;  %v7776_v37 = vld [vmem:[#allocation5 + $0x18] sm:$0xff]  }
 0x573   :  { %v3429_v13 = vpack.c.bf16 %v3422_v28, %v3422_v28  ;;  %7162 = vmatprep.mubr.msk.bf16.mxu1 %vm8088_vm1, %v11239_v24  ;;  %v3505_v4 = vrot.slane %v3503_v63, 1  ;;  %v3501_v2 = vor.u32 %v3499_v9, %v3497_v12  ;;  %v7778_v63 = vld [vmem:[#allocation5 + $0x10] sm:$0xff]  }
 0x575   :  { %v3511_v21 = vshll.u32 %v3429_v13, 16  ;;  %v3515_v43 = vshrl.u32 %v3429_v13, 16  ;;  %v3509_v53 = vor.u32 %v3507_v23, %v3505_v4  ;;  %v10375_v6 = vsel %vm3487_vm12, %v3501_v2, %v3505_v4  ;;  %v7779_v13 = vld [vmem:[#allocation5 + $0x48] sm:$0xff]  }
 0x577   :  { %v10359_v56 = vand.u32 %v3515_v43, %v10309_v54  ;;  %v3513_v46 = vrot.slane %v3511_v21, 1  ;;  %v3492_v54 = vrot.slane %v3490_v45, 1 }
 0x579   :  { %7155 = vmatpush3.bf16.msra.mxu1 %v10359_v56  ;;  %7179 = vmatpush3.bf16.msra.mxu0 %v10359_v56  ;;  %v10367_v29 = vsel %vm3487_vm12, %v3509_v53, %v3513_v46  ;;  %v3493_v19 = vor.u32 %v3492_v54, %v3488_v27  ;;  %v7782_v53 = vld [vmem:[#allocation5] sm:$0xff]  }
 0x57a   :  { %7156 = vmatprep.subr.bf16.mxu1 %v11239_v24  ;;  %7180 = vmatprep.subr.bf16.mxu0 %v11239_v24 }
 0x57b   :  { %v10382_v36 = vsel %vm3487_vm12, %v3493_v19, %v3497_v12  ;;  %v7781_v12 = vld [vmem:[#allocation5 + $0x40] sm:$0xff]  }
 0x57d   :  { %7157 = vmatpush3.bf16.msra.mxu1 %v10367_v29  ;;  %7181 = vmatpush3.bf16.msra.mxu0 %v10367_v29 }
 0x57e   :  { %7158 = vmatprep.subr.bf16.mxu1 %v11239_v24  ;;  %7182 = vmatprep.subr.bf16.mxu0 %v11239_v24 }
 0x581   :  { %7159 = vmatpush3.bf16.msra.mxu1 %v10375_v6  ;;  %7183 = vmatpush3.bf16.msra.mxu0 %v10375_v6 }
 0x582   :  { %7160 = vmatprep.subr.bf16.mxu1 %v11239_v24  ;;  %7184 = vmatprep.subr.bf16.mxu0 %v11239_v24 }
 0x585   :  { %7161 = vmatpush3.bf16.msra.mxu1 %v10382_v36  ;;  %7185 = vmatpush3.bf16.msra.mxu0 %v10382_v36 }
 0x586   :  { %7166 = vmatprep.subr.bf16.mxu1 %v11239_v24  ;;  %7202 = vmatprep.subr.bf16.mxu0 %v11239_v24 }
 0x588   :  { %7163 = vmatmul.mubr.msk.bf16.vlgmr.msra.gmra.mxu1 %vm3437_vm11, %v7758_v14  ;;  %7187 = vmatmul.mubr.msk.bf16.vlgmr.msra.gmra.mxu0 %vm3437_vm11, %v7759_v61  ;;  %v7774_v14 = vld [vmem:[#allocation5 + $0x20] sm:$0xff]  }
 0x589   :  { %7167 = vmatpush3.bf16.msra.mxu1 %v10320_v48  ;;  %7203 = vmatpush3.bf16.msra.mxu0 %v10359_v56 }
 0x58a   :  { %7168 = vmatprep.subr.bf16.mxu1 %v11239_v24  ;;  %7204 = vmatprep.subr.bf16.mxu0 %v11239_v24 }
 0x58b   :  { %7174 = vmatprep.mubr.msk.bf16.mxu1 %vm8088_vm1, %v11239_v24  ;;  %7210 = vmatprep.mubr.msk.bf16.mxu0 %vm8088_vm1, %v11239_v24 }
 0x58d   :  { %7169 = vmatpush3.bf16.msra.mxu1 %v10330_v3  ;;  %7205 = vmatpush3.bf16.msra.mxu0 %v10367_v29 }
 0x58e   :  { %7170 = vmatprep.subr.bf16.mxu1 %v11239_v24  ;;  %7206 = vmatprep.subr.bf16.mxu0 %v11239_v24 }
 0x591   :  { %7171 = vmatpush3.bf16.msra.mxu1 %v10339_v40  ;;  %7207 = vmatpush3.bf16.msra.mxu0 %v10375_v6 }
 0x592   :  { %7172 = vmatprep.subr.bf16.mxu1 %v11239_v24  ;;  %7208 = vmatprep.subr.bf16.mxu0 %v11239_v24 }
 0x595   :  { %7173 = vmatpush3.bf16.msra.mxu1 %v10349_v34  ;;  %7209 = vmatpush3.bf16.msra.mxu0 %v10382_v36 }
 0x596   :  { %7190 = vmatprep.subr.bf16.mxu1 %v11239_v24  ;;  %7226 = vmatprep.subr.bf16.mxu0 %v11239_v24 }
 0x598   :  { %7175 = vmatmul.mubr.msk.bf16.vlgmr.msra.gmra.mxu1 %vm3437_vm11, %v7759_v61  ;;  %7211 = vmatmul.mubr.msk.bf16.vlgmr.msra.gmra.mxu0 %vm3437_vm11, %v7760_v35 }
 0x599   :  { %7191 = vmatpush3.bf16.msra.mxu1 %v10320_v48  ;;  %7227 = vmatpush3.bf16.msra.mxu0 %v10359_v56 }
 0x59a   :  { %7192 = vmatprep.subr.bf16.mxu1 %v11239_v24  ;;  %7228 = vmatprep.subr.bf16.mxu0 %v11239_v24 }
 0x59b   :  { %7198 = vmatprep.mubr.msk.bf16.mxu1 %vm8088_vm1, %v11239_v24  ;;  %7234 = vmatprep.mubr.msk.bf16.mxu0 %vm8088_vm1, %v11239_v24 }
 0x59d   :  { %7193 = vmatpush3.bf16.msra.mxu1 %v10330_v3  ;;  %7229 = vmatpush3.bf16.msra.mxu0 %v10367_v29 }
 0x59e   :  { %7194 = vmatprep.subr.bf16.mxu1 %v11239_v24  ;;  %7230 = vmatprep.subr.bf16.mxu0 %v11239_v24 }
 0x5a1   :  { %7195 = vmatpush3.bf16.msra.mxu1 %v10339_v40  ;;  %7231 = vmatpush3.bf16.msra.mxu0 %v10375_v6 }
 0x5a2   :  { %7196 = vmatprep.subr.bf16.mxu1 %v11239_v24  ;;  %7232 = vmatprep.subr.bf16.mxu0 %v11239_v24 }
 0x5a5   :  { %7197 = vmatpush3.bf16.msra.mxu1 %v10349_v34  ;;  %7233 = vmatpush3.bf16.msra.mxu0 %v10382_v36 }
 0x5a6   :  { %7214 = vmatprep.subr.bf16.mxu1 %v11239_v24  ;;  %7250 = vmatprep.subr.bf16.mxu0 %v11239_v24 }
 0x5a8   :  { %7199 = vmatmul.mubr.msk.bf16.vlgmr.msra.gmra.mxu1 %vm3437_vm11, %v7760_v35  ;;  %7235 = vmatmul.mubr.msk.bf16.vlgmr.msra.gmra.mxu0 %vm3437_vm11, %v7761_v57 }
 0x5a9   :  { %7215 = vmatpush3.bf16.msra.mxu1 %v10320_v48  ;;  %7251 = vmatpush3.bf16.msra.mxu0 %v10359_v56 }
 0x5aa   :  { %7216 = vmatprep.subr.bf16.mxu1 %v11239_v24  ;;  %7252 = vmatprep.subr.bf16.mxu0 %v11239_v24 }
 0x5ab   :  { %7222 = vmatprep.mubr.msk.bf16.mxu1 %vm8088_vm1, %v11239_v24  ;;  %7258 = vmatprep.mubr.msk.bf16.mxu0 %vm8088_vm1, %v11239_v24 }
 0x5ad   :  { %7217 = vmatpush3.bf16.msra.mxu1 %v10330_v3  ;;  %7253 = vmatpush3.bf16.msra.mxu0 %v10367_v29 }
 0x5ae   :  { %7218 = vmatprep.subr.bf16.mxu1 %v11239_v24  ;;  %7254 = vmatprep.subr.bf16.mxu0 %v11239_v24 }
 0x5b1   :  { %7219 = vmatpush3.bf16.msra.mxu1 %v10339_v40  ;;  %7255 = vmatpush3.bf16.msra.mxu0 %v10375_v6 }
 0x5b2   :  { %7220 = vmatprep.subr.bf16.mxu1 %v11239_v24  ;;  %7256 = vmatprep.subr.bf16.mxu0 %v11239_v24 }
 0x5b5   :  { %7221 = vmatpush3.bf16.msra.mxu1 %v10349_v34  ;;  %7257 = vmatpush3.bf16.msra.mxu0 %v10382_v36 }
 0x5b6   :  { %7238 = vmatprep.subr.bf16.mxu1 %v11239_v24  ;;  %7274 = vmatprep.subr.bf16.mxu0 %v11239_v24 }
 0x5b8   :  { %7223 = vmatmul.mubr.msk.bf16.vlgmr.msra.gmra.mxu1 %vm3437_vm11, %v7761_v57  ;;  %7259 = vmatmul.mubr.msk.bf16.vlgmr.msra.gmra.mxu0 %vm3437_vm11, %v7762_v15 }
 0x5b9   :  { %7239 = vmatpush3.bf16.msra.mxu1 %v10320_v48  ;;  %7275 = vmatpush3.bf16.msra.mxu0 %v10359_v56 }
 0x5ba   :  { %7240 = vmatprep.subr.bf16.mxu1 %v11239_v24  ;;  %7276 = vmatprep.subr.bf16.mxu0 %v11239_v24 }
 0x5bb   :  { %7246 = vmatprep.mubr.msk.bf16.mxu1 %vm8088_vm1, %v11239_v24  ;;  %7282 = vmatprep.mubr.msk.bf16.mxu0 %vm8088_vm1, %v11239_v24 }
 0x5bd   :  { %7241 = vmatpush3.bf16.msra.mxu1 %v10330_v3  ;;  %7277 = vmatpush3.bf16.msra.mxu0 %v10367_v29 }
 0x5be   :  { %7242 = vmatprep.subr.bf16.mxu1 %v11239_v24  ;;  %7278 = vmatprep.subr.bf16.mxu0 %v11239_v24 }
 0x5c1   :  { %7243 = vmatpush3.bf16.msra.mxu1 %v10339_v40  ;;  %7279 = vmatpush3.bf16.msra.mxu0 %v10375_v6 }
 0x5c2   :  { %7244 = vmatprep.subr.bf16.mxu1 %v11239_v24  ;;  %7280 = vmatprep.subr.bf16.mxu0 %v11239_v24 }
 0x5c5   :  { %7245 = vmatpush3.bf16.msra.mxu1 %v10349_v34  ;;  %7281 = vmatpush3.bf16.msra.mxu0 %v10382_v36 }
 0x5c6   :  { %7262 = vmatprep.subr.bf16.mxu1 %v11239_v24  ;;  %7298 = vmatprep.subr.bf16.mxu0 %v11239_v24 }
 0x5c8   :  { %7247 = vmatmul.mubr.msk.bf16.vlgmr.msra.gmra.mxu1 %vm3437_vm11, %v7762_v15  ;;  %7283 = vmatmul.mubr.msk.bf16.vlgmr.msra.gmra.mxu0 %vm3437_vm11, %v7763_v11 }
 0x5c9   :  { %7263 = vmatpush3.bf16.msra.mxu1 %v10320_v48  ;;  %7299 = vmatpush3.bf16.msra.mxu0 %v10359_v56 }
 0x5ca   :  { %7264 = vmatprep.subr.bf16.mxu1 %v11239_v24  ;;  %7300 = vmatprep.subr.bf16.mxu0 %v11239_v24 }
 0x5cb   :  { %7270 = vmatprep.mubr.msk.bf16.mxu1 %vm8088_vm1, %v11239_v24  ;;  %7306 = vmatprep.mubr.msk.bf16.mxu0 %vm8088_vm1, %v11239_v24 }
 0x5cd   :  { %7265 = vmatpush3.bf16.msra.mxu1 %v10330_v3  ;;  %7301 = vmatpush3.bf16.msra.mxu0 %v10367_v29 }
 0x5ce   :  { %7266 = vmatprep.subr.bf16.mxu1 %v11239_v24  ;;  %7302 = vmatprep.subr.bf16.mxu0 %v11239_v24 }
 0x5d1   :  { %7267 = vmatpush3.bf16.msra.mxu1 %v10339_v40  ;;  %7303 = vmatpush3.bf16.msra.mxu0 %v10375_v6 }
 0x5d2   :  { %7268 = vmatprep.subr.bf16.mxu1 %v11239_v24  ;;  %7304 = vmatprep.subr.bf16.mxu0 %v11239_v24 }
 0x5d5   :  { %7269 = vmatpush3.bf16.msra.mxu1 %v10349_v34  ;;  %7305 = vmatpush3.bf16.msra.mxu0 %v10382_v36 }
 0x5d6   :  { %7286 = vmatprep.subr.bf16.mxu1 %v11239_v24  ;;  %7322 = vmatprep.subr.bf16.mxu0 %v11239_v24 }
 0x5d8   :  { %7271 = vmatmul.mubr.msk.bf16.vlgmr.msra.gmra.mxu1 %vm3437_vm11, %v7763_v11  ;;  %7307 = vmatmul.mubr.msk.bf16.vlgmr.msra.gmra.mxu0 %vm3437_vm11, %v7764_v60 }
 0x5d9   :  { %7287 = vmatpush3.bf16.msra.mxu1 %v10320_v48  ;;  %7323 = vmatpush3.bf16.msra.mxu0 %v10359_v56 }
 0x5da   :  { %7288 = vmatprep.subr.bf16.mxu1 %v11239_v24  ;;  %7324 = vmatprep.subr.bf16.mxu0 %v11239_v24 }
 0x5db   :  { %7294 = vmatprep.mubr.msk.bf16.mxu1 %vm8088_vm1, %v11239_v24  ;;  %7330 = vmatprep.mubr.msk.bf16.mxu0 %vm8088_vm1, %v11239_v24 }
 0x5dd   :  { %7289 = vmatpush3.bf16.msra.mxu1 %v10330_v3  ;;  %7325 = vmatpush3.bf16.msra.mxu0 %v10367_v29 }
 0x5de   :  { %7290 = vmatprep.subr.bf16.mxu1 %v11239_v24  ;;  %7326 = vmatprep.subr.bf16.mxu0 %v11239_v24 }
 0x5e1   :  { %7291 = vmatpush3.bf16.msra.mxu1 %v10339_v40  ;;  %7327 = vmatpush3.bf16.msra.mxu0 %v10375_v6 }
 0x5e2   :  { %7292 = vmatprep.subr.bf16.mxu1 %v11239_v24  ;;  %7328 = vmatprep.subr.bf16.mxu0 %v11239_v24 }
 0x5e5   :  { %7293 = vmatpush3.bf16.msra.mxu1 %v10349_v34  ;;  %7329 = vmatpush3.bf16.msra.mxu0 %v10382_v36 }
 0x5e6   :  { %7310 = vmatprep.subr.bf16.mxu1 %v11239_v24  ;;  %7346 = vmatprep.subr.bf16.mxu0 %v11239_v24 }
 0x5e8   :  { %7295 = vmatmul.mubr.msk.bf16.vlgmr.msra.gmra.mxu1 %vm3437_vm11, %v7764_v60  ;;  %7331 = vmatmul.mubr.msk.bf16.vlgmr.msra.gmra.mxu0 %vm3437_vm11, %v7765_v50 }
 0x5e9   :  { %7311 = vmatpush3.bf16.msra.mxu1 %v10320_v48  ;;  %7347 = vmatpush3.bf16.msra.mxu0 %v10359_v56  ;;  %v7780_v56 = vld [vmem:[#allocation5 + $0x8] sm:$0xff]  }
 0x5ea   :  { %7312 = vmatprep.subr.bf16.mxu1 %v11239_v24  ;;  %7348 = vmatprep.subr.bf16.mxu0 %v11239_v24 }
 0x5eb   :  { %7318 = vmatprep.mubr.msk.bf16.mxu1 %vm8088_vm1, %v11239_v24  ;;  %7354 = vmatprep.mubr.msk.bf16.mxu0 %vm8088_vm1, %v11239_v24 }
 0x5ed   :  { %7313 = vmatpush3.bf16.msra.mxu1 %v10330_v3  ;;  %7349 = vmatpush3.bf16.msra.mxu0 %v10367_v29 }
 0x5ee   :  { %7314 = vmatprep.subr.bf16.mxu1 %v11239_v24  ;;  %7350 = vmatprep.subr.bf16.mxu0 %v11239_v24 }
 0x5f1   :  { %7315 = vmatpush3.bf16.msra.mxu1 %v10339_v40  ;;  %7351 = vmatpush3.bf16.msra.mxu0 %v10375_v6 }
 0x5f2   :  { %7316 = vmatprep.subr.bf16.mxu1 %v11239_v24  ;;  %7352 = vmatprep.subr.bf16.mxu0 %v11239_v24 }
 0x5f5   :  { %7317 = vmatpush3.bf16.msra.mxu1 %v10349_v34  ;;  %7353 = vmatpush3.bf16.msra.mxu0 %v10382_v36 }
 0x5f6   :  { %7334 = vmatprep.subr.bf16.mxu1 %v11239_v24 }
 0x5f8   :  { %7319 = vmatmul.mubr.msk.bf16.vlgmr.msra.gmra.mxu1 %vm3437_vm11, %v7765_v50  ;;  %7355 = vmatmul.mubr.msk.bf16.vlgmr.msra.gmra.mxu0 %vm3437_vm11, %v7766_v49 }
 0x5f9   :  { %7335 = vmatpush3.bf16.msra.mxu1 %v10320_v48  ;;  %7342 = vmatprep.mubr.msk.bf16.mxu1 %vm8088_vm1, %v11239_v24 }
 0x5fa   :  { %7336 = vmatprep.subr.bf16.mxu1 %v11239_v24 }
 0x5fd   :  { %7337 = vmatpush3.bf16.msra.mxu1 %v10330_v3 }
 0x5fe   :  { %7338 = vmatprep.subr.bf16.mxu1 %v11239_v24 }
 0x601   :  { %7339 = vmatpush3.bf16.msra.mxu1 %v10339_v40  ;;  %v7767_v40 = vld [vmem:[#allocation5 + $0x78] sm:$0xff]  }
 0x602   :  { %7340 = vmatprep.subr.bf16.mxu1 %v11239_v24 }
 0x605   :  { %7341 = vmatpush3.bf16.msra.mxu1 %v10349_v34  ;;  %v7772_v34 = vld [vmem:[#allocation5 + $0x28] sm:$0xff]  }
 0x606   :  { %6924 = vmatprep.subr.bf16.mxu1 %v7767_v40 }
 0x608   :  { %7343 = vmatmul.mubr.msk.bf16.vlgmr.msra.gmra.mxu1 %vm3437_vm11, %v7766_v49 }
 0x609   :  { %6925 = vmatpush3.bf16.msra.mxu1 %v7768_v44  ;;  %v7785_v44 = vld [vmem:[#allocation5 + $0xf0] sm:$0xff]  }
 0x60a   :  { %6926 = vmatprep.subr.bf16.mxu1 %v7769_v55 }
 0x60d   :  { %6927 = vmatpush3.bf16.msra.mxu1 %v7770_v32  ;;  %v7786_v32 = vld [vmem:[#allocation5 + $0xb0] sm:$0xff]  }
 0x60e   :  { %6928 = vmatprep.subr.bf16.mxu1 %v7771_v30 }
 0x611   :  { %6929 = vmatpush3.bf16.msra.mxu1 %v7772_v34  ;;  %v7788_v34 = vld [vmem:[#allocation5 + $0xa8] sm:$0xff]  }
 0x612   :  { %6930 = vmatprep.subr.bf16.mxu1 %v7773_v16  ;;  %v7790_v16 = vld [vmem:[#allocation5 + $0xa0] sm:$0xff]  }
 0x615   :  { %6931 = vmatpush3.bf16.msra.mxu1 %v7774_v14  ;;  %v7792_v14 = vld [vmem:[#allocation5 + $0x98] sm:$0xff]  }
 0x616   :  { %6932 = vmatprep.subr.bf16.mxu1 %v7775_v25  ;;  %v7793_v25 = vld [vmem:[#allocation5 + $0xd0] sm:$0xff]  }
 0x619   :  { %6933 = vmatpush3.bf16.msra.mxu1 %v7776_v37 }
 0x61a   :  { %6934 = vmatprep.subr.bf16.mxu1 %v7777_v0 }
 0x61d   :  { %6935 = vmatpush3.bf16.msra.mxu1 %v7778_v63 }
 0x61e   :  { %6936 = vmatprep.subr.bf16.mxu1 %v7779_v13 }
 0x621   :  { %6937 = vmatpush3.bf16.msra.mxu1 %v7780_v56 }
 0x622   :  { %6938 = vmatprep.subr.bf16.mxu1 %v7781_v12  ;;  %v7798_v12 = vld [vmem:[#allocation5 + $0x118] sm:$0xff]  }
 0x625   :  { %6939 = vmatpush3.bf16.msra.mxu1 %v7782_v53  ;;  %v7799_v53 = vld [vmem:[#allocation5 + $0x80] sm:$0xff]  }
 0x626   :  { %7358 = vmatprep.subr.bf16.mxu1 %v7798_v12 }
 0x632   :  { %v10553_v48 = vpop.f32.mrf.mxu1 }
 0x634   :  { %v7152_v62 = vpop.f32.mrf.mxu1 }
 0x636   :  { %v10555_v7 = vpop.f32.mrf.mxu1 }
 0x638   :  { %v7153_v18 = vpop.f32.mrf.mxu1 }
 0x639   :  { %v7783_v18 = vld [vmem:[#allocation5 + $0xf8] sm:$0xff]  }
 0x63a   :  { %6952 = vmatprep.subr.bf16.mxu0 %v7783_v18 }
 0x648   :  { %v10557_v31 = vpop.f32.mrf.mxu1  ;;  %v10559_v17 = vpop.f32.mrf.mxu0 }
 0x64a   :  { %v7164_v3 = vpop.f32.mrf.mxu1  ;;  %v7188_v33 = vpop.f32.mrf.mxu0 }
 0x64c   :  { %v10561_v8 = vpop.f32.mrf.mxu1  ;;  %v10563_v58 = vpop.f32.mrf.mxu0 }
 0x64d   :  { %v7600_v24 = vpack.i.bf16 %v10563_v58, %v10559_v17 }
 0x64e   :  { %v7165_v22 = vpop.f32.mrf.mxu1  ;;  %v7189_v39 = vpop.f32.mrf.mxu0 }
 0x64f   :  { %v7784_v22 = vld [vmem:[#allocation5 + $0xb8] sm:$0xff]  }
 0x650   :  { %6953 = vmatpush3.bf16.msra.mxu0 %v7784_v22 }
 0x651   :  { %6954 = vmatprep.subr.bf16.mxu0 %v7785_v44 }
 0x654   :  { %6955 = vmatpush3.bf16.msra.mxu0 %v7786_v32 }
 0x658   :  { %v3609_v38 = vpop.f32.mrf.mxu1  ;;  %v10567_v5 = vpop.f32.mrf.mxu0 }
 0x65a   :  { %v7176_v51 = vpop.f32.mrf.mxu1  ;;  %v7212_v52 = vpop.f32.mrf.mxu0 }
 0x65b   :  { %v7787_v51 = vld [vmem:[#allocation5 + $0xe8] sm:$0xff]  }
 0x65c   :  { %v3612_v20 = vpop.f32.mrf.mxu1  ;;  %v10569_v47 = vpop.f32.mrf.mxu0  ;;  %6956 = vmatprep.subr.bf16.mxu0 %v7787_v51 }
 0x65d   :  { %v7575_v10 = vpack.i.bf16 %v3612_v20, %v3609_v38  ;;  %6957 = vmatpush3.bf16.msra.mxu0 %v7788_v34  ;;  %v7800_v34 = vld [vmem:[#allocation5 + $0x110] sm:$0xff]  }
 0x65e   :  { %v7177_v1 = vpop.f32.mrf.mxu1  ;;  %v7213_v26 = vpop.f32.mrf.mxu0 }
 0x65f   :  { %7576 = vrot.lane.b32.xlu0 %v7575_v10, %s8084_s30  ;;  %v7789_v10 = vld [vmem:[#allocation5 + $0xe0] sm:$0xff]   ;;  %v7791_v1 = vld [vmem:[#allocation5 + $0xd8] sm:$0xff]  }
 0x660   :  { %6958 = vmatprep.subr.bf16.mxu0 %v7789_v10  ;;  %v7801_v10 = vld [vmem:[#allocation5 + $0x108] sm:$0xff]  }
 0x661   :  { %6959 = vmatpush3.bf16.msra.mxu0 %v7790_v16 }
 0x662   :  { %6960 = vmatprep.subr.bf16.mxu0 %v7791_v1 }
 0x665   :  { %6961 = vmatpush3.bf16.msra.mxu0 %v7792_v14 }
 0x666   :  { %6962 = vmatprep.subr.bf16.mxu0 %v7793_v25 }
 0x668   :  { %v10572_v28 = vpop.f32.mrf.mxu1  ;;  %v10574_v42 = vpop.f32.mrf.mxu0 }
 0x66a   :  { %v7200_v21 = vpop.f32.mrf.mxu1  ;;  %v7236_v43 = vpop.f32.mrf.mxu0 }
 0x66b   :  { %v7794_v21 = vld [vmem:[#allocation5 + $0x90] sm:$0xff]   ;;  %v7795_v43 = vld [vmem:[#allocation5 + $0xc8] sm:$0xff]  }
 0x66c   :  { %v10576_v41 = vpop.f32.mrf.mxu1  ;;  %v10578_v4 = vpop.f32.mrf.mxu0  ;;  %6963 = vmatpush3.bf16.msra.mxu0 %v7794_v21 }
 0x66d   :  { %v7595_v23 = vpack.i.bf16 %v10578_v4, %v10574_v42  ;;  %6964 = vmatprep.subr.bf16.mxu0 %v7795_v43 }
 0x66e   :  { %v7201_v46 = vpop.f32.mrf.mxu1  ;;  %v7237_v45 = vpop.f32.mrf.mxu0 }
 0x66f   :  { %v7796_v46 = vld [vmem:[#allocation5 + $0x88] sm:$0xff]   ;;  %v7797_v45 = vld [vmem:[#allocation5 + $0xc0] sm:$0xff]  }
 0x670   :  { %6965 = vmatpush3.bf16.msra.mxu0 %v7796_v46 }
 0x671   :  { %6966 = vmatprep.subr.bf16.mxu0 %v7797_v45 }
 0x674   :  { %6967 = vmatpush3.bf16.msra.mxu0 %v7799_v53 }
 0x678   :  { %v3795_v9 = vpop.f32.mrf.mxu1  ;;  %v10582_v29 = vpop.f32.mrf.mxu0 }
 0x67a   :  { %v7224_v54 = vpop.f32.mrf.mxu1  ;;  %v7260_v2 = vpop.f32.mrf.mxu0 }
 0x67c   :  { %v3798_v27 = vpop.f32.mrf.mxu1  ;;  %v10584_v6 = vpop.f32.mrf.mxu0 }
 0x67d   :  { %v7580_v19 = vpack.i.bf16 %v3798_v27, %v3795_v9 }
 0x67e   :  { %v7225_v36 = vpop.f32.mrf.mxu1  ;;  %v7261_v61 = vpop.f32.mrf.mxu0 }
 0x67f   :  { %7581 = vrot.lane.b32.xlu1 %v7580_v19, %s8084_s30 }
 0x688   :  { %v10587_v35 = vpop.f32.mrf.mxu1  ;;  %v4022_v57 = vpop.f32.mrf.mxu0 }
 0x68a   :  { %v7248_v15 = vpop.f32.mrf.mxu1  ;;  %v7284_v11 = vpop.f32.mrf.mxu0 }
 0x68c   :  { %v10589_v60 = vpop.f32.mrf.mxu1  ;;  %v4025_v50 = vpop.f32.mrf.mxu0 }
 0x68d   :  { %v7610_v26 = vpack.i.bf16 %v4025_v50, %v4022_v57 }
 0x68e   :  { %v7249_v49 = vpop.f32.mrf.mxu1  ;;  %v7285_v62 = vpop.f32.mrf.mxu0 }
 0x698   :  { %v3981_v3 = vpop.f32.mrf.mxu1  ;;  %v10591_v33 = vpop.f32.mrf.mxu0 }
 0x69a   :  { %v7272_v39 = vpop.f32.mrf.mxu1  ;;  %v7308_v40 = vpop.f32.mrf.mxu0 }
 0x69c   :  { %v3984_v55 = vpop.f32.mrf.mxu1  ;;  %v10593_v38 = vpop.f32.mrf.mxu0 }
 0x69d   :  { %v7585_v30 = vpack.i.bf16 %v3984_v55, %v3981_v3 }
 0x69e   :  { %v7273_v52 = vpop.f32.mrf.mxu1  ;;  %v7309_v20 = vpop.f32.mrf.mxu0 }
 0x69f   :  { %7586 = vrot.lane.b32.xlu0 %v7585_v30, %s8084_s30 }
 0x6a3   :  { %7601 = vrot.lane.b32.xlu0 %v7600_v24, %s8084_s30 }
 0x6a7   :  { %7611 = vrot.lane.b32.xlu0 %v7610_v26, %s8084_s30 }
 0x6a8   :  { %v10601_v37 = vpop.f32.mrf.mxu1  ;;  %v4208_v0 = vpop.f32.mrf.mxu0 }
 0x6aa   :  { %v7296_v63 = vpop.f32.mrf.mxu1  ;;  %v7332_v13 = vpop.f32.mrf.mxu0 }
 0x6ac   :  { %v10603_v17 = vpop.f32.mrf.mxu1  ;;  %v4211_v58 = vpop.f32.mrf.mxu0 }
 0x6ad   :  { %v7605_v50 = vpack.i.bf16 %v4211_v58, %v4208_v0 }
 0x6ae   :  { %v7297_v24 = vpop.f32.mrf.mxu1  ;;  %v7333_v56 = vpop.f32.mrf.mxu0 }
 0x6b8   :  { %v4167_v9 = vpop.f32.mrf.mxu1  ;;  %v10605_v2 = vpop.f32.mrf.mxu0 }
 0x6ba   :  { %v7320_v54 = vpop.f32.mrf.mxu1  ;;  %v7356_v19 = vpop.f32.mrf.mxu0 }
 0x6bc   :  { %v4170_v27 = vpop.f32.mrf.mxu1  ;;  %v10607_v57 = vpop.f32.mrf.mxu0 }
 0x6bd   :  { %v7590_v36 = vpack.i.bf16 %v4170_v27, %v4167_v9  ;;  %v4397_v15 = vpack.c.bf16 %v10607_v57, %v10605_v2  ;;  %v7823_v2 = vld [vmem:[%s11200_s9 + $0x44] ss:$8 sps:$4 sm:$0xff]   ;;  %v7818_v57 = vld [vmem:[%s11200_s9 + $0x150] ss:$8 sps:$4 sm:$0xff]  }
 0x6be   :  { %v7321_v61 = vpop.f32.mrf.mxu1  ;;  %v7357_v11 = vpop.f32.mrf.mxu0 }
 0x6bf   :  { %7591 = vrot.lane.b32.xlu1 %v7590_v36, %s8084_s30 }
 0x6c3   :  { %7596 = vrot.lane.b32.xlu1 %v7595_v23, %s8084_s30 }
 0x6c7   :  { %7606 = vrot.lane.b32.xlu1 %v7605_v50, %s8084_s30 }
 0x6c8   :  { %v10617_v49 = vpop.f32.mrf.mxu1 }
 0x6ca   :  { %v7344_v62 = vpop.f32.mrf.mxu1 }
 0x6cb   :  { %v7809_v62 = vld [vmem:[%s11200_s9 + $0x60] ss:$8 sps:$4 sm:$0xff]  }
 0x6cc   :  { %v10619_v18 = vpop.f32.mrf.mxu1 }
 0x6cd   :  { %v4392_v3 = vpack.c.bf16 %v10619_v18, %v10617_v49  ;;  %v7806_v49 = vld [vmem:[%s11200_s9 + $0x170] ss:$8 sps:$4 sm:$0xff]   ;;  %v7814_v18 = vld [vmem:[%s11200_s9 + $0x164] ss:$8 sps:$4 sm:$0xff]  }
 0x6ce   :  { %v7345_v22 = vpop.f32.mrf.mxu1 }
 0x6cf   :  { %v7812_v22 = vld [vmem:[%s11200_s9 + $0x160] ss:$8 sps:$4 sm:$0xff]  }
 0x6d1   :  { %v7577_v39 = vpop.permute.xlu0 %7576 }
 0x6d2   :  { %v7579_v40 = vunpack.i.h.bf16 %v7577_v39  ;;  %v7578_v44 = vunpack.i.l.bf16 %v7577_v39  ;;  %v7815_v39 = vld [vmem:[%s11200_s9 + $0x50] ss:$8 sps:$4 sm:$0xff]  }
 0x6d4   :  { %v4373_v42 = vsel %vm2945_vm9, %v10555_v7, %v7579_v40  ;;  %v4372_v4 = vsel %vm2945_vm9, %v10553_v48, %v7578_v44  ;;  %v7802_v7 = vld [vmem:[#allocation5 + $0x100] sm:$0xff]   ;;  %v7820_v40 = vld [vmem:[%s11200_s9 + $0x154] ss:$8 sps:$4 sm:$0xff]  }
 0x6d5   :  { %v4388_v20 = vpack.c.bf16 %v4373_v42, %v4372_v4  ;;  %v7826_v44 = vld [vmem:[%s11200_s9 + $0x144] ss:$8 sps:$4 sm:$0xff]   ;;  %v7832_v42 = vld [vmem:[%s11200_s9 + $0x134] ss:$8 sps:$4 sm:$0xff]  }
 0x6d6   :  { %v7835_v4 = vld [vmem:[%s11200_s9 + $0x24] ss:$8 sps:$4 sm:$0xff]  }
 0x6f1   :  { %v7582_v55 = vpop.permute.xlu1 %7581 }
 0x6f2   :  { %v7584_v32 = vunpack.i.h.bf16 %v7582_v55  ;;  %v7583_v30 = vunpack.i.l.bf16 %v7582_v55  ;;  %v7829_v55 = vld [vmem:[%s11200_s9 + $0x34] ss:$8 sps:$4 sm:$0xff]  }
 0x6f4   :  { %v4376_v23 = vsel %vm2945_vm9, %v10572_v28, %v7583_v30  ;;  %v4377_v51 = vsel %vm2945_vm9, %v10576_v41, %v7584_v32  ;;  %v7824_v32 = vld [vmem:[%s11200_s9 + $0x140] ss:$8 sps:$4 sm:$0xff]   ;;  %v7827_v30 = vld [vmem:[%s11200_s9 + $0x30] ss:$8 sps:$4 sm:$0xff]  }
 0x6f5   :  { %v4389_v52 = vpack.c.bf16 %v4377_v51, %v4376_v23  ;;  %v7830_v23 = vld [vmem:[%s11200_s9 + $0x130] ss:$8 sps:$4 sm:$0xff]   ;;  %v7833_v51 = vld [vmem:[%s11200_s9 + $0x20] ss:$8 sps:$4 sm:$0xff]  }
 0x6f7   :  { %4724 = vmatprep.mubr.bf16.mxu1 %v4389_v52  ;;  %v7838_v52 = vld [vmem:[%s11200_s9 + $0x124] ss:$8 sps:$4 sm:$0xff]  }
 0x6f8   :  { %4725 = vmatmul.mubr.bf16.vlgmr.msra.gmra.mxu1 %v4388_v20  ;;  %v7841_v20 = vld [vmem:[%s11200_s9 + $0x14] ss:$8 sps:$4 sm:$0xff]  }
 0x6f9   :  { %7359 = vmatpush3.bf16.msra.mxu1 %v7798_v12 }
 0x6fa   :  { %7360 = vmatprep.subr.bf16.mxu1 %v7800_v34 }
 0x6fd   :  { %7361 = vmatpush3.bf16.msra.mxu1 %v7800_v34  ;;  %v7836_v34 = vld [vmem:[%s11200_s9 + $0x120] ss:$8 sps:$4 sm:$0xff]  }
 0x6fe   :  { %7362 = vmatprep.subr.bf16.mxu1 %v7801_v10 }
 0x701   :  { %7363 = vmatpush3.bf16.msra.mxu1 %v7801_v10  ;;  %v7839_v10 = vld [vmem:[%s11200_s9 + $0x10] ss:$8 sps:$4 sm:$0xff]  }
 0x702   :  { %7364 = vmatprep.subr.bf16.mxu1 %v7802_v7 }
 0x705   :  { %7365 = vmatpush3.bf16.msra.mxu1 %v7802_v7  ;;  %v7844_v7 = vld [vmem:[%s11200_s9 + $0x114] ss:$8 sps:$4 sm:$0xff]  }
 0x711   :  { %v7587_v48 = vpop.permute.xlu0 %7586 }
 0x712   :  { %v7589_v28 = vunpack.i.h.bf16 %v7587_v48  ;;  %v7588_v1 = vunpack.i.l.bf16 %v7587_v48  ;;  %v7847_v48 = vld [vmem:[%s11200_s9 + $0x4] ss:$8 sps:$4 sm:$0xff]  }
 0x714   :  { %v4381_v25 = vsel %vm2945_vm9, %v10589_v60, %v7589_v28  ;;  %v4380_v0 = vsel %vm2945_vm9, %v10587_v35, %v7588_v1  ;;  %v7845_v28 = vld [vmem:[%s11200_s9] ss:$8 sps:$4 sm:$0xff]   ;;  %v7850_v1 = vld [vmem:[%s11200_s9 + $0x104] ss:$8 sps:$4 sm:$0xff]  }
 0x715   :  { %v7602_v16 = vpop.permute.xlu0 %7601  ;;  %v4390_v46 = vpack.c.bf16 %v4381_v25, %v4380_v0  ;;  %v7851_v25 = vld [vmem:[%s11200_s9 + $0xf0] ss:$8 sps:$4 sm:$0xff]  }
 0x716   :  { %v7604_v63 = vunpack.i.h.bf16 %v7602_v16  ;;  %v7603_v13 = vunpack.i.l.bf16 %v7602_v16  ;;  %v7842_v16 = vld [vmem:[%s11200_s9 + $0x110] ss:$8 sps:$4 sm:$0xff]  }
 0x717   :  { %v7854_v0 = vld [vmem:[%s11200_s9 + $0x1f0] ss:$8 sps:$4 sm:$0xff]  }
 0x718   :  { %v4375_v60 = vsel %vm2945_vm9, %v10561_v8, %v7604_v63  ;;  %v4374_v35 = vsel %vm2945_vm9, %v10557_v31, %v7603_v13  ;;  %v7859_v63 = vld [vmem:[%s11200_s9 + $0xe4] ss:$8 sps:$4 sm:$0xff]  }
 0x719   :  { %v7612_v21 = vpop.permute.xlu0 %7611  ;;  %v4393_v19 = vpack.c.bf16 %v4375_v60, %v4374_v35  ;;  %v7862_v13 = vld [vmem:[%s11200_s9 + $0x1e4] ss:$8 sps:$4 sm:$0xff]   ;;  %v7869_v60 = vld [vmem:[%s11200_s9 + $0xc0] ss:$8 sps:$4 sm:$0xff]  }
 0x71a   :  { %v7614_v53 = vunpack.i.h.bf16 %v7612_v21  ;;  %v7613_v9 = vunpack.i.l.bf16 %v7612_v21  ;;  %v7857_v21 = vld [vmem:[%s11200_s9 + $0xe0] ss:$8 sps:$4 sm:$0xff]  }
 0x71b   :  { %v7872_v35 = vld [vmem:[%s11200_s9 + $0x1c0] ss:$8 sps:$4 sm:$0xff]  }
 0x71c   :  { %v4383_v8 = vsel %vm2945_vm9, %v10584_v6, %v7614_v53  ;;  %v4382_v31 = vsel %vm2945_vm9, %v10582_v29, %v7613_v9  ;;  %v7803_v29 = vld [vmem:[%s11200_s9 + $0x70] ss:$8 sps:$4 sm:$0xff]   ;;  %v7805_v6 = vld [vmem:[%s11200_s9 + $0x74] ss:$8 sps:$4 sm:$0xff]  }
 0x71d   :  { %v4395_v50 = vpack.c.bf16 %v4383_v8, %v4382_v31  ;;  %5804 = vmatprep.subr.bf16.mxu0 %v7805_v6  ;;  %v7877_v53 = vld [vmem:[%s11200_s9 + $0xb4] ss:$8 sps:$4 sm:$0xff]   ;;  %v7887_v31 = vld [vmem:[%s11200_s9 + $0x90] ss:$8 sps:$4 sm:$0xff]  }
 0x71e   :  { %v7880_v9 = vld [vmem:[%s11200_s9 + $0x1b4] ss:$8 sps:$4 sm:$0xff]  }
 0x71f   :  { %v7892_v8 = vld [vmem:[%s11200_s9 + $0x194] ss:$8 sps:$4 sm:$0xff]  }
 0x720   :  { %v7901_v6 = vld [vmem:[%s11200_s9 + $0x274] ss:$8 sps:$4 sm:$0xff]  }
 0x731   :  { %v7592_v26 = vpop.permute.xlu1 %7591 }
 0x732   :  { %v7594_v41 = vunpack.i.h.bf16 %v7592_v26  ;;  %v7593_v14 = vunpack.i.l.bf16 %v7592_v26  ;;  %v7848_v26 = vld [vmem:[%s11200_s9 + $0x100] ss:$8 sps:$4 sm:$0xff]  }
 0x734   :  { %v4384_v43 = vsel %vm2945_vm9, %v10601_v37, %v7593_v14  ;;  %v4385_v58 = vsel %vm2945_vm9, %v10603_v17, %v7594_v41  ;;  %v7853_v41 = vld [vmem:[%s11200_s9 + $0xf4] ss:$8 sps:$4 sm:$0xff]  }
 0x735   :  { %v7597_v24 = vpop.permute.xlu1 %7596  ;;  %v4391_v56 = vpack.c.bf16 %v4385_v58, %v4384_v43  ;;  %v7856_v14 = vld [vmem:[%s11200_s9 + $0x1f4] ss:$8 sps:$4 sm:$0xff]   ;;  %v7860_v43 = vld [vmem:[%s11200_s9 + $0x1e0] ss:$8 sps:$4 sm:$0xff]  }
 0x736   :  { %v7599_v45 = vunpack.i.h.bf16 %v7597_v24  ;;  %v7598_v12 = vunpack.i.l.bf16 %v7597_v24  ;;  %v7865_v58 = vld [vmem:[%s11200_s9 + $0xd4] ss:$8 sps:$4 sm:$0xff]  }
 0x737   :  { %4773 = vmatprep.mubr.bf16.mxu0 %v4391_v56  ;;  %v7868_v24 = vld [vmem:[%s11200_s9 + $0x1d4] ss:$8 sps:$4 sm:$0xff]   ;;  %v7863_v56 = vld [vmem:[%s11200_s9 + $0xd0] ss:$8 sps:$4 sm:$0xff]  }
 0x738   :  { %4774 = vmatmul.mubr.bf16.vlgmr.msra.gmra.mxu0 %v4390_v46  ;;  %v4378_v37 = vsel %vm2945_vm9, %v10567_v5, %v7598_v12  ;;  %v4379_v17 = vsel %vm2945_vm9, %v10569_v47, %v7599_v45  ;;  %v7866_v46 = vld [vmem:[%s11200_s9 + $0x1d0] ss:$8 sps:$4 sm:$0xff]   ;;  %v7871_v45 = vld [vmem:[%s11200_s9 + $0xc4] ss:$8 sps:$4 sm:$0xff]  }
 0x739   :  { %v7607_v54 = vpop.permute.xlu1 %7606  ;;  %v4394_v27 = vpack.c.bf16 %v4379_v17, %v4378_v37  ;;  %5805 = vmatpush1.bf16.msra.mxu0 %v7803_v29  ;;  %v7874_v12 = vld [vmem:[%s11200_s9 + $0x1c4] ss:$8 sps:$4 sm:$0xff]   ;;  %v7875_v37 = vld [vmem:[%s11200_s9 + $0xb0] ss:$8 sps:$4 sm:$0xff]  }
 0x73a   :  { %v7609_v36 = vunpack.i.h.bf16 %v7607_v54  ;;  %v7608_v61 = vunpack.i.l.bf16 %v7607_v54  ;;  %v7878_v17 = vld [vmem:[%s11200_s9 + $0x1b0] ss:$8 sps:$4 sm:$0xff]   ;;  %v7883_v54 = vld [vmem:[%s11200_s9 + $0xa4] ss:$8 sps:$4 sm:$0xff]  }
 0x73b   :  { %4732 = vmatprep.mubr.bf16.mxu1 %v4394_v27  ;;  %v7886_v27 = vld [vmem:[%s11200_s9 + $0x1a4] ss:$8 sps:$4 sm:$0xff]  }
 0x73c   :  { %4733 = vmatmul.mubr.bf16.gmra.mxu1 %v4393_v19  ;;  %v4386_v11 = vsel %vm2945_vm9, %v10591_v33, %v7608_v61  ;;  %v4387_v5 = vsel %vm2945_vm9, %v10593_v38, %v7609_v36  ;;  %v7808_v33 = vld [vmem:[%s11200_s9 + $0x174] ss:$8 sps:$4 sm:$0xff]   ;;  %v7811_v38 = vld [vmem:[%s11200_s9 + $0x64] ss:$8 sps:$4 sm:$0xff]   ;;  %v7881_v19 = vld [vmem:[%s11200_s9 + $0xa0] ss:$8 sps:$4 sm:$0xff]  }
 0x73d   :  { %v4396_v47 = vpack.c.bf16 %v4387_v5, %v4386_v11  ;;  %7366 = vmatprep.mubr.msk.bf16.mxu1 %vm2945_vm9, %v4392_v3  ;;  %5845 = vmatprep.subr.bf16.mxu1 %v7808_v33  ;;  %v7817_v3 = vld [vmem:[%s11200_s9 + $0x54] ss:$8 sps:$4 sm:$0xff]   ;;  %v7884_v36 = vld [vmem:[%s11200_s9 + $0x1a0] ss:$8 sps:$4 sm:$0xff]   ;;  %v7890_v11 = vld [vmem:[%s11200_s9 + $0x190] ss:$8 sps:$4 sm:$0xff]  }
 0x73e   :  { %5806 = vmatprep.subr.bf16.mxu0 %v7811_v38  ;;  %v7889_v61 = vld [vmem:[%s11200_s9 + $0x94] ss:$8 sps:$4 sm:$0xff]   ;;  %v7895_v5 = vld [vmem:[%s11200_s9 + $0x84] ss:$8 sps:$4 sm:$0xff]  }
 0x73f   :  { %4781 = vmatprep.mubr.bf16.mxu0 %v4396_v47  ;;  %5807 = vmatpush1.bf16.msra.mxu0 %v7809_v62  ;;  %v7893_v47 = vld [vmem:[%s11200_s9 + $0x80] ss:$8 sps:$4 sm:$0xff]   ;;  %v7898_v29 = vld [vmem:[%s11200_s9 + $0x184] ss:$8 sps:$4 sm:$0xff]   ;;  %v7904_v33 = vld [vmem:[%s11200_s9 + $0x374] ss:$8 sps:$4 sm:$0xff]  }
 0x740   :  { %4782 = vmatmul.mubr.bf16.gmra.mxu0 %v4395_v50  ;;  %5808 = vmatprep.subr.bf16.mxu0 %v7817_v3  ;;  %v7896_v50 = vld [vmem:[%s11200_s9 + $0x180] ss:$8 sps:$4 sm:$0xff]  }
 0x743   :  { %5809 = vmatpush1.bf16.msra.mxu0 %v7815_v39 }
 0x744   :  { %7367 = vmatmul.mubr.msk.bf16.vlgmr.msra.gmra.mxu1 %vm2945_vm9, %v4397_v15  ;;  %v7821_v15 = vld [vmem:[%s11200_s9 + $0x40] ss:$8 sps:$4 sm:$0xff]   ;;  %5810 = vmatprep.subr.bf16.mxu0 %v7823_v2 }
 0x745   :  { %5846 = vmatpush1.bf16.msra.mxu1 %v7806_v49 }
 0x746   :  { %5847 = vmatprep.subr.bf16.mxu1 %v7814_v18 }
 0x747   :  { %5811 = vmatpush1.bf16.msra.mxu0 %v7821_v15 }
 0x748   :  { %5812 = vmatprep.subr.bf16.mxu0 %v7829_v55 }
 0x749   :  { %5848 = vmatpush1.bf16.msra.mxu1 %v7812_v22 }
 0x74a   :  { %5849 = vmatprep.subr.bf16.mxu1 %v7820_v40 }
 0x74b   :  { %5813 = vmatpush1.bf16.msra.mxu0 %v7827_v30 }
 0x74c   :  { %5814 = vmatprep.subr.bf16.mxu0 %v7835_v4 }
 0x74d   :  { %5850 = vmatpush1.bf16.msra.mxu1 %v7818_v57 }
 0x74e   :  { %5851 = vmatprep.subr.bf16.mxu1 %v7826_v44 }
 0x74f   :  { %5815 = vmatpush1.bf16.msra.mxu0 %v7833_v51 }
 0x750   :  { %5816 = vmatprep.subr.bf16.mxu0 %v7841_v20 }
 0x751   :  { %5852 = vmatpush1.bf16.msra.mxu1 %v7824_v32 }
 0x752   :  { %5853 = vmatprep.subr.bf16.mxu1 %v7832_v42 }
 0x753   :  { %5817 = vmatpush1.bf16.msra.mxu0 %v7839_v10 }
 0x754   :  { %5818 = vmatprep.subr.bf16.mxu0 %v7847_v48  ;;  %v6576_v48 = vld [vmem:[%s11199_s8] ss:$0 sm:$0xff] }
 0x755   :  { %5854 = vmatpush1.bf16.msra.mxu1 %v7830_v23 }
 0x756   :  { %5855 = vmatprep.subr.bf16.mxu1 %v7838_v52 }
 0x757   :  { %5819 = vmatpush1.bf16.msra.mxu0 %v7845_v28 }
 0x758   :  { %5820 = vmatprep.subr.bf16.mxu0 %v7853_v41 }
 0x759   :  { %5856 = vmatpush1.bf16.msra.mxu1 %v7836_v34 }
 0x75a   :  { %5857 = vmatprep.subr.bf16.mxu1 %v7844_v7 }
 0x75b   :  { %5821 = vmatpush2.bf16.msra.mxu0 %v7851_v25 }
 0x75c   :  { %5822 = vmatprep.subr.bf16.mxu0 %v7859_v63 }
 0x75d   :  { %5858 = vmatpush1.bf16.msra.mxu1 %v7842_v16 }
 0x75e   :  { %5859 = vmatprep.subr.bf16.mxu1 %v7850_v1 }
 0x75f   :  { %5823 = vmatpush2.bf16.msra.mxu0 %v7857_v21 }
 0x760   :  { %5824 = vmatprep.subr.bf16.mxu0 %v7865_v58 }
 0x761   :  { %5860 = vmatpush1.bf16.msra.mxu1 %v7848_v26 }
 0x762   :  { %5861 = vmatprep.subr.bf16.mxu1 %v7856_v14 }
 0x763   :  { %5825 = vmatpush2.bf16.msra.mxu0 %v7863_v56 }
 0x764   :  { %5826 = vmatprep.subr.bf16.mxu0 %v7871_v45 }
 0x765   :  { %5862 = vmatpush2.bf16.msra.mxu1 %v7854_v0 }
 0x766   :  { %5863 = vmatprep.subr.bf16.mxu1 %v7862_v13 }
 0x767   :  { %5827 = vmatpush2.bf16.msra.mxu0 %v7869_v60 }
 0x768   :  { %5828 = vmatprep.subr.bf16.mxu0 %v7877_v53 }
 0x769   :  { %5864 = vmatpush2.bf16.msra.mxu1 %v7860_v43  ;;  %v6577_v43 = vld [vmem:[%s11199_s8 + $0x1] ss:$0 sm:$0xff] }
 0x76a   :  { %5865 = vmatprep.subr.bf16.mxu1 %v7868_v24 }
 0x76b   :  { %5829 = vmatpush2.bf16.msra.mxu0 %v7875_v37 }
 0x76c   :  { %5830 = vmatprep.subr.bf16.mxu0 %v7883_v54 }
 0x76d   :  { %5866 = vmatpush2.bf16.msra.mxu1 %v7866_v46 }
 0x76e   :  { %5867 = vmatprep.subr.bf16.mxu1 %v7874_v12 }
 0x76f   :  { %5831 = vmatpush2.bf16.msra.mxu0 %v7881_v19 }
 0x770   :  { %5832 = vmatprep.subr.bf16.mxu0 %v7889_v61 }
 0x771   :  { %5868 = vmatpush2.bf16.msra.mxu1 %v7872_v35 }
 0x772   :  { %5869 = vmatprep.subr.bf16.mxu1 %v7880_v9 }
 0x773   :  { %5833 = vmatpush2.bf16.msra.mxu0 %v7887_v31 }
 0x774   :  { %5834 = vmatprep.subr.bf16.mxu0 %v7895_v5 }
 0x775   :  { %5870 = vmatpush2.bf16.msra.mxu1 %v7878_v17 }
 0x776   :  { %5871 = vmatprep.subr.bf16.mxu1 %v7886_v27 }
 0x777   :  { %5835 = vmatpush2.bf16.msra.mxu0 %v7893_v47 }
 0x778   :  { %5886 = vmatprep.subr.bf16.mxu0 %v7901_v6  ;;  %v7899_v6 = vld [vmem:[%s11200_s9 + $0x270] ss:$8 sps:$4 sm:$0xff]  }
 0x779   :  { %5872 = vmatpush2.bf16.msra.mxu1 %v7884_v36 }
 0x77a   :  { %5873 = vmatprep.subr.bf16.mxu1 %v7892_v8 }
 0x77d   :  { %5874 = vmatpush2.bf16.msra.mxu1 %v7890_v11 }
 0x77e   :  { %5875 = vmatprep.subr.bf16.mxu1 %v7898_v29 }
 0x781   :  { %5876 = vmatpush2.bf16.msra.mxu1 %v7896_v50  ;;  %v7958_v50 = vld [vmem:[%s11200_s9 + $0x3e4] ss:$8 sps:$4 sm:$0xff]  }
 0x782   :  { %5927 = vmatprep.subr.bf16.mxu1 %v7904_v33 }
 0x7b8   :  { %v6940_v38 = vpop.f32.mrf.mxu1 }
 0x7ba   :  { %v6941_v49 = vpop.f32.mrf.mxu1 }
 0x7bb   :  { %v6942_v42 = vadd.f32 %v6941_v49, %v6940_v38  ;;  %v7902_v49 = vld [vmem:[%s11200_s9 + $0x370] ss:$8 sps:$4 sm:$0xff]  }
 0x7bc   :  { %v6943_v62 = vpop.f32.mrf.mxu1 }
 0x7be   :  { %v6944_v3 = vpop.f32.mrf.mxu1 }
 0x7bf   :  { %v6945_v7 = vadd.f32 %v6944_v3, %v6943_v62 }
 0x7f8   :  { %v6968_v18 = vpop.f32.mrf.mxu0 }
 0x7fa   :  { %v6969_v22 = vpop.f32.mrf.mxu0 }
 0x7fb   :  { %v6970_v55 = vadd.f32 %v6969_v22, %v6968_v18 }
 0x7fc   :  { %v6946_v39 = vpop.f32.mrf.mxu1  ;;  %v6971_v40 = vpop.f32.mrf.mxu0 }
 0x7fd   :  { %v4776_v10 = vadd.f32 %v6970_v55, %v6942_v42 }
 0x7fe   :  { %v6947_v2 = vpop.f32.mrf.mxu1  ;;  %v6972_v57 = vpop.f32.mrf.mxu0 }
 0x7ff   :  { %v6948_v4 = vadd.f32 %v6947_v2, %v6946_v39  ;;  %v6973_v20 = vadd.f32 %v6972_v57, %v6971_v40 }
 0x800   :  { %v6949_v15 = vpop.f32.mrf.mxu1  ;;  %v6974_v44 = vpop.f32.mrf.mxu0 }
 0x801   :  { %v4779_v21 = vadd.f32 %v6973_v20, %v6945_v7 }
 0x802   :  { %v6950_v32 = vpop.f32.mrf.mxu1  ;;  %v6975_v30 = vpop.f32.mrf.mxu0 }
 0x803   :  { %v6976_v23 = vadd.f32 %v6975_v30, %v6974_v44  ;;  %v6951_v1 = vadd.f32 %v6950_v32, %v6949_v15  ;;  %v7907_v32 = vld [vmem:[%s11200_s9 + $0x264] ss:$8 sps:$4 sm:$0xff]  }
 0x804   :  { %v6977_v51 = vpop.f32.mrf.mxu0  ;;  %v7368_v52 = vpop.f32.mrf.mxu1  ;;  %v7910_v30 = vld [vmem:[%s11200_s9 + $0x364] ss:$8 sps:$4 sm:$0xff]  }
 0x805   :  { %v4784_v34 = vadd.f32 %v6976_v23, %v6948_v4 }
 0x806   :  { %v6978_v16 = vpop.f32.mrf.mxu0  ;;  %v4824_v28 = vpop.f32.mrf.mxu1 }
 0x807   :  { %v4833_v26 = vadd.f32 %v7368_v52, %v4784_v34  ;;  %v6979_v41 = vadd.f32 %v6978_v16, %v6977_v51  ;;  %v4825_v14 = vadd.f32 %v4824_v28, %v4776_v10  ;;  %v7905_v34 = vld [vmem:[%s11200_s9 + $0x260] ss:$8 sps:$4 sm:$0xff]   ;;  %v7913_v16 = vld [vmem:[%s11200_s9 + $0x254] ss:$8 sps:$4 sm:$0xff]  }
 0x808   :  { %v7369_v25 = vpop.f32.mrf.mxu1  ;;  %v7908_v10 = vld [vmem:[%s11200_s9 + $0x360] ss:$8 sps:$4 sm:$0xff]   ;;  %v7916_v28 = vld [vmem:[%s11200_s9 + $0x354] ss:$8 sps:$4 sm:$0xff]  }
 0x809   :  { %v4846_v0 = vmul.f32 %v6576_v48, %v4833_v26  ;;  %v4844_v63 = vmul.f32 %v6576_v48, %v4825_v14  ;;  %v4787_v13 = vadd.f32 %v6979_v41, %v6951_v1 }
 0x80a   :  { %v4827_v58 = vpop.f32.mrf.mxu1 }
 0x80b   :  { %v4836_v24 = vadd.f32 %v7369_v25, %v4787_v13  ;;  %v4828_v56 = vadd.f32 %v4827_v58, %v4779_v21  ;;  %v4855_v46 = vadd.f32 %v6577_v43, %v4846_v0  ;;  %v4853_v45 = vadd.f32 %v6577_v43, %v4844_v63  ;;  %v7911_v0 = vld [vmem:[%s11200_s9 + $0x250] ss:$8 sps:$4 sm:$0xff]   ;;  %v7919_v13 = vld [vmem:[%s11200_s9 + $0x244] ss:$8 sps:$4 sm:$0xff]   ;;  %v7920_v58 = vld [vmem:[%s11200_s9 + $0x340] ss:$8 sps:$4 sm:$0xff]  }
 0x80c   :  { %v7914_v63 = vld [vmem:[%s11200_s9 + $0x350] ss:$8 sps:$4 sm:$0xff]   ;;  %v7922_v21 = vld [vmem:[%s11200_s9 + $0x344] ss:$8 sps:$4 sm:$0xff]  }
 0x80d   :  { %v4847_v12 = vmul.f32 %v6576_v48, %v4836_v24  ;;  %v4845_v60 = vmul.f32 %v6576_v48, %v4828_v56  ;;  %v4859_v9 = vmax.f32 %v4855_v46, 0.0  ;;  %v4857_v37 = vmax.f32 %v4853_v45, 0.0  ;;  %v7925_v24 = vld [vmem:[%s11200_s9 + $0x234] ss:$8 sps:$4 sm:$0xff]   ;;  %v7923_v46 = vld [vmem:[%s11200_s9 + $0x230] ss:$8 sps:$4 sm:$0xff]  }
 0x80e   :  { %v7928_v56 = vld [vmem:[%s11200_s9 + $0x334] ss:$8 sps:$4 sm:$0xff]   ;;  %v7926_v45 = vld [vmem:[%s11200_s9 + $0x330] ss:$8 sps:$4 sm:$0xff]  }
 0x80f   :  { %v4856_v35 = vadd.f32 %v6577_v43, %v4847_v12  ;;  %v4854_v53 = vadd.f32 %v6577_v43, %v4845_v60  ;;  %v7917_v43 = vld [vmem:[%s11200_s9 + $0x240] ss:$8 sps:$4 sm:$0xff]   ;;  %v7931_v12 = vld [vmem:[%s11200_s9 + $0x224] ss:$8 sps:$4 sm:$0xff]  }
 0x810   :  { %v7934_v60 = vld [vmem:[%s11200_s9 + $0x324] ss:$8 sps:$4 sm:$0xff]  }
 0x811   :  { %v4860_v17 = vmax.f32 %v4856_v35, 0.0  ;;  %v4858_v54 = vmax.f32 %v4854_v53, 0.0  ;;  %v7929_v35 = vld [vmem:[%s11200_s9 + $0x220] ss:$8 sps:$4 sm:$0xff]  }
 0x812   :  { %v7932_v53 = vld [vmem:[%s11200_s9 + $0x320] ss:$8 sps:$4 sm:$0xff]  }
 0x813   :  { %v4862_v27 = vpack.c.bf16 %v4860_v17, %v4859_v9  ;;  %v4861_v19 = vpack.c.bf16 %v4858_v54, %v4857_v37  ;;  %v7937_v9 = vld [vmem:[%s11200_s9 + $0x214] ss:$8 sps:$4 sm:$0xff]   ;;  %v7935_v17 = vld [vmem:[%s11200_s9 + $0x210] ss:$8 sps:$4 sm:$0xff]  }
 0x814   :  { %v7940_v37 = vld [vmem:[%s11200_s9 + $0x314] ss:$8 sps:$4 sm:$0xff]   ;;  %v7938_v54 = vld [vmem:[%s11200_s9 + $0x310] ss:$8 sps:$4 sm:$0xff]  }
 0x815   :  { %v4864_v36 = vshrl.u32 %v4861_v19, 16  ;;  %v4883_v61 = vshrl.u32 %v4862_v27, 16  ;;  %v4887_v8 = vrot.slane %v4862_v27, 2  ;;  %v4870_v31 = vrot.slane %v4861_v19, 2 }
 0x816   :  { %v4893_v11 = vshll.u32 %v4862_v27, 16  ;;  %v4886_v5 = vrot.slane %v4862_v27, 1  ;;  %v4868_v33 = vrot.slane %v4861_v19, 1  ;;  %v4889_v38 = vrot.slane %v4862_v27, 3 }
 0x817   :  { %v4896_v47 = vshll.u32 %v4883_v61, 16  ;;  %v4902_v29 = vshll.u32 %v4887_v8, 16  ;;  %v4874_v18 = vrot.slane %v4861_v19, 3  ;;  %v4878_v3 = vrot.slane %v4864_v36, 4  ;;  %v7949_v8 = vld [vmem:[%s11200_s9 + $0x2f4] ss:$8 sps:$4 sm:$0xff]  }
 0x818   :  { %v4899_v62 = vshll.u32 %v4886_v5, 16  ;;  %v4891_v22 = vrot.slane %v4883_v61, 4  ;;  %v4908_v2 = vshll.u32 %v4889_v38, 16  ;;  %v4888_v57 = vrot.slane %v4883_v61, 2  ;;  %v7944_v61 = vld [vmem:[%s11200_s9 + $0x300] ss:$8 sps:$4 sm:$0xff]  }
 0x819   :  { %v4932_v39 = vsel %vm10868_vm14, %v4864_v36, %v4896_v47  ;;  %v4934_v40 = vsel %vm10868_vm14, %v4870_v31, %v4902_v29  ;;  %v4931_v15 = vsel %vm10868_vm14, %v4861_v19, %v4893_v11  ;;  %v4890_v42 = vrot.slane %v4862_v27, 4  ;;  %v7952_v31 = vld [vmem:[%s11200_s9 + $0x3f4] ss:$8 sps:$4 sm:$0xff]   ;;  %v7947_v11 = vld [vmem:[%s11200_s9 + $0x2f0] ss:$8 sps:$4 sm:$0xff]  }
 0x81a   :  { %5836 = vmatprep.mubr.bf16.mxu0 %v4932_v39  ;;  %5877 = vmatprep.mubr.bf16.mxu1 %v4934_v40  ;;  %v4933_v44 = vsel %vm10868_vm14, %v4868_v33, %v4899_v62  ;;  %v4914_v55 = vshll.u32 %v4891_v22, 16  ;;  %v4872_v4 = vrot.slane %v4864_v36, 2  ;;  %v4905_v23 = vshll.u32 %v4888_v57, 16  ;;  %v7941_v36 = vld [vmem:[%s11200_s9 + $0x200] ss:$8 sps:$4 sm:$0xff]  }
 0x81b   :  { %5837 = vmatmul.mubr.bf16.vlgmr.msra.gmra.mxu0 %v4931_v15  ;;  %5878 = vmatmul.mubr.bf16.vlgmr.msra.gmra.mxu1 %v4933_v44  ;;  %v4892_v51 = vrot.slane %v4862_v27, 5  ;;  %v4936_v52 = vsel %vm10868_vm14, %v4874_v18, %v4908_v2  ;;  %v4876_v7 = vrot.slane %v4861_v19, 4  ;;  %v4911_v48 = vshll.u32 %v4890_v42, 16  ;;  %v7943_v27 = vld [vmem:[%s11200_s9 + $0x204] ss:$8 sps:$4 sm:$0xff]  }
 0x81c   :  { %5887 = vmatpush1.bf16.msra.mxu0 %v7899_v6  ;;  %5928 = vmatpush1.bf16.msra.mxu1 %v7902_v49  ;;  %v4938_v20 = vsel %vm10868_vm14, %v4878_v3, %v4914_v55  ;;  %v10910_v1 = vsel %vm10868_vm14, %v4872_v4, %v4905_v23  ;;  %v4880_v26 = vrot.slane %v4861_v19, 5  ;;  %v7946_v19 = vld [vmem:[%s11200_s9 + $0x304] ss:$8 sps:$4 sm:$0xff]   ;;  %v7950_v5 = vld [vmem:[%s11200_s9 + $0x3f0] ss:$8 sps:$4 sm:$0xff]  }
 0x81d   :  { %5918 = vmatprep.mubr.bf16.mxu0 %v4936_v52  ;;  %5959 = vmatprep.mubr.bf16.mxu1 %v4938_v20  ;;  %v4917_v41 = vshll.u32 %v4892_v51, 16  ;;  %v10914_v14 = vsel %vm10868_vm14, %v4876_v7, %v4911_v48  ;;  %v7955_v47 = vld [vmem:[%s11200_s9 + $0x2e4] ss:$8 sps:$4 sm:$0xff]   ;;  %v7953_v29 = vld [vmem:[%s11200_s9 + $0x2e0] ss:$8 sps:$4 sm:$0xff]  }
 0x81e   :  { %5888 = vmatprep.subr.bf16.mxu0 %v7907_v32  ;;  %5929 = vmatprep.subr.bf16.mxu1 %v7910_v30  ;;  %v7956_v6 = vld [vmem:[%s11200_s9 + $0x3e0] ss:$8 sps:$4 sm:$0xff]   ;;  %v7961_v33 = vld [vmem:[%s11200_s9 + $0x2d4] ss:$8 sps:$4 sm:$0xff]   ;;  %v7959_v49 = vld [vmem:[%s11200_s9 + $0x2d0] ss:$8 sps:$4 sm:$0xff]  }
 0x81f   :  { %v10918_v25 = vsel %vm10868_vm14, %v4880_v26, %v4917_v41  ;;  %v7964_v38 = vld [vmem:[%s11200_s9 + $0x3d4] ss:$8 sps:$4 sm:$0xff]   ;;  %v7962_v62 = vld [vmem:[%s11200_s9 + $0x3d0] ss:$8 sps:$4 sm:$0xff]   ;;  %v7967_v18 = vld [vmem:[%s11200_s9 + $0x2c4] ss:$8 sps:$4 sm:$0xff]  }
 0x820   :  { %5889 = vmatpush1.bf16.msra.mxu0 %v7905_v34  ;;  %5930 = vmatpush1.bf16.msra.mxu1 %v7908_v10  ;;  %v7970_v3 = vld [vmem:[%s11200_s9 + $0x3c4] ss:$8 sps:$4 sm:$0xff]   ;;  %v7965_v22 = vld [vmem:[%s11200_s9 + $0x2c0] ss:$8 sps:$4 sm:$0xff]   ;;  %v7973_v40 = vld [vmem:[%s11200_s9 + $0x2b4] ss:$8 sps:$4 sm:$0xff]  }
 0x821   :  { %5890 = vmatprep.subr.bf16.mxu0 %v7913_v16  ;;  %5931 = vmatprep.subr.bf16.mxu1 %v7916_v28  ;;  %v7968_v39 = vld [vmem:[%s11200_s9 + $0x3c0] ss:$8 sps:$4 sm:$0xff]   ;;  %v7976_v2 = vld [vmem:[%s11200_s9 + $0x3b4] ss:$8 sps:$4 sm:$0xff]   ;;  %v7971_v57 = vld [vmem:[%s11200_s9 + $0x2b0] ss:$8 sps:$4 sm:$0xff]  }
 0x822   :  { %v7974_v15 = vld [vmem:[%s11200_s9 + $0x3b0] ss:$8 sps:$4 sm:$0xff]   ;;  %v7979_v44 = vld [vmem:[%s11200_s9 + $0x2a4] ss:$8 sps:$4 sm:$0xff]   ;;  %v7977_v32 = vld [vmem:[%s11200_s9 + $0x2a0] ss:$8 sps:$4 sm:$0xff]  }
 0x823   :  { %v7982_v55 = vld [vmem:[%s11200_s9 + $0x3a4] ss:$8 sps:$4 sm:$0xff]   ;;  %v7980_v30 = vld [vmem:[%s11200_s9 + $0x3a0] ss:$8 sps:$4 sm:$0xff]   ;;  %v7985_v42 = vld [vmem:[%s11200_s9 + $0x294] ss:$8 sps:$4 sm:$0xff]  }
 0x824   :  { %5891 = vmatpush1.bf16.msra.mxu0 %v7911_v0  ;;  %5932 = vmatpush1.bf16.msra.mxu1 %v7914_v63  ;;  %v7988_v4 = vld [vmem:[%s11200_s9 + $0x394] ss:$8 sps:$4 sm:$0xff]   ;;  %v7983_v23 = vld [vmem:[%s11200_s9 + $0x290] ss:$8 sps:$4 sm:$0xff]   ;;  %v7991_v52 = vld [vmem:[%s11200_s9 + $0x284] ss:$8 sps:$4 sm:$0xff]  }
 0x825   :  { %5892 = vmatprep.subr.bf16.mxu0 %v7919_v13  ;;  %5933 = vmatprep.subr.bf16.mxu1 %v7922_v21  ;;  %v7986_v51 = vld [vmem:[%s11200_s9 + $0x390] ss:$8 sps:$4 sm:$0xff]   ;;  %v7994_v20 = vld [vmem:[%s11200_s9 + $0x384] ss:$8 sps:$4 sm:$0xff]   ;;  %v7989_v34 = vld [vmem:[%s11200_s9 + $0x280] ss:$8 sps:$4 sm:$0xff]  }
 0x826   :  { %v7992_v10 = vld [vmem:[%s11200_s9 + $0x380] ss:$8 sps:$4 sm:$0xff]   ;;  %v7997_v7 = vld [vmem:[%s11200_s9 + $0x474] ss:$8 sps:$4 sm:$0xff]   ;;  %v7995_v48 = vld [vmem:[%s11200_s9 + $0x470] ss:$8 sps:$4 sm:$0xff]  }
 0x827   :  { %v8000_v16 = vld [vmem:[%s11200_s9 + $0x464] ss:$8 sps:$4 sm:$0xff]   ;;  %v7998_v28 = vld [vmem:[%s11200_s9 + $0x460] ss:$8 sps:$4 sm:$0xff]   ;;  %v8003_v26 = vld [vmem:[%s11200_s9 + $0x454] ss:$8 sps:$4 sm:$0xff]  }
 0x828   :  { %5893 = vmatpush1.bf16.msra.mxu0 %v7917_v43  ;;  %5934 = vmatpush1.bf16.msra.mxu1 %v7920_v58  ;;  %v8001_v41 = vld [vmem:[%s11200_s9 + $0x450] ss:$8 sps:$4 sm:$0xff]   ;;  %v8012_v63 = vld [vmem:[%s11200_s9 + $0x424] ss:$8 sps:$4 sm:$0xff]   ;;  %v8010_v13 = vld [vmem:[%s11200_s9 + $0x420] ss:$8 sps:$4 sm:$0xff]  }
 0x829   :  { %5894 = vmatprep.subr.bf16.mxu0 %v7925_v24  ;;  %5935 = vmatprep.subr.bf16.mxu1 %v7928_v56  ;;  %v8007_v0 = vld [vmem:[%s11200_s9 + $0x430] ss:$8 sps:$4 sm:$0xff]   ;;  %v8015_v21 = vld [vmem:[%s11200_s9 + $0x414] ss:$8 sps:$4 sm:$0xff]   ;;  %v8018_v58 = vld [vmem:[%s11200_s9 + $0x404] ss:$8 sps:$4 sm:$0xff]  }
 0x82a   :  { %v8013_v43 = vld [vmem:[%s11200_s9 + $0x410] ss:$8 sps:$4 sm:$0xff]   ;;  %v8016_v24 = vld [vmem:[%s11200_s9 + $0x400] ss:$8 sps:$4 sm:$0xff]  }
 0x82b   :  { %v8019_v56 = vld [vmem:[%s11202_s11 + $0x78] sm:$0xff]  }
 0x82c   :  { %5895 = vmatpush1.bf16.msra.mxu0 %v7923_v46  ;;  %5936 = vmatpush1.bf16.msra.mxu1 %v7926_v45  ;;  %v8020_v46 = vld [vmem:[%s11202_s11 + $0x38] sm:$0xff]   ;;  %v8021_v45 = vld [vmem:[%s11202_s11 + $0x70] sm:$0xff]  }
 0x82d   :  { %5896 = vmatprep.subr.bf16.mxu0 %v7931_v12  ;;  %5937 = vmatprep.subr.bf16.mxu1 %v7934_v60  ;;  %v8022_v12 = vld [vmem:[%s11202_s11 + $0x30] sm:$0xff]   ;;  %v8024_v60 = vld [vmem:[%s11202_s11 + $0x28] sm:$0xff]  }
 0x830   :  { %5897 = vmatpush1.bf16.msra.mxu0 %v7929_v35  ;;  %5938 = vmatpush1.bf16.msra.mxu1 %v7932_v53  ;;  %v8025_v35 = vld [vmem:[%s11202_s11 + $0x60] sm:$0xff]  }
 0x831   :  { %5898 = vmatprep.subr.bf16.mxu0 %v7937_v9  ;;  %5939 = vmatprep.subr.bf16.mxu1 %v7940_v37  ;;  %v8026_v53 = vld [vmem:[%s11202_s11 + $0x20] sm:$0xff]   ;;  %v8027_v9 = vld [vmem:[%s11202_s11 + $0x58] sm:$0xff]  }
 0x832   :  { %v8028_v37 = vld [vmem:[%s11202_s11 + $0x18] sm:$0xff]  }
 0x834   :  { %5899 = vmatpush1.bf16.msra.mxu0 %v7935_v17  ;;  %5940 = vmatpush1.bf16.msra.mxu1 %v7938_v54  ;;  %v8029_v17 = vld [vmem:[%s11202_s11 + $0x50] sm:$0xff]  }
 0x835   :  { %5900 = vmatprep.subr.bf16.mxu0 %v7943_v27  ;;  %5941 = vmatprep.subr.bf16.mxu1 %v7946_v19  ;;  %v8030_v54 = vld [vmem:[%s11202_s11 + $0x10] sm:$0xff]   ;;  %v8031_v27 = vld [vmem:[%s11202_s11 + $0x48] sm:$0xff]  }
 0x836   :  { %v8032_v19 = vld [vmem:[%s11202_s11 + $0x8] sm:$0xff]  }
 0x838   :  { %5901 = vmatpush1.bf16.msra.mxu0 %v7941_v36  ;;  %5942 = vmatpush1.bf16.msra.mxu1 %v7944_v61  ;;  %v8033_v36 = vld [vmem:[%s11202_s11 + $0x40] sm:$0xff]  }
 0x839   :  { %5902 = vmatprep.subr.bf16.mxu0 %v7949_v8  ;;  %5943 = vmatprep.subr.bf16.mxu1 %v7952_v31  ;;  %v8034_v61 = vld [vmem:[%s11202_s11] sm:$0xff]  }
 0x83c   :  { %5903 = vmatpush2.bf16.msra.mxu0 %v7947_v11  ;;  %5944 = vmatpush2.bf16.msra.mxu1 %v7950_v5 }
 0x83d   :  { %5904 = vmatprep.subr.bf16.mxu0 %v7955_v47  ;;  %5945 = vmatprep.subr.bf16.mxu1 %v7958_v50 }
 0x840   :  { %5905 = vmatpush2.bf16.msra.mxu0 %v7953_v29  ;;  %5946 = vmatpush2.bf16.msra.mxu1 %v7956_v6 }
 0x841   :  { %5906 = vmatprep.subr.bf16.mxu0 %v7961_v33  ;;  %5947 = vmatprep.subr.bf16.mxu1 %v7964_v38 }
 0x844   :  { %5907 = vmatpush2.bf16.msra.mxu0 %v7959_v49  ;;  %5948 = vmatpush2.bf16.msra.mxu1 %v7962_v62 }
 0x845   :  { %5908 = vmatprep.subr.bf16.mxu0 %v7967_v18  ;;  %5949 = vmatprep.subr.bf16.mxu1 %v7970_v3 }
 0x848   :  { %5909 = vmatpush2.bf16.msra.mxu0 %v7965_v22  ;;  %5950 = vmatpush2.bf16.msra.mxu1 %v7968_v39 }
 0x849   :  { %5910 = vmatprep.subr.bf16.mxu0 %v7973_v40  ;;  %5951 = vmatprep.subr.bf16.mxu1 %v7976_v2 }
 0x84c   :  { %5911 = vmatpush2.bf16.msra.mxu0 %v7971_v57  ;;  %5952 = vmatpush2.bf16.msra.mxu1 %v7974_v15  ;;  %v6011_v57 = vlaneseq }
 0x84d   :  { %5912 = vmatprep.subr.bf16.mxu0 %v7979_v44  ;;  %5953 = vmatprep.subr.bf16.mxu1 %v7982_v55 }
 0x84e   :  { %v6012_v15 = vshrl.u32 %v6011_v57, 7 }
 0x850   :  { %5913 = vmatpush2.bf16.msra.mxu0 %v7977_v32  ;;  %5954 = vmatpush2.bf16.msra.mxu1 %v7980_v30  ;;  %v6013_v55 = vsub.s32 0, %v6012_v15  ;;  %v6009_v32 = vld [vmem:[%s11201_s10] ss:$2 sm:$0x3] }
 0x851   :  { %5914 = vmatprep.subr.bf16.mxu0 %v7985_v42  ;;  %5955 = vmatprep.subr.bf16.mxu1 %v7988_v4  ;;  %v6017_v42 = vsub.s32 1, %v6012_v15  ;;  %v6722_v4 = vld [vmem:[%s11201_s10 + $0x1] ss:$2 sm:$0x3] }
 0x854   :  { %5915 = vmatpush2.bf16.msra.mxu0 %v7983_v23  ;;  %5956 = vmatpush2.bf16.msra.mxu1 %v7986_v51  ;;  %v6014_v51 = vrot.slane %v6009_v32, %v6013_v55 }
 0x855   :  { %5916 = vmatprep.subr.bf16.mxu0 %v7991_v52  ;;  %5957 = vmatprep.subr.bf16.mxu1 %v7994_v20 }
 0x858   :  { %5917 = vmatpush2.bf16.msra.mxu0 %v7989_v34  ;;  %5958 = vmatpush2.bf16.msra.mxu1 %v7992_v10  ;;  %v6029_v10 = vrot.slane %v6722_v4, %v6013_v55 }
 0x859   :  { %5968 = vmatprep.subr.bf16.mxu0 %v7997_v7  ;;  %6986 = vmatprep.subr.bf16.mxu1 %v8019_v56  ;;  %v6018_v7 = vrot.slane %v6009_v32, %v6017_v42 }
 0x85b   :  { %5919 = vmatmul.mubr.bf16.vlgmr.msra.gmra.mxu0 %v10910_v1  ;;  %5960 = vmatmul.mubr.bf16.vlgmr.msra.gmra.mxu1 %v10914_v14  ;;  %v8006_v1 = vld [vmem:[%s11200_s9 + $0x444] ss:$8 sps:$4 sm:$0xff]   ;;  %v8009_v14 = vld [vmem:[%s11200_s9 + $0x434] ss:$8 sps:$4 sm:$0xff]  }
 0x85c   :  { %5969 = vmatpush1.bf16.msra.mxu0 %v7995_v48  ;;  %6000 = vmatprep.mubr.bf16.mxu0 %v11281_v59  ;;  %v8004_v59 = vld [vmem:[%s11200_s9 + $0x440] ss:$8 sps:$4 sm:$0xff]  }
 0x85d   :  { %5970 = vmatprep.subr.bf16.mxu0 %v8000_v16  ;;  %6987 = vmatpush3.bf16.msra.mxu1 %v8020_v46 }
 0x85e   :  { %6988 = vmatprep.subr.bf16.mxu1 %v8021_v45 }
 0x860   :  { %5971 = vmatpush1.bf16.msra.mxu0 %v7998_v28 }
 0x861   :  { %5972 = vmatprep.subr.bf16.mxu0 %v8003_v26  ;;  %6989 = vmatpush3.bf16.msra.mxu1 %v8022_v12  ;;  %v6033_v26 = vrot.slane %v6722_v4, %v6017_v42 }
 0x864   :  { %5973 = vmatpush1.bf16.msra.mxu0 %v8001_v41 }
 0x865   :  { %5974 = vmatprep.subr.bf16.mxu0 %v8006_v1 }
 0x868   :  { %5975 = vmatpush1.bf16.msra.mxu0 %v8004_v59 }
 0x869   :  { %5976 = vmatprep.subr.bf16.mxu0 %v8009_v14 }
 0x86c   :  { %5977 = vmatpush1.bf16.msra.mxu0 %v8007_v0 }
 0x86d   :  { %5978 = vmatprep.subr.bf16.mxu0 %v8012_v63 }
 0x870   :  { %5979 = vmatpush1.bf16.msra.mxu0 %v8010_v13 }
 0x871   :  { %5980 = vmatprep.subr.bf16.mxu0 %v8015_v21 }
 0x874   :  { %5981 = vmatpush1.bf16.msra.mxu0 %v8013_v43 }
 0x875   :  { %5982 = vmatprep.subr.bf16.mxu0 %v8018_v58 }
 0x878   :  { %5983 = vmatpush1.bf16.msra.mxu0 %v8016_v24  ;;  %v6723_v24 = vld [vmem:[#allocation2] ss:$0 sm:$0xff] }
 0x87b   :  { %6001 = vmatmul.mubr.bf16.vlgmr.msra.gmra.mxu0 %v10918_v25  ;;  %v8023_v25 = vld [vmem:[%s11202_s11 + $0x68] sm:$0xff]  }
 0x87c   :  { %6990 = vmatprep.subr.bf16.mxu1 %v8023_v25 }
 0x87d   :  { %6991 = vmatpush3.bf16.msra.mxu1 %v8024_v60 }
 0x87e   :  { %6992 = vmatprep.subr.bf16.mxu1 %v8025_v35 }
 0x881   :  { %6993 = vmatpush3.bf16.msra.mxu1 %v8026_v53 }
 0x882   :  { %6994 = vmatprep.subr.bf16.mxu1 %v8027_v9 }
 0x885   :  { %6995 = vmatpush3.bf16.msra.mxu1 %v8028_v37 }
 0x886   :  { %6996 = vmatprep.subr.bf16.mxu1 %v8029_v17 }
 0x889   :  { %6997 = vmatpush3.bf16.msra.mxu1 %v8030_v54 }
 0x88a   :  { %6998 = vmatprep.subr.bf16.mxu1 %v8031_v27 }
 0x88d   :  { %6999 = vmatpush3.bf16.msra.mxu1 %v8032_v19 }
 0x88e   :  { %7000 = vmatprep.subr.bf16.mxu1 %v8033_v36 }
 0x891   :  { %7001 = vmatpush3.bf16.msra.mxu1 %v8034_v61 }
 0x8db   :  { %v5838_v8 = vpop.f32.mrf.mxu0  ;;  %v5879_v31 = vpop.f32.mrf.mxu1 }
 0x8dc   :  { %v5880_v11 = vadd.f32 %v5879_v31, %v5838_v8 }
 0x8dd   :  { %v5840_v5 = vpop.f32.mrf.mxu0  ;;  %v5881_v47 = vpop.f32.mrf.mxu1 }
 0x8de   :  { %v5882_v50 = vadd.f32 %v5881_v47, %v5840_v5 }
 0x8df   :  { %v5842_v29 = vpop.f32.mrf.mxu0  ;;  %v5883_v6 = vpop.f32.mrf.mxu1 }
 0x8e1   :  { %v5843_v33 = vpop.f32.mrf.mxu0  ;;  %v5884_v38 = vpop.f32.mrf.mxu1 }
 0x91b   :  { %v5920_v49 = vpop.f32.mrf.mxu0  ;;  %v5961_v62 = vpop.f32.mrf.mxu1 }
 0x91c   :  { %v5921_v44 = vadd.f32 %v5920_v49, %v5880_v11 }
 0x91d   :  { %v5922_v18 = vpop.f32.mrf.mxu0  ;;  %v5963_v3 = vpop.f32.mrf.mxu1 }
 0x91e   :  { %v5923_v30 = vadd.f32 %v5922_v18, %v5882_v50  ;;  %v5962_v23 = vadd.f32 %v5961_v62, %v5921_v44 }
 0x91f   :  { %v5924_v22 = vpop.f32.mrf.mxu0  ;;  %v5965_v39 = vpop.f32.mrf.mxu1 }
 0x920   :  { %v5964_v20 = vadd.f32 %v5963_v3, %v5923_v30 }
 0x921   :  { %v5925_v40 = vpop.f32.mrf.mxu0  ;;  %v5966_v2 = vpop.f32.mrf.mxu1 }
 0x93b   :  { %v6002_v52 = vpop.f32.mrf.mxu0 }
 0x93c   :  { %v6003_v34 = vadd.f32 %v6002_v52, %v5962_v23 }
 0x93d   :  { %v6004_v48 = vpop.f32.mrf.mxu0 }
 0x93e   :  { %v6021_v16 = vmul.f32 %v6014_v51, %v6003_v34  ;;  %v6005_v28 = vadd.f32 %v6004_v48, %v5964_v20 }
 0x93f   :  { %v6006_v41 = vpop.f32.mrf.mxu0 }
 0x940   :  { %v6036_v1 = vadd.f32 %v6029_v10, %v6021_v16  ;;  %v6022_v59 = vmul.f32 %v6018_v7, %v6005_v28 }
 0x941   :  { %v6007_v14 = vpop.f32.mrf.mxu0 }
 0x942   :  { %v6037_v0 = vadd.f32 %v6033_v26, %v6022_v59  ;;  %v6038_v63 = vmax.f32 %v6036_v1, 0.0 }
 0x944   :  { %v6039_v13 = vmax.f32 %v6037_v0, 0.0  ;;  %v6040_v43 = vpack.c.bf16 %v6038_v63, %v6038_v63 }
 0x946   :  { %v6041_v21 = vpack.c.bf16 %v6039_v13, %v6039_v13 }
 0x948   :  { %6209 = vmatprep.mubr.bf16.mxu1 %v6041_v21 }
 0x949   :  { %6210 = vmatmul.mubr.bf16.vlgmr.msra.gmra.mxu1 %v6040_v43 }
 0xa09   :  { %v7002_v58 = vpop.f32.mrf.mxu1 }
 0xa0b   :  { %v7003_v56 = vpop.f32.mrf.mxu1 }
 0xa0c   :  { %v7004_v46 = vadd.f32 %v7003_v56, %v7002_v58 }
 0xa0d   :  { %v7005_v45 = vpop.f32.mrf.mxu1 }
 0xa0e   :  { %v6212_v12 = vadd.f32 %v7004_v46, %v6723_v24 }
 0xa0f   :  { %v7006_v25 = vpop.f32.mrf.mxu1 }
 0xa10   :  { %v6740_v60 = vmul.f32 -1.442695, %v6212_v12 }
 0xa12   :  { %8035 = vpow2.f32 %v6740_v60 }
 0xa1f   :  { %v8036_v35 = vpop.eup %8035 }
 0xa20   :  { %v6220_v53 = vadd.f32 1.0, %v8036_v35 }
 0xa22   :  { %8037 = vrcp.f32 %v6220_v53 }
 0xa2f   :  { %v8038_v9 = vpop.eup %8037 }
 0xa30   :  { %6224 = vst.msk [vmem:[%s11204_s13] sm:$0x3] %vm6223_vm15, %v8038_v9 }
 0xa31   :  { %6229 = vsyncpa [#allocation4], 1 }
 0xa32   :  { %6230 = vsyncpa [#allocation6], 1 }

</bundles_post_ra>
